<compile_context>
chip_gen: v7x
topology: tpu7x:2x2x1
jax: 0.10.0
libtpu: 0.0.40
codegen_flags: <defaults>
</compile_context>

<pallas_src>
import functools

import jax
import jax.numpy as jnp
from jax import lax
from jax.experimental import pallas as pl
from jax.experimental.pallas import tpu as pltpu

# The torch module draws shift_direction from random.random() in __init__.
# We fix it deterministically here (both +1 and -1 paths are implemented).
SHIFT = 1

M, J, N, H = 128, 64, 28, 28          # batch, in-channels, n, h (fixed by the module)
K, I = 2, 128                         # weight "k" and "i" output dims
L = 3                                 # conv taps
C = L * J                             # contraction dim = 192
P = H * N                             # flattened spatial p = o*28 + n  (o == h) = 784
B = 8                                 # samples per grid step
GRID = M // B                         # 16 grid steps


def _kernel(a_ref, w_ref, o_ref, *, shift):
    # a_ref: (B, 64, 784) bf16, lanes p = o*28 + n
    # w_ref: (256, 192) bf16, rows r = k*128 + i, cols c = l*64 + j
    # o_ref: (B, 128, 784) f32, lanes p = o*28 + n
    w = w_ref[...]

    # Lane-position masks (hoisted out of the per-sample loop).
    p_iota = lax.broadcasted_iota(jnp.int32, (1, P), 1)
    o_first = p_iota < H               # o == 0
    o_last = p_iota >= P - H           # o == 27
    n_first = (p_iota % H) == 0        # n == 0
    n_last = (p_iota % H) == H - 1     # n == 27

    def body(b, carry):
        a = a_ref[b]                                     # (64, 784) bf16

        # Conv taps along o (zero padding): l=0 -> o-1, l=1 -> o, l=2 -> o+1.
        t0 = jnp.roll(a, H, axis=1)                      # a[:, p-28]
        t0 = jnp.where(o_first, jnp.zeros_like(t0), t0)  # zero at o == 0
        t2 = jnp.roll(a, -H, axis=1)                     # a[:, p+28]
        t2 = jnp.where(o_last, jnp.zeros_like(t2), t2)   # zero at o == 27
        a_full = jnp.concatenate([t0, a, t2], axis=0)    # (192, 784), c = l*64+j

        # einsum 'mjnol,jlki->mnoki' for this sample as one MXU matmul.
        t3 = jnp.dot(w, a_full,
                     preferred_element_type=jnp.float32)  # (256, 784) f32
        k0 = t3[:I, :]                                    # k = 0
        k1 = t3[I:, :]                                    # k = 1

        if shift == 1:
            # roll(+1) over flattened (o,k) + sum over k:
            #   t4[o,n] = k0[o,n] + k1[(o-1)%28, n]  ->  full-lane roll by +28
            t4 = k0 + jnp.roll(k1, H, axis=1)
            # roll(+1) over n:  t5[o,n] = t4[o, (n-1)%28]
            t5 = jnp.where(n_first,
                           jnp.roll(t4, -(H - 1), axis=1),
                           jnp.roll(t4, 1, axis=1))
        else:
            #   t4[o,n] = k1[o,n] + k0[(o+1)%28, n]  ->  full-lane roll by -28
            t4 = k1 + jnp.roll(k0, -H, axis=1)
            #   t5[o,n] = t4[o, (n+1)%28]
            t5 = jnp.where(n_last,
                           jnp.roll(t4, H - 1, axis=1),
                           jnp.roll(t4, -1, axis=1))

        o_ref[b] = t5
        return carry

    lax.fori_loop(0, B, body, 0)


def kernel_generated_1_forward(x, w, *, shift=SHIFT):
    # x: (128, 64, 28, 28) f32 == the torch input viewed as (128, 1792, 28, 1)
    # w: (64, 3, 2, 128)  f32 == self.weights[0]
    assert x.shape == (M, J, N, H) and w.shape == (J, L, K, I)

    # Only wrapper data movement: a[m, j, o*28 + n] = x[m, j, n, o], cast bf16.
    a = jnp.transpose(x, (0, 1, 3, 2)).reshape(M, J, P).astype(jnp.bfloat16)
    # w_mat[k*128 + i, l*64 + j] = w[j, l, k, i], cast bf16.
    w_mat = jnp.transpose(w, (2, 3, 1, 0)).reshape(K * I, C).astype(jnp.bfloat16)

    out = pl.pallas_call(
        functools.partial(_kernel, shift=shift),
        out_shape=jax.ShapeDtypeStruct((M, I, P), jnp.float32),
        grid_spec=pltpu.PrefetchScalarGridSpec(
            num_scalar_prefetch=0,
            grid=(GRID,),
            in_specs=[
                pl.BlockSpec((B, J, P), lambda t: (t, 0, 0)),     # activations
                pl.BlockSpec((K * I, C), lambda t: (0, 0)),       # weights (resident)
            ],
            out_specs=pl.BlockSpec((B, I, P), lambda t: (t, 0, 0)),
        ),
        compiler_params=pltpu.CompilerParams(
            dimension_semantics=("parallel",),
            vmem_limit_bytes=32 * 1024 * 1024,
        ),
    )(a, w_mat)

    # out[m, i, o*28 + n] reshapes directly to (m, i, o, n) == torch output.
    return out.reshape(M, I, H, N)


def torch_reference(x, w, shift):
    """Pure-JAX (f32, HIGHEST precision) transcription of the torch forward."""
    t2 = x.reshape(M, J * N, H, 1)
    t2p = jnp.pad(t2, ((0, 0), (0, 0), (1, 1), (0, 0)))
    # F.unfold kernel (3,1), padding (1,0): (M, 1792*3, 28), block index = c*3 + kh
    cols = jnp.stack([t2p[:, :, kh:kh + H, 0] for kh in range(3)], axis=2)
    t2u = cols.reshape(M, J * N * 3, H)
    t2r = t2u.reshape(M, J, N, 3, H)
    t2r = jnp.transpose(t2r, (0, 1, 2, 4, 3))                  # (m, j, n, o, l)
    t3 = jnp.einsum('mjnol,jlki->mnoki', t2r, w,
                    precision=jax.lax.Precision.HIGHEST)
    t3 = jnp.transpose(t3, (0, 1, 2, 4, 3))                    # (m, n, o, i, k)
    t4 = jnp.transpose(t3, (0, 1, 3, 2, 4)).reshape(M, N, I, 2 * H)
    t4 = jnp.roll(t4, shift, axis=3)
    t4 = t4.reshape(M, N, I, H, 2).sum(axis=4)
    t5 = jnp.roll(t4, shift, axis=1)
    return jnp.transpose(t5, (0, 2, 3, 1))                     # (m, i, o, n)


if __name__ == "__main__":
    # Shapes are fixed by the module's hard-coded reshapes (128, 1792, 28, 1)
    # and weight (64, 3, 2, 128); they cannot be shrunk.
    key = jax.random.PRNGKey(0)
    kx, kw = jax.random.split(key)
    x = jax.random.normal(kx, (M, J, N, H), dtype=jnp.float32)
    w = jax.random.normal(kw, (J, L, K, I), dtype=jnp.float32)

    y = jax.jit(kernel_generated_1_forward)(x, w)
    y = jax.block_until_ready(y)
    assert y.shape == (M, I, H, N) and y.dtype == jnp.float32

    y_ref = jax.block_until_ready(
        jax.jit(functools.partial(torch_reference, shift=SHIFT))(x, w))
    # bf16 MXU operands (per perf review): check relative error against the
    # f32 reference instead of a tight absolute bound.
    rel = float(jnp.max(jnp.abs(y - y_ref)) / jnp.max(jnp.abs(y_ref)))
    assert rel < 2e-2, f"relative max err {rel}"
    print("KERNEL_OK")
</pallas_src>

<mosaic_0001>
module attributes {stable_mosaic.version = 11 : i64} {
  func.func @_kernel(%arg0: i32, %arg1: memref<8x64x784xbf16, #tpu.memory_space<vmem>>, %arg2: memref<256x192xbf16, #tpu.memory_space<vmem>>, %arg3: memref<8x128x784xf32, #tpu.memory_space<vmem>>) attributes {dimension_semantics = [#tpu.dimension_semantics<parallel>], iteration_bounds = array<i64: 16>, scalar_prefetch = 0 : i64, scratch_operands = 0 : i64, tpu.core_type = #tpu.core_type<tc>, window_params = [{transform_indices = @transform_0, window_bounds = array<i64: 8, 64, 784>}, {pipeline_mode = #tpu.pipeline_mode<synchronous>, transform_indices = @transform_1, window_bounds = array<i64: 256, 192>}, {transform_indices = @transform_2, window_bounds = array<i64: 8, 128, 784>}]} {
    %c0 = arith.constant 0 : index
    %c0_0 = arith.constant 0 : index
    %0 = vector.load %arg2[%c0, %c0_0] : memref<256x192xbf16, #tpu.memory_space<vmem>>, vector<256x192xbf16>
    %1 = tpu.iota {dimensions = array<i32: 1>} : vector<1x784xi32>
    %c28_i32 = arith.constant 28 : i32
    %2 = vector.broadcast %c28_i32 : i32 to vector<1x784xi32>
    %3 = arith.cmpi slt, %1, %2 : vector<1x784xi32>
    %c756_i32 = arith.constant 756 : i32
    %4 = vector.broadcast %c756_i32 : i32 to vector<1x784xi32>
    %5 = arith.cmpi sge, %1, %4 : vector<1x784xi32>
    %c28_i32_1 = arith.constant 28 : i32
    %c0_i32 = arith.constant 0 : i32
    %6 = arith.cmpi eq, %c28_i32_1, %c0_i32 : i32
    %c1_i32 = arith.constant 1 : i32
    %7 = arith.select %6, %c1_i32, %c28_i32_1 : i32
    %8 = vector.broadcast %7 : i32 to vector<1x784xi32>
    %9 = arith.remsi %1, %8 : vector<1x784xi32>
    %c0_i32_2 = arith.constant 0 : i32
    %10 = vector.broadcast %c0_i32_2 : i32 to vector<1x784xi32>
    %11 = arith.cmpi ne, %9, %10 : vector<1x784xi32>
    %c0_i32_3 = arith.constant 0 : i32
    %12 = vector.broadcast %c0_i32_3 : i32 to vector<1x784xi32>
    %13 = arith.cmpi slt, %9, %12 : vector<1x784xi32>
    %c0_i32_4 = arith.constant 0 : i32
    %14 = arith.cmpi slt, %7, %c0_i32_4 : i32
    %15 = vector.broadcast %14 : i1 to vector<1x784xi1>
    %16 = vector.broadcast %15 : vector<1x784xi1> to vector<1x784xi1>
    %17 = arith.xori %13, %16 : vector<1x784xi1>
    %18 = arith.andi %17, %11 : vector<1x784xi1>
    %19 = vector.broadcast %7 : i32 to vector<1x784xi32>
    %20 = arith.addi %9, %19 : vector<1x784xi32>
    %21 = arith.select %18, %20, %9 : vector<1x784xi1>, vector<1x784xi32>
    %c0_i32_5 = arith.constant 0 : i32
    %22 = vector.broadcast %c0_i32_5 : i32 to vector<1x784xi32>
    %23 = arith.cmpi eq, %21, %22 : vector<1x784xi32>
    %c0_i32_6 = arith.constant 0 : i32
    %c8_i32 = arith.constant 8 : i32
    %24 = arith.addi %c0_i32_6, %c8_i32 : i32
    %c1_i32_7 = arith.constant 1 : i32
    scf.for %arg4 = %c0_i32_6 to %24 step %c1_i32_7  : i32 {
      %25 = arith.index_cast %arg4 : i32 to index
      %c0_9 = arith.constant 0 : index
      %c0_10 = arith.constant 0 : index
      %26 = vector.load %arg1[%25, %c0_9, %c0_10] : memref<8x64x784xbf16, #tpu.memory_space<vmem>>, vector<1x64x784xbf16>
      %27 = vector.shape_cast %26 : vector<1x64x784xbf16> to vector<64x784xbf16>
      %28 = vector.extract_strided_slice %27 {offsets = [0, 756], sizes = [64, 28], strides = [1, 1]} : vector<64x784xbf16> to vector<64x28xbf16>
      %29 = vector.extract_strided_slice %27 {offsets = [0, 0], sizes = [64, 756], strides = [1, 1]} : vector<64x784xbf16> to vector<64x756xbf16>
      %30 = tpu.concatenate %28, %29 in 1 : vector<64x28xbf16>, vector<64x756xbf16> -> vector<64x784xbf16>
      %cst = arith.constant 0.000000e+00 : bf16
      %31 = vector.broadcast %cst : bf16 to vector<64x784xbf16>
      %32 = vector.shape_cast %3 : vector<1x784xi1> to vector<1x784xi1>
      %33 = vector.broadcast %32 : vector<1x784xi1> to vector<64x784xi1>
      %34 = arith.select %33, %31, %30 : vector<64x784xi1>, vector<64x784xbf16>
      %35 = vector.extract_strided_slice %27 {offsets = [0, 28], sizes = [64, 756], strides = [1, 1]} : vector<64x784xbf16> to vector<64x756xbf16>
      %36 = vector.extract_strided_slice %27 {offsets = [0, 0], sizes = [64, 28], strides = [1, 1]} : vector<64x784xbf16> to vector<64x28xbf16>
      %37 = tpu.concatenate %35, %36 in 1 : vector<64x756xbf16>, vector<64x28xbf16> -> vector<64x784xbf16>
      %cst_11 = arith.constant 0.000000e+00 : bf16
      %38 = vector.broadcast %cst_11 : bf16 to vector<64x784xbf16>
      %39 = vector.shape_cast %5 : vector<1x784xi1> to vector<1x784xi1>
      %40 = vector.broadcast %39 : vector<1x784xi1> to vector<64x784xi1>
      %41 = arith.select %40, %38, %37 : vector<64x784xi1>, vector<64x784xbf16>
      %42 = tpu.concatenate %34, %27, %41 in 0 : vector<64x784xbf16>, vector<64x784xbf16>, vector<64x784xbf16> -> vector<192x784xbf16>
      %cst_12 = arith.constant dense<0.000000e+00> : vector<256x784xf32>
      %43 = tpu.matmul %0, %42, %cst_12 {dimension_numbers = #tpu.dot_dimension_numbers<[1], [0], [0], [1], [0, 0, 1, 1], [], []>} : vector<256x192xbf16>, vector<192x784xbf16>, vector<256x784xf32> -> vector<256x784xf32>
      %44 = vector.extract_strided_slice %43 {offsets = [0, 0], sizes = [128, 784], strides = [1, 1]} : vector<256x784xf32> to vector<128x784xf32>
      %45 = vector.extract_strided_slice %43 {offsets = [128, 0], sizes = [128, 784], strides = [1, 1]} : vector<256x784xf32> to vector<128x784xf32>
      %46 = vector.extract_strided_slice %45 {offsets = [0, 756], sizes = [128, 28], strides = [1, 1]} : vector<128x784xf32> to vector<128x28xf32>
      %47 = vector.extract_strided_slice %45 {offsets = [0, 0], sizes = [128, 756], strides = [1, 1]} : vector<128x784xf32> to vector<128x756xf32>
      %48 = tpu.concatenate %46, %47 in 1 : vector<128x28xf32>, vector<128x756xf32> -> vector<128x784xf32>
      %49 = arith.addf %44, %48 : vector<128x784xf32>
      %50 = vector.extract_strided_slice %49 {offsets = [0, 27], sizes = [128, 757], strides = [1, 1]} : vector<128x784xf32> to vector<128x757xf32>
      %51 = vector.extract_strided_slice %49 {offsets = [0, 0], sizes = [128, 27], strides = [1, 1]} : vector<128x784xf32> to vector<128x27xf32>
      %52 = tpu.concatenate %50, %51 in 1 : vector<128x757xf32>, vector<128x27xf32> -> vector<128x784xf32>
      %53 = vector.extract_strided_slice %49 {offsets = [0, 783], sizes = [128, 1], strides = [1, 1]} : vector<128x784xf32> to vector<128x1xf32>
      %54 = vector.extract_strided_slice %49 {offsets = [0, 0], sizes = [128, 783], strides = [1, 1]} : vector<128x784xf32> to vector<128x783xf32>
      %55 = tpu.concatenate %53, %54 in 1 : vector<128x1xf32>, vector<128x783xf32> -> vector<128x784xf32>
      %56 = vector.shape_cast %23 : vector<1x784xi1> to vector<1x784xi1>
      %57 = vector.broadcast %56 : vector<1x784xi1> to vector<128x784xi1>
      %58 = arith.select %57, %52, %55 : vector<128x784xi1>, vector<128x784xf32>
      %59 = arith.index_cast %arg4 : i32 to index
      %c0_13 = arith.constant 0 : index
      %c0_14 = arith.constant 0 : index
      %60 = vector.load %arg3[%59, %c0_13, %c0_14] : memref<8x128x784xf32, #tpu.memory_space<vmem>>, vector<1x128x784xf32>
      %61 = vector.shape_cast %60 : vector<1x128x784xf32> to vector<128x784xf32>
      %62 = vector.shape_cast %58 : vector<128x784xf32> to vector<1x128x784xf32>
      tpu.vector_store %arg3[%59, %c0_13, %c0_14], %62 {strides = array<i32>} : memref<8x128x784xf32, #tpu.memory_space<vmem>>, vector<1x128x784xf32>,
    }
    %c8_i32_8 = arith.constant 8 : i32
    return
  }
  func.func @transform_0(%arg0: i32) -> (i32, i32, i32) {
    %c0_i32 = arith.constant 0 : i32
    %c0_i32_0 = arith.constant 0 : i32
    %c0_i32_1 = arith.constant 0 : i32
    return %arg0, %c0_i32, %c0_i32_0 : i32, i32, i32
  }
  func.func @transform_1(%arg0: i32) -> (i32, i32) {
    %c0_i32 = arith.constant 0 : i32
    %c0_i32_0 = arith.constant 0 : i32
    %c0_i32_1 = arith.constant 0 : i32
    return %c0_i32, %c0_i32_0 : i32, i32
  }
  func.func @transform_2(%arg0: i32) -> (i32, i32, i32) {
    %c0_i32 = arith.constant 0 : i32
    %c0_i32_0 = arith.constant 0 : i32
    %c0_i32_1 = arith.constant 0 : i32
    return %arg0, %c0_i32, %c0_i32_0 : i32, i32, i32
  }
}

</mosaic_0001>

<bundles_post_ra>
// kernel: kernel_generated_1_forward.1
= control target key start
LH: loop header
LB: loop body
LE: loop exit
PB: predicated region body
PF: predicated region fallthrough
CT: control target
= control target key end

     0   :  { %7 = vsyncpa [#allocation3], 0  ;;  %s8663_s0 = inlined_call_operand.vmem [shape: bf16[128,64,784], index: 0, kind: input, shape index: {}]   ;;  %s8664_s1 = inlined_call_operand.vmem [shape: bf16[256,192], index: 1, kind: input, shape index: {}]   ;;  %s8665_s2 = inlined_call_operand.hbm [shape: f32[128,128,784], index: 2, kind: output, shape index: {}]  }
   0x1   :  { %9 = vsyncpa [#allocation3 + $0x1], 0  ;;  %s4512_s9 = smov 0   ;;  %s4514_s10 = smov 0  }
   0x2   :  { %s4516_s11 = smov 0   ;;  %s4518_s12 = smov 0  }
   0x3 LB: > { %s4533_s13 = sadd.s32 4294967295, %s4476_s12   ;;  %s4034_s14 = sadd.s32 4294967294, %s4476_s12   ;;  %s4476_s12 = sphi %s4518_s12, %s9498_s12   ;;  %s4472_s11 = sphi %s4516_s11, %s9497_s11   ;;  %s4468_s10 = sphi %s4514_s10, %s9496_s10   ;;  %s4464_s9 = sphi %s4512_s9, %s9495_s9  }
   0x4   : > { %s4537_s15 = sadd.s32 1, %s4476_s12   ;;  %s69_s16 = sadd.s32 1, %s4472_s11 }
   0x5   : > { %s66_s17 = ssub.s32 %s4476_s12, %s4537_s15  ;;  %p79_p0 = scmp.ne.s32.totalorder %s4472_s11, %s4468_s10 }
   0x6   : > { %p67_p1 = scmp.eq.s32.totalorder %s66_s17, 0  ;;  %p80_p2 = scmp.eq.s32.totalorder %s4533_s13, 15 }
   0x7   : > { %p85_p3 = scmp.ne.s32.totalorder %s4468_s10, %s4464_s9  ;;  %p86_p4 = scmp.eq.s32.totalorder %s4034_s14, 15 }
   0x8   : > { %s4548_s18 = scalar_select %p67_p1, %s4472_s11, %s69_s16  }
   0x9   : > { %p4550_p5 = por %p80_p2, %p79_p0  ;;  %p4554_p6 = por %p86_p4, %p85_p3 }
   0xa   : > { %p4037_p7 = scmp.ge.s32.totalorder %s4476_s12, 1  ;;  %p117_p8 = scmp.lt.s32.totalorder %s4476_s12, 17 }
   0xc   : > { %p118_p9 = pnand %p4037_p7, %p117_p8 }
   0xe   : > { %121 = sbr.rel (%p118_p9) target bundleno = 1468 (0x5bc), region = 28 }
  0x15   : > { %s137_s21 = sand.u32 1, %s4468_s10   ;;  %s4038_s22 = sshll.u32 %s4533_s13, 3  ;;  %v4565_v0 = vld [vmem:[%s8664_s1] sm:$0xff]  ;;  %v4570_v1 = vld [vmem:[%s8664_s1 + $0x8] sm:$0xff]  ;;  %v4575_v2 = vld [vmem:[%s8664_s1 + $0x10] sm:$0xff]  ;;  %v8666_v3 = vlaneseq  ;;  %v4482_v43 = vmov 0  }
  0x16   : > { %8873 = vst [vmem:[#allocation5_spill] sm:$0xff] %v4565_v0  ;;  %8874 = vst [vmem:[#allocation6_spill] sm:$0xff] %v4570_v1  ;;  %s4579_s29 = smul.u32 7168, %s137_s21  ;;  %p141_p10 = scmp.lt.s32.totalorder %s4038_s22, 127  ;;  %v4584_v4 = vld [vmem:[%s8664_s1 + $0x18] sm:$0xff]  ;;  %v4589_v5 = vld [vmem:[%s8664_s1 + $0x20] sm:$0xff] }
  0x17   : > { %8875 = vst [vmem:[#allocation7_spill] sm:$0xff] %v4575_v2  ;;  %8876 = vst [vmem:[#allocation8_spill] sm:$0xff] %v4584_v4  ;;  %v4594_v6 = vld [vmem:[%s8664_s1 + $0x28] sm:$0xff]  ;;  %v4599_v7 = vld [vmem:[%s8664_s1 + $0x30] sm:$0xff]  ;;  %v4612_v10 = vand.u32 127, %v8666_v3  ;;  %s4841_s28 = smov 0  }
  0x18   : > { %8877 = vst [vmem:[#allocation9_spill] sm:$0xff] %v4589_v5  ;;  %8878 = vst [vmem:[#allocation10_spill] sm:$0xff] %v4594_v6  ;;  %v4604_v8 = vld [vmem:[%s8664_s1 + $0x38] sm:$0xff]  ;;  %v4609_v9 = vld [vmem:[%s8664_s1 + $0x40] sm:$0xff]  ;;  %s9500_s22 = smov (!%p141_p10, %s4038_s22), 127  ;;  %s139_s26 = scalar_lea.vmem [#allocation2], %s4579_s29 }
  0x19   : > { %8879 = vst [vmem:[#allocation11_spill] sm:$0xff] %v4599_v7  ;;  %8880 = vst [vmem:[#allocation12_spill] sm:$0xff] %v4604_v8  ;;  %v4617_v11 = vld [vmem:[%s8664_s1 + $0x48] sm:$0xff]  ;;  %v4622_v12 = vld [vmem:[%s8664_s1 + $0x50] sm:$0xff]  ;;  %v185_v17 = vadd.s32 128, %v4612_v10  ;;  %v4661_v21 = vadd.s32 640, %v4612_v10 }
  0x1a   : > { %8881 = vst [vmem:[#allocation13_spill] sm:$0xff] %v4609_v9  ;;  %8882 = vst [vmem:[#allocation14_spill] sm:$0xff] %v4612_v10  ;;  %v4627_v13 = vld [vmem:[%s8664_s1 + $0x58] sm:$0xff]  ;;  %v4632_v14 = vld [vmem:[%s8664_s1 + $0x60] sm:$0xff]  ;;  %s4293_s27 = smul.u32 224, %s9500_s22  ;;  %v186_v25 = vadd.s32 256, %v4612_v10 }
  0x1b   : > { %8883 = vst [vmem:[#allocation15_spill] sm:$0xff] %v4617_v11  ;;  %8884 = vst [vmem:[#allocation16_spill] sm:$0xff] %v4622_v12  ;;  %v4637_v15 = vld [vmem:[%s8664_s1 + $0x68] sm:$0xff]  ;;  %v4642_v16 = vld [vmem:[%s8664_s1 + $0x70] sm:$0xff]  ;;  %vm203_vm1 = vcmp.ge.s32.totalorder %v4661_v21, 756  ;;  %v187_v34 = vadd.s32 384, %v4612_v10 }
  0x1c   : > { %8885 = vst [vmem:[#allocation17_spill] sm:$0xff] %v4627_v13  ;;  %8886 = vst [vmem:[#allocation18_spill] sm:$0xff] %v4632_v14  ;;  %v4648_v18 = vld [vmem:[%s8664_s1 + $0x78] sm:$0xff]  ;;  %v4653_v19 = vld [vmem:[%s8664_s1 + $0x80] sm:$0xff]  ;;  %v4697_v29 = vmul.u32.u64.low 2454267026, %v4612_v10  ;;  %v4698_v30 = vmul.u32.u64.high 2454267026, %v4612_v10, %v4697_v29  ;;  %s4703_s25 = scalar_lea.vmem %s8663_s0, %s4293_s27 }
  0x1d   : > { %8887 = vst [vmem:[#allocation19_spill] sm:$0xff] %v4637_v15  ;;  %8888 = vst [vmem:[#allocation20_spill] sm:$0xff] %v4642_v16  ;;  %v4658_v20 = vld [vmem:[%s8664_s1 + $0x88] sm:$0xff]  ;;  %v4666_v22 = vld [vmem:[%s8664_s1 + $0x90] sm:$0xff]  ;;  %v4721_v35 = vmul.u32.u64.low 2454267026, %v185_v17  ;;  %v4722_v36 = vmul.u32.u64.high 2454267026, %v185_v17, %v4721_v35 }
  0x1e   : > { %8889 = vst [vmem:[#allocation21_spill] sm:$0xff] %v4648_v18  ;;  %8890 = vst [vmem:[#allocation22_spill] sm:$0xff] %v4653_v19  ;;  %v4671_v23 = vld [vmem:[%s8664_s1 + $0x98] sm:$0xff]  ;;  %v4676_v24 = vld [vmem:[%s8664_s1 + $0xa0] sm:$0xff]  ;;  %v188_v40 = vadd.s32 512, %v4612_v10  ;;  %v4762_v55 = vadd.s32 768, %v4612_v10 }
  0x1f   : > { %8891 = vst [vmem:[#allocation23_spill] sm:$0xff] %v4658_v20  ;;  %8892 = vst [vmem:[#allocation24_spill] sm:$0xff] %v4661_v21  ;;  %v4683_v26 = vld [vmem:[%s8664_s1 + $0xa8] sm:$0xff]  ;;  %v4688_v27 = vld [vmem:[%s8664_s1 + $0xb0] sm:$0xff]  ;;  %vm211_vm2 = vc.u32 %v4697_v29, 2454267026 }
  0x20   : > { %8893 = vst [vmem:[#allocation25_spill] sm:$0xff] %v4666_v22  ;;  %8894 = vst [vmem:[#allocation26_spill] sm:$0xff] %v4671_v23  ;;  %v4693_v28 = vld [vmem:[%s8664_s1 + $0xb8] sm:$0xff]  ;;  %v4708_v31 = vld [vmem:[%s8664_s1 + $0xc0] sm:$0xff]  ;;  %v212_v44 = vsel %vm211_vm2, 1, %v4482_v43 }
  0x21   : > { %8895 = vst [vmem:[#allocation27_spill] sm:$0xff] %v4676_v24  ;;  %8896 = vst [vmem:[#allocation28_spill] sm:$0xff] %v4683_v26  ;;  %v4713_v32 = vld [vmem:[%s8664_s1 + $0xc8] sm:$0xff]  ;;  %v4718_v33 = vld [vmem:[%s8664_s1 + $0xd0] sm:$0xff]  ;;  %vm225_vm3 = vc.u32 %v4721_v35, 2454267026  ;;  %v213_v45 = vadd.s32 %v4698_v30, %v212_v44 }
  0x22   : > { %8897 = vst [vmem:[#allocation29_spill] sm:$0xff] %v4688_v27  ;;  %8898 = vst [vmem:[#allocation30_spill] sm:$0xff] %v4693_v28  ;;  %v4727_v37 = vld [vmem:[%s8664_s1 + $0xd8] sm:$0xff]  ;;  %v4732_v38 = vld [vmem:[%s8664_s1 + $0xe0] sm:$0xff]  ;;  %v226_v46 = vsel %vm225_vm3, 1, %v4482_v43 }
  0x23   : > { %8899 = vst [vmem:[#allocation31_spill] sm:$0xff] %v4708_v31  ;;  %8900 = vst [vmem:[#allocation32_spill] sm:$0xff] %v4713_v32  ;;  %v4737_v39 = vld [vmem:[%s8664_s1 + $0xe8] sm:$0xff]  ;;  %v4743_v41 = vld [vmem:[%s8664_s1 + $0xf0] sm:$0xff]  ;;  %v4751_v47 = vmul.u32.u64.low 2454267026, %v186_v25  ;;  %v4752_v48 = vmul.u32.u64.high 2454267026, %v186_v25, %v4751_v47  ;;  %v227_v49 = vadd.s32 %v4722_v36, %v226_v46 }
  0x24   : > { %8901 = vst [vmem:[#allocation33_spill] sm:$0xff] %v4718_v33  ;;  %8902 = vst [vmem:[#allocation34_spill] sm:$0xff] %v4727_v37  ;;  %v4748_v42 = vld [vmem:[%s8664_s1 + $0xf8] sm:$0xff]  ;;  %v4755_v50 = vmul.u32.u64.low 2454267026, %v187_v34  ;;  %v4756_v51 = vmul.u32.u64.high 2454267026, %v187_v34, %v4755_v50  ;;  %v214_v52 = vshrl.u32 %v213_v45, 4 }
  0x25   : > { %8903 = vst [vmem:[#allocation35_spill] sm:$0xff] %v4732_v38  ;;  %8904 = vst [vmem:[#allocation36_spill] sm:$0xff] %v4737_v39  ;;  %vm239_vm4 = vc.u32 %v4751_v47, 2454267026  ;;  %v4758_v53 = vmul.u32.u64.low 2454267026, %v188_v40  ;;  %v4759_v54 = vmul.u32.u64.high 2454267026, %v188_v40, %v4758_v53 }
  0x26   : > { %8905 = vst [vmem:[#allocation37_spill] sm:$0xff] %v4743_v41  ;;  %8906 = vst [vmem:[#allocation38_spill] sm:$0xff] %v4748_v42  ;;  %v228_v56 = vshrl.u32 %v227_v49, 4  ;;  %v240_v57 = vsel %vm239_vm4, 1, %v4482_v43  ;;  %vm253_vm5 = vc.u32 %v4755_v50, 2454267026 }
  0x27   : > { %v215_v58 = vmul.u32 28, %v214_v52  ;;  %v241_v59 = vadd.s32 %v4752_v48, %v240_v57  ;;  %v254_v60 = vsel %vm253_vm5, 1, %v4482_v43  ;;  %vm267_vm6 = vc.u32 %v4758_v53, 2454267026 }
  0x28   : > { %v229_v61 = vmul.u32 28, %v228_v56  ;;  %v255_v62 = vadd.s32 %v4756_v51, %v254_v60  ;;  %v268_v63 = vsel %vm267_vm6, 1, %v4482_v43 }
  0x29   : > { %v216_v29 = vsub.s32 %v4612_v10, %v215_v58  ;;  %v242_v30 = vshrl.u32 %v241_v59, 4  ;;  %v269_v35 = vadd.s32 %v4759_v54, %v268_v63 }
  0x2a   : > { %v230_v36 = vsub.s32 %v185_v17, %v229_v61  ;;  %v256_v44 = vshrl.u32 %v255_v62, 4  ;;  %v4769_v45 = vmul.u32.u64.low 2454267026, %v4661_v21  ;;  %v4770_v46 = vmul.u32.u64.high 2454267026, %v4661_v21, %v4769_v45 }
  0x2b   : > { %v243_v47 = vmul.u32 28, %v242_v30  ;;  %v270_v49 = vshrl.u32 %v269_v35, 4  ;;  %v4773_v48 = vmul.u32.u64.low 2454267026, %v4762_v55  ;;  %v4774_v50 = vmul.u32.u64.high 2454267026, %v4762_v55, %v4773_v48 }
  0x2c   : > { %v257_v52 = vmul.u32 28, %v256_v44  ;;  %vm281_vm7 = vc.u32 %v4769_v45, 2454267026  ;;  %vm303_vm8 = vcmp.ne.s32.totalorder %v216_v29, 0  ;;  %vm304_vm9 = vcmp.ne.s32.totalorder %v230_v36, 0 }
  0x2d   : > { %v244_v51 = vsub.s32 %v186_v25, %v243_v47  ;;  %v271_v53 = vmul.u32 28, %v270_v49  ;;  %v282_v56 = vsel %vm281_vm7, 1, %v4482_v43  ;;  %vm295_vm10 = vc.u32 %v4773_v48, 2454267026 }
  0x2e   : > { %v258_v17 = vsub.s32 %v187_v34, %v257_v52  ;;  %v283_v54 = vadd.s32 %v4770_v46, %v282_v56  ;;  %v296_v57 = vsel %vm295_vm10, 1, %v4482_v43  ;;  %vm310_vm11 = vcmp.lt.s32.totalorder %v216_v29, 0 }
  0x2f   : > { %v272_v58 = vsub.s32 %v188_v40, %v271_v53  ;;  %v297_v59 = vadd.s32 %v4774_v50, %v296_v57  ;;  %vm305_vm12 = vcmp.ne.s32.totalorder %v244_v51, 0  ;;  %vm311_vm13 = vcmp.lt.s32.totalorder %v230_v36, 0  ;;  %vm4779_vm14 = vmand %vm310_vm11, %vm303_vm8 }
  0x30   : > { %v284_v61 = vshrl.u32 %v283_v54, 4  ;;  %vm306_vm15 = vcmp.ne.s32.totalorder %v258_v17, 0  ;;  %vm312_vm2 = vcmp.lt.s32.totalorder %v244_v51, 0  ;;  %vm313_vm3 = vcmp.lt.s32.totalorder %v258_v17, 0  ;;  %vm4784_vm4 = vmand %vm311_vm13, %vm304_vm9 }
  0x31   : > { %v298_v34 = vshrl.u32 %v297_v59, 4  ;;  %vm307_vm5 = vcmp.ne.s32.totalorder %v272_v58, 0  ;;  %vm314_vm6 = vcmp.lt.s32.totalorder %v272_v58, 0  ;;  %vm4788_vm7 = vmand %vm312_vm2, %vm305_vm12  ;;  %v324_v43 = vadd.s32 28, %v216_v29 }
  0x32   : > { %v285_v62 = vmul.u32 28, %v284_v61  ;;  %vm4792_vm8 = vmand %vm313_vm3, %vm306_vm15  ;;  %v325_v30 = vadd.s32 28, %v230_v36  ;;  %v326_v35 = vadd.s32 28, %v244_v51  ;;  %v327_v44 = vadd.s32 28, %v258_v17 }
  0x33   : > { %v299_v45 = vmul.u32 28, %v298_v34  ;;  %vm4796_vm9 = vmand %vm314_vm6, %vm307_vm5  ;;  %v328_v47 = vadd.s32 28, %v272_v58  ;;  %v331_v49 = vsel %vm4779_vm14, %v324_v43, %v216_v29  ;;  %v8917_v57 = vmov 0 }
  0x34   : > { %v286_v48 = vsub.s32 %v4661_v21, %v285_v62  ;;  %v332_v50 = vsel %vm4784_vm4, %v325_v30, %v230_v36  ;;  %v333_v52 = vsel %vm4788_vm7, %v326_v35, %v244_v51  ;;  %v334_v53 = vsel %vm4792_vm8, %v327_v44, %v258_v17 }
  0x35   : > { %v300_v56 = vsub.s32 %v4762_v55, %v299_v45  ;;  %v335_v54 = vsel %vm4796_vm9, %v328_v47, %v272_v58  ;;  %vm4812_vm10 = vcmp.eq.s32.totalorder %v331_v49, 0  ;;  %vm4816_vm11 = vcmp.eq.s32.totalorder %v332_v50, 0 }
  0x36   : > { %v8918_v57 = vsel %vm4812_vm10, 4294967295, %v8917_v57  ;;  %v8920_v29 = vmov 0  ;;  %vm308_vm12 = vcmp.ne.s32.totalorder %v286_v48, 0  ;;  %vm315_vm13 = vcmp.lt.s32.totalorder %v286_v48, 0 }
  0x37   : > { %8919 = vst [vmem:[#allocation39_spill] sm:$0xff] %v8918_v57  ;;  %v8921_v29 = vsel %vm4816_vm11, 4294967295, %v8920_v29  ;;  %v329_v36 = vadd.s32 28, %v286_v48  ;;  %vm4820_vm14 = vcmp.eq.s32.totalorder %v333_v52, 0  ;;  %v8923_v51 = vmov 0  ;;  %vm322_vm3 = vmand %vm315_vm13, %vm308_vm12 }
  0x38   : > { %8922 = vst [vmem:[#allocation40_spill] sm:$0xff] %v8921_v29  ;;  %v8924_v51 = vsel %vm4820_vm14, 4294967295, %v8923_v51  ;;  %vm309_vm15 = vcmp.ne.s32.totalorder %v300_v56, 0  ;;  %vm316_vm2 = vcmp.lt.s32.totalorder %v300_v56, 0  ;;  %v330_v55 = vadd.s32 28, %v300_v56 }
  0x39   : > { %8925 = vst [vmem:[#allocation41_spill] sm:$0xff] %v8924_v51  ;;  %vm4824_vm4 = vcmp.eq.s32.totalorder %v334_v53, 0  ;;  %v8926_v17 = vmov 0  ;;  %vm323_vm5 = vmand %vm316_vm2, %vm309_vm15  ;;  %v336_v58 = vsel %vm322_vm3, %v329_v36, %v286_v48  ;;  %vm4828_vm6 = vcmp.eq.s32.totalorder %v335_v54, 0 }
  0x3a   : > { %v8927_v17 = vsel %vm4824_vm4, 4294967295, %v8926_v17  ;;  %v8929_v59 = vmov 0  ;;  %v337_v60 = vsel %vm323_vm5, %v330_v55, %v300_v56  ;;  %vm4832_vm7 = vcmp.eq.s32.totalorder %v336_v58, 0 }
  0x3b   : > { %8928 = vst [vmem:[#allocation42_spill] sm:$0xff] %v8927_v17  ;;  %v8930_v59 = vsel %vm4828_vm6, 4294967295, %v8929_v59  ;;  %v8932_v61 = vmov 0  ;;  %vm4836_vm8 = vcmp.eq.s32.totalorder %v337_v60, 0  ;;  %v8935_v25 = vmov 0 }
  0x3c   : > { %8931 = vst [vmem:[#allocation43_spill] sm:$0xff] %v8930_v59  ;;  %v8933_v61 = vsel %vm4832_vm7, 4294967295, %v8932_v61  ;;  %v8936_v25 = vsel %vm4836_vm8, 4294967295, %v8935_v25 }
  0x3d   : > { %8934 = vst [vmem:[#allocation44_spill] sm:$0xff] %v8933_v61  ;;  %8937 = vst [vmem:[#allocation45_spill] sm:$0xff] %v8936_v25 }
  0x3e LB: >> { %v8938_v13 = vld [vmem:[#allocation17_spill] sm:$0xff]  ;;  %v8939_v11 = vld [vmem:[#allocation15_spill] sm:$0xff]  ;;  %v8941_v8 = vld [vmem:[#allocation12_spill] sm:$0xff]  ;;  %s4283_s30 = smul.u32 224, %s4480_s28  ;;  %s4483_s4 = smov 12   ;;  %vm1105_vm9 = vcmask 523264   ;;  %v8952_v42 = vlaneseq  ;;  %s4480_s28 = sphi %s4841_s28, %s350_s28  }
  0x3f   : >> { %v8940_v9 = vld [vmem:[#allocation13_spill] sm:$0xff]  ;;  %v8942_v7 = vld [vmem:[#allocation11_spill] sm:$0xff]  ;;  %v8943_v6 = vld [vmem:[#allocation10_spill] sm:$0xff]  ;;  %s4484_s5 = smov 28   ;;  %s4485_s27 = smov 100   ;;  %vm4487_vm12 = vmmov 0  }
  0x40   : >> { %v8944_v5 = vld [vmem:[#allocation9_spill] sm:$0xff]  ;;  %v8945_v4 = vld [vmem:[#allocation8_spill] sm:$0xff]  ;;  %v8946_v2 = vld [vmem:[#allocation7_spill] sm:$0xff]  ;;  %s4848_s3 = scalar_lea.vmem %s4703_s25, %s4283_s30  ;;  %v656_v38 = vshrl.u32 %v8952_v42, 7  ;;  %s4486_s6 = smov 116   ;;  %v8703_v32 = vmov 0  }
  0x41   : >> { %v8947_v1 = vld [vmem:[#allocation6_spill] sm:$0xff]  ;;  %v8948_v0 = vld [vmem:[#allocation5_spill] sm:$0xff]  ;;  %v4854_v40 = vld [vmem:[%s4848_s3 + $0x14] ss:$28 sps:$4 sm:$0xff]   ;;  %vm442_vm2 = vcmask 97280   ;;  %vm571_vm3 = vcmask 228352  }
  0x42   : >> { %v4851_v34 = vld [vmem:[%s4848_s3 + $0x4c] ss:$28 sps:$4 sm:$0xff]   ;;  %426 = vrot.lane.b32.xlu0 %v4854_v40, %s4483_s4  ;;  %v4864_v62 = vld [vmem:[%s4848_s3 + $0x18] ss:$28 sps:$4 sm:$0xff]   ;;  %v4874_v30 = vld [vmem:[%s4848_s3 + $0x84] ss:$28 sps:$4 sm:$0xff]   ;;  %v5036_v17 = vcombine.high %v8948_v0, %v8947_v1 }
  0x43   : >> { %430 = vrot.lane.b32.xlu1 %v4851_v34, %s4483_s4  ;;  %v4859_v43 = vld [vmem:[%s4848_s3 + $0x50] ss:$28 sps:$4 sm:$0xff]   ;;  %v4869_v63 = vld [vmem:[%s4848_s3 + $0x88] ss:$28 sps:$4 sm:$0xff]   ;;  %v4879_v35 = vld [vmem:[%s4848_s3 + $0xc0] ss:$28 sps:$4 sm:$0xff]  }
  0x44   : >> { %8949 = vst [vmem:[#allocation46_spill] sm:$0xff] %v4869_v63  ;;  %8950 = vst [vmem:[#allocation47_spill] sm:$0xff] %v4879_v35  ;;  %v4884_v44 = vld [vmem:[%s4848_s3 + $0xbc] ss:$28 sps:$4 sm:$0xff]   ;;  %v4889_v45 = vld [vmem:[%s4848_s3 + $0x4] ss:$28 sps:$4 sm:$0xff]   ;;  %4133 = vmatprep.mubr.msk.bf16.mxu0 %vm1105_vm9, %v5036_v17  ;;  %4181 = vmatprep.mubr.msk.bf16.mxu1 %vm1105_vm9, %v5036_v17 }
  0x45   : >> { %v4894_v46 = vld [vmem:[%s4848_s3] ss:$28 sps:$4 sm:$0xff]   ;;  %v4899_v47 = vld [vmem:[%s4848_s3 + $0xc] ss:$28 sps:$4 sm:$0xff]   ;;  %v4921_v52 = vld [vmem:[%s4848_s3 + $0x38] ss:$28 sps:$4 sm:$0xff]  }
  0x46   : >> { %428 = vrot.lane.b32.xlu0 %v4864_v62, %s4483_s4  ;;  %v4904_v49 = vld [vmem:[%s4848_s3 + $0x8] ss:$28 sps:$4 sm:$0xff]   ;;  %v4911_v48 = vld [vmem:[%s4848_s3 + $0x10] ss:$28 sps:$4 sm:$0xff]   ;;  %v4916_v50 = vld [vmem:[%s4848_s3 + $0x3c] ss:$28 sps:$4 sm:$0xff]  }
  0x47   : >> { %432 = vrot.lane.b32.xlu1 %v4859_v43, %s4483_s4  ;;  %v4926_v53 = vld [vmem:[%s4848_s3 + $0x44] ss:$28 sps:$4 sm:$0xff]   ;;  %v4943_v36 = vld [vmem:[%s4848_s3 + $0x74] ss:$28 sps:$4 sm:$0xff]   ;;  %v4953_v58 = vld [vmem:[%s4848_s3 + $0x7c] ss:$28 sps:$4 sm:$0xff]  }
  0x48   : >> { %v4931_v56 = vld [vmem:[%s4848_s3 + $0x40] ss:$28 sps:$4 sm:$0xff]   ;;  %v4938_v54 = vld [vmem:[%s4848_s3 + $0x48] ss:$28 sps:$4 sm:$0xff]   ;;  %v4948_v55 = vld [vmem:[%s4848_s3 + $0x70] ss:$28 sps:$4 sm:$0xff]  }
  0x49   : >> { %v4958_v60 = vld [vmem:[%s4848_s3 + $0x78] ss:$28 sps:$4 sm:$0xff]   ;;  %v4965_v3 = vld [vmem:[%s4848_s3 + $0x80] ss:$28 sps:$4 sm:$0xff]   ;;  %v4970_v29 = vld [vmem:[%s4848_s3 + $0xac] ss:$28 sps:$4 sm:$0xff]  }
  0x4a   : >> { %434 = vrot.lane.b32.xlu0 %v4874_v30, %s4483_s4  ;;  %v4975_v57 = vld [vmem:[%s4848_s3 + $0xa8] ss:$28 sps:$4 sm:$0xff]   ;;  %v4980_v61 = vld [vmem:[%s4848_s3 + $0xb4] ss:$28 sps:$4 sm:$0xff]   ;;  %8951 = vst [vmem:[#allocation48_spill] sm:$0xff] %v5036_v17  ;;  %v5068_v37 = vsub.s32 4, %v656_v38  ;;  %vm648_vm15 = vmpackc.low %vm4487_vm12, %vm4487_vm12 }
  0x4b   : >> { %436 = vrot.lane.b32.xlu1 %v4869_v63, %s4483_s4  ;;  %v4985_v25 = vld [vmem:[%s4848_s3 + $0xb0] ss:$28 sps:$4 sm:$0xff]   ;;  %v4992_v59 = vld [vmem:[%s4848_s3 + $0xb8] ss:$28 sps:$4 sm:$0xff]   ;;  %v5071_v28 = vsub.s32 0, %v656_v38  ;;  %v652_v26 = vsel %vm648_vm15, 65537, %v8703_v32 }
  0x4c   : >> { %v8953_v10 = vld [vmem:[#allocation14_spill] sm:$0xff]  ;;  %v670_v38 = vrot.slane %v652_v26, %v5068_v37  ;;  %s4490_s22 = smov 101   ;;  %s4491_s7 = smov 1  }
  0x4d   : >> { %vm8954_vm0 = vcmp.lt.s32.totalorder %v8953_v10, 28  ;;  %v666_v18 = vrot.slane %v652_v26, %v5071_v28  ;;  %s4284_s8 = smul.u32 896, %s4480_s28  ;;  %s4492_s16 = smov 113  }
  0x4e   : >> { %438 = vrot.lane.b32.xlu0 %v4884_v44, %s4483_s4  ;;  %vm647_vm13 = vmpackc.low %vm4487_vm12, %vm8954_vm0  ;;  %vm5095_vm15 = vcmp.eq.s16.totalorder %v670_v38, 0  ;;  %s4493_s17 = smov 117   ;;  %s350_s28 = sadd.s32 1, %s4480_s28  }
  0x4f   : >> { %440 = vrot.lane.b32.xlu1 %v4879_v35, %s4483_s4  ;;  %v651_v27 = vsel %vm647_vm13, 65537, %v8703_v32  ;;  %vm5103_vm0 = vcmp.eq.s16.totalorder %v666_v18, 0  ;;  %s6484_s14 = scalar_lea.vmem %s139_s26, %s4284_s8 [#allocation2]  ;;  %p347_p11 = scmp.ge.s32.totalorder %s350_s28, 8  }
  0x50   : >> { %v662_v10 = vrot.slane %v651_v27, %v5068_v37  ;;  %v658_v22 = vrot.slane %v651_v27, %v5071_v28  ;;  %s4308_s23 = smul.u32 (%p347_p11), 114688, %s4533_s13  ;;  %s3963_s24 = sshll.u32 (%p347_p11), %s139_s26, 4  ;;  %s8618_s24 = int_to_ptr.vmem [resolvable:$true] %s3963_s24 }
  0x51   : > { %s8622_s28 = scalar_lea.sflag (%p347_p11), [#allocation3], %s137_s21  ;;  %s4410_s25 = scalar_lea.vmem (%p347_p11), %s8618_s24, 114688 }
  0x52   : >> { %523 = vrot.lane.b32.xlu0 %v4894_v46, %s4484_s5  ;;  %vm5081_vm5 = vcmp.eq.s16.totalorder %v662_v10, 0  ;;  %vm5087_vm13 = vcmp.eq.s16.totalorder %v658_v22, 0  ;;  %v5352_v10 = vcombine.high %v8942_v7, %v8941_v8  ;;  %p4411_p12 = scmp.ne.s32.totalorder (%p347_p11), %s8618_s24, %s4410_s25  ;;  %s4494_s13 = smov (%p347_p11), [#allocation2]  }
  0x53   : >> { %525 = vrot.lane.b32.xlu1 %v4889_v45, %s4484_s5  ;;  %s4414_s29 = sshll.u32 (%p347_p11), %s4494_s13, 4  ;;  %s4415_s29 = int_to_ptr.vmem [resolvable:$false] %s4414_s29 }
  0x54   : > { %p4412_p13 = pnand (%p347_p11), %p4411_p12, %p4550_p5  ;;  %s4416_s26 = scalar_lea.vmem (%p347_p11), %s4415_s29, 229376 }
  0x55   : > { %p4417_p1 = scmp.lt.s32.totalorder (%p347_p11), %s8618_s24, %s4415_s29  ;;  %p4418_p2 = scmp.lt.s32.totalorder (%p347_p11), %s4416_s26, %s4410_s25 }
  0x56   : >> { %527 = vrot.lane.b32.xlu0 %v4904_v49, %s4484_s5  ;;  %p4413_p0 = pneg (%p347_p11), %p4412_p13 }
  0x57   : >> { %529 = vrot.lane.b32.xlu1 %v4899_v47, %s4484_s5  ;;  %p4419_p3 = por (%p347_p11), %p4418_p2, %p4417_p1 }
  0x59   : > { %p4420_p4 = pnand (%p347_p11), %p4419_p3, %p4413_p0 }
  0x5a   : >> { %531 = vrot.lane.b32.xlu0 %v4911_v48, %s4484_s5 }
  0x5b   : >> { %533 = vrot.lane.b32.xlu1 %v4854_v40, %s4484_s5 }
  0x5e   : >> { %535 = vrot.lane.b32.xlu0 %v4921_v52, %s4484_s5 }
  0x5f   : >> { %537 = vrot.lane.b32.xlu1 %v4916_v50, %s4484_s5 }
  0x62   : >> { %539 = vrot.lane.b32.xlu0 %v4931_v56, %s4484_s5 }
  0x63   : >> { %541 = vrot.lane.b32.xlu1 %v4926_v53, %s4484_s5 }
  0x66   : >> { %543 = vrot.lane.b32.xlu0 %v4938_v54, %s4484_s5 }
  0x67   : >> { %545 = vrot.lane.b32.xlu1 %v4851_v34, %s4484_s5 }
  0x6a   : >> { %547 = vrot.lane.b32.xlu0 %v4948_v55, %s4484_s5 }
  0x6b   : >> { %549 = vrot.lane.b32.xlu1 %v4943_v36, %s4484_s5 }
  0x6e   : >> { %551 = vrot.lane.b32.xlu0 %v4958_v60, %s4484_s5 }
  0x6f   : >> { %553 = vrot.lane.b32.xlu1 %v4953_v58, %s4484_s5 }
  0x72   : >> { %555 = vrot.lane.b32.xlu0 %v4965_v3, %s4484_s5 }
  0x73   : >> { %557 = vrot.lane.b32.xlu1 %v4874_v30, %s4484_s5 }
  0x76   : >> { %559 = vrot.lane.b32.xlu0 %v4975_v57, %s4484_s5 }
  0x77   : >> { %561 = vrot.lane.b32.xlu1 %v4970_v29, %s4484_s5 }
  0x7a   : >> { %563 = vrot.lane.b32.xlu0 %v4985_v25, %s4484_s5 }
  0x7b   : >> { %565 = vrot.lane.b32.xlu1 %v4980_v61, %s4484_s5 }
  0x7e   : >> { %567 = vrot.lane.b32.xlu0 %v4992_v59, %s4484_s5 }
  0x7f   : >> { %569 = vrot.lane.b32.xlu1 %v4884_v44, %s4484_s5 }
  0x82   : >> { %718 = vrot.lane.b32.xlu0 %v4894_v46, %s4485_s27 }
  0x83   : >> { %720 = vrot.lane.b32.xlu1 %v4889_v45, %s4485_s27 }
  0x86   : >> { %722 = vrot.lane.b32.xlu0 %v4904_v49, %s4485_s27 }
  0x87   : >> { %724 = vrot.lane.b32.xlu1 %v4899_v47, %s4485_s27 }
  0x8a   : >> { %726 = vrot.lane.b32.xlu0 %v4911_v48, %s4485_s27 }
  0x8b   : >> { %728 = vrot.lane.b32.xlu1 %v4854_v40, %s4485_s27 }
  0x8e   : >> { %730 = vrot.lane.b32.xlu0 %v4864_v62, %s4485_s27 }
  0x8f   : >> { %732 = vrot.lane.b32.xlu1 %v4921_v52, %s4485_s27 }
  0x92   : >> { %734 = vrot.lane.b32.xlu0 %v4916_v50, %s4485_s27 }
  0x93   : >> { %736 = vrot.lane.b32.xlu1 %v4931_v56, %s4485_s27 }
  0x96   : >> { %738 = vrot.lane.b32.xlu0 %v4926_v53, %s4485_s27 }
  0x97   : >> { %740 = vrot.lane.b32.xlu1 %v4938_v54, %s4485_s27 }
  0x9a   : >> { %742 = vrot.lane.b32.xlu0 %v4851_v34, %s4485_s27 }
  0x9b   : >> { %744 = vrot.lane.b32.xlu1 %v4859_v43, %s4485_s27 }
  0x9e   : >> { %746 = vrot.lane.b32.xlu0 %v4948_v55, %s4485_s27 }
  0x9f   : >> { %748 = vrot.lane.b32.xlu1 %v4943_v36, %s4485_s27 }
  0xa2   : >> { %750 = vrot.lane.b32.xlu0 %v4958_v60, %s4485_s27 }
  0xa3   : >> { %752 = vrot.lane.b32.xlu1 %v4953_v58, %s4485_s27 }
  0xa6   : >> { %754 = vrot.lane.b32.xlu0 %v4965_v3, %s4485_s27 }
  0xa7   : >> { %756 = vrot.lane.b32.xlu1 %v4874_v30, %s4485_s27 }
  0xaa   : >> { %758 = vrot.lane.b32.xlu0 %v4869_v63, %s4485_s27 }
  0xab   : >> { %760 = vrot.lane.b32.xlu1 %v4975_v57, %s4485_s27 }
  0xae   : >> { %762 = vrot.lane.b32.xlu0 %v4970_v29, %s4485_s27 }
  0xaf   : >> { %764 = vrot.lane.b32.xlu1 %v4985_v25, %s4485_s27 }
  0xb2   : >> { %766 = vrot.lane.b32.xlu0 %v4980_v61, %s4485_s27 }
  0xb3   : >> { %768 = vrot.lane.b32.xlu1 %v4992_v59, %s4485_s27 }
  0xb4   : >> { %v427_v17 = vpop.permute.xlu0 %426 }
  0xb5   : >> { %v431_v51 = vpop.permute.xlu1 %430 }
  0xb6   : >> { %770 = vrot.lane.b32.xlu0 %v4884_v44, %s4485_s27 }
  0xb7   : >> { %772 = vrot.lane.b32.xlu1 %v4879_v35, %s4485_s27 }
  0xb8   : >> { %v429_v39 = vpop.permute.xlu0 %428 }
  0xb9   : >> { %v433_v41 = vpop.permute.xlu1 %432  ;;  %v443_v20 = vsel %vm442_vm2, %v427_v17, %v429_v39 }
  0xba   : >> { %819 = vrot.lane.b32.xlu0 %v4894_v46, %s4486_s6  ;;  %v444_v38 = vsel %vm442_vm2, %v431_v51, %v433_v41 }
  0xbb   : >> { %821 = vrot.lane.b32.xlu1 %v4921_v52, %s4486_s6 }
  0xbc   : >> { %v435_v31 = vpop.permute.xlu0 %434 }
  0xbd   : >> { %v437_v33 = vpop.permute.xlu1 %436 }
  0xbe   : >> { %823 = vrot.lane.b32.xlu0 %v4948_v55, %s4486_s6 }
  0xbf   : >> { %825 = vrot.lane.b32.xlu1 %v4975_v57, %s4486_s6 }
  0xc0   : >> { %v439_v24 = vpop.permute.xlu0 %438 }
  0xc1   : >> { %v441_v42 = vpop.permute.xlu1 %440 }
  0xc4   : >> { %v524_v16 = vpop.permute.xlu0 %523 }
  0xc5   : >> { %v526_v23 = vpop.permute.xlu1 %525  ;;  %v619_v32 = vsel %vm571_vm3, %v443_v20, %v524_v16 }
  0xc6   : >> { %v572_v27 = vsel %vm571_vm3, %v524_v16, %v526_v23 }
  0xc7   : >> { %4102 = vmatprep.subr.msk.bf16.mxu0 %vm5081_vm5, %v572_v27 }
  0xc8   : >> { %4104 = vmatpush1.bf16.msk.msra.mxu0 %vm5087_vm13, %v619_v32  ;;  %v528_v26 = vpop.permute.xlu0 %527 }
  0xc9   : >> { %v5101_v39 = vpop.permute.xlu1 %529  ;;  %v573_v20 = vsel %vm571_vm3, %v526_v23, %v528_v26 }
  0xca   : >> { %v574_v16 = vsel %vm571_vm3, %v528_v26, %v5101_v39 }
  0xcb   : >> { %4150 = vmatprep.subr.msk.bf16.mxu1 %vm5095_vm15, %v574_v16 }
  0xcc   : >> { %4152 = vmatpush1.bf16.msk.msra.mxu1 %vm5103_vm0, %v573_v20  ;;  %v5116_v32 = vpop.permute.xlu0 %531 }
  0xcd   : >> { %v5114_v17 = vpop.permute.xlu1 %533 }
  0xd0   : >> { %v536_v27 = vpop.permute.xlu0 %535 }
  0xd1   : >> { %v538_v18 = vpop.permute.xlu1 %537  ;;  %v623_v35 = vsel %vm571_vm3, %v444_v38, %v536_v27 }
  0xd2   : >> { %v577_v15 = vsel %vm571_vm3, %v536_v27, %v538_v18 }
  0xd3   : >> { %4106 = vmatprep.subr.msk.bf16.mxu0 %vm5081_vm5, %v577_v15 }
  0xd4   : >> { %4108 = vmatpush1.bf16.msk.msra.mxu0 %vm5087_vm13, %v623_v35  ;;  %v540_v26 = vpop.permute.xlu0 %539  ;;  %v445_v35 = vsel %vm442_vm2, %v435_v31, %v437_v33 }
  0xd5   : >> { %v5125_v23 = vpop.permute.xlu1 %541  ;;  %v578_v20 = vsel %vm571_vm3, %v538_v18, %v540_v26 }
  0xd6   : >> { %v579_v16 = vsel %vm571_vm3, %v540_v26, %v5125_v23 }
  0xd7   : >> { %4154 = vmatprep.subr.msk.bf16.mxu1 %vm5095_vm15, %v579_v16 }
  0xd8   : >> { %4156 = vmatpush1.bf16.msk.msra.mxu1 %vm5103_vm0, %v578_v20  ;;  %v5136_v15 = vpop.permute.xlu0 %543 }
  0xd9   : >> { %v5134_v41 = vpop.permute.xlu1 %545 }
  0xdc   : >> { %v548_v38 = vpop.permute.xlu0 %547 }
  0xdd   : >> { %v550_v51 = vpop.permute.xlu1 %549  ;;  %v627_v63 = vsel %vm571_vm3, %v445_v35, %v548_v38 }
  0xde   : >> { %v582_v27 = vsel %vm571_vm3, %v548_v38, %v550_v51 }
  0xdf   : >> { %4110 = vmatprep.subr.msk.bf16.mxu0 %vm5081_vm5, %v582_v27 }
  0xe0   : >> { %4112 = vmatpush1.bf16.msk.msra.mxu0 %vm5087_vm13, %v627_v63  ;;  %v552_v26 = vpop.permute.xlu0 %551  ;;  %v446_v63 = vsel %vm442_vm2, %v439_v24, %v441_v42 }
  0xe1   : >> { %v5145_v18 = vpop.permute.xlu1 %553  ;;  %v583_v20 = vsel %vm571_vm3, %v550_v51, %v552_v26 }
  0xe2   : >> { %v584_v16 = vsel %vm571_vm3, %v552_v26, %v5145_v18 }
  0xe3   : >> { %4158 = vmatprep.subr.msk.bf16.mxu1 %vm5095_vm15, %v584_v16 }
  0xe4   : >> { %4160 = vmatpush1.bf16.msk.msra.mxu1 %vm5103_vm0, %v583_v20  ;;  %v5156_v33 = vpop.permute.xlu0 %555 }
  0xe5   : >> { %v5154_v31 = vpop.permute.xlu1 %557 }
  0xe8   : >> { %v560_v38 = vpop.permute.xlu0 %559 }
  0xe9   : >> { %v562_v35 = vpop.permute.xlu1 %561  ;;  %v631_v12 = vsel %vm571_vm3, %v446_v63, %v560_v38 }
  0xea   : >> { %v587_v27 = vsel %vm571_vm3, %v560_v38, %v562_v35 }
  0xeb   : >> { %4114 = vmatprep.subr.msk.bf16.mxu0 %vm5081_vm5, %v587_v27  ;;  %vm774_vm5 = vcmask 818176  }
  0xec   : >> { %4116 = vmatpush1.bf16.msk.msra.mxu0 %vm5087_vm13, %v631_v12  ;;  %v564_v26 = vpop.permute.xlu0 %563  ;;  %vm864_vm13 = vmpackc.low %vm203_vm1, %vm4487_vm12 }
  0xed   : >> { %v5165_v51 = vpop.permute.xlu1 %565  ;;  %1162 = vmatprep.subr.bf16.mxu0 %v4889_v45  ;;  %v588_v24 = vsel %vm571_vm3, %v562_v35, %v564_v26 }
  0xee   : >> { %v589_v16 = vsel %vm571_vm3, %v564_v26, %v5165_v51 }
  0xef   : >> { %4162 = vmatprep.subr.msk.bf16.mxu1 %vm5095_vm15, %v589_v16 }
  0xf0   : >> { %1163 = vmatpush1.bf16.msra.mxu0 %v4894_v46  ;;  %4164 = vmatpush1.bf16.msk.msra.mxu1 %vm5103_vm0, %v588_v24  ;;  %v5178_v12 = vpop.permute.xlu0 %567 }
  0xf1   : >> { %v5176_v14 = vpop.permute.xlu1 %569  ;;  %1164 = vmatprep.subr.bf16.mxu0 %v4916_v50  ;;  %1355 = vmatprep.subr.bf16.mxu1 %v4899_v47 }
  0xf4   : >> { %1165 = vmatpush1.bf16.msra.mxu0 %v4921_v52  ;;  %1356 = vmatpush1.bf16.msra.mxu1 %v4904_v49  ;;  %v719_v45 = vpop.permute.xlu0 %718 }
  0xf5   : >> { %v721_v19 = vpop.permute.xlu1 %720  ;;  %1166 = vmatprep.subr.bf16.mxu0 %v4943_v36  ;;  %1357 = vmatprep.subr.bf16.mxu1 %v4926_v53 }
  0xf8   : >> { %1167 = vmatpush1.bf16.msra.mxu0 %v4948_v55  ;;  %1358 = vmatpush1.bf16.msra.mxu1 %v4931_v56  ;;  %v723_v42 = vpop.permute.xlu0 %722 }
  0xf9   : >> { %v725_v46 = vpop.permute.xlu1 %724  ;;  %1168 = vmatprep.subr.bf16.mxu0 %v4970_v29  ;;  %1359 = vmatprep.subr.bf16.mxu1 %v4953_v58  ;;  %v776_v49 = vsel %vm774_vm5, %v721_v19, %v723_v42  ;;  %v775_v29 = vsel %vm774_vm5, %v719_v45, %v721_v19 }
  0xfa   : >> { %v777_v56 = vsel %vm774_vm5, %v723_v42, %v725_v46 }
  0xfc   : >> { %1169 = vmatpush1.bf16.msra.mxu0 %v4975_v57  ;;  %1360 = vmatpush1.bf16.msra.mxu1 %v4958_v60  ;;  %v5197_v50 = vpop.permute.xlu0 %726 }
  0xfd   : >> { %v5192_v47 = vpop.permute.xlu1 %728  ;;  %4118 = vmatprep.subr.msk.bf16.mxu0 %vm5095_vm15, %v776_v49  ;;  %1361 = vmatprep.subr.bf16.mxu1 %v4980_v61  ;;  %v778_v52 = vsel %vm774_vm5, %v725_v46, %v5197_v50 }
 0x100   : >> { %4120 = vmatpush1.bf16.msk.msra.mxu0 %vm5103_vm0, %v775_v29  ;;  %1362 = vmatpush1.bf16.msra.mxu1 %v4985_v25  ;;  %v5208_v53 = vpop.permute.xlu0 %730 }
 0x101   : >> { %v733_v57 = vpop.permute.xlu1 %732  ;;  %4166 = vmatprep.subr.msk.bf16.mxu1 %vm5095_vm15, %v778_v52 }
 0x104   : >> { %4168 = vmatpush1.bf16.msk.msra.mxu1 %vm5103_vm0, %v777_v56  ;;  %v735_v36 = vpop.permute.xlu0 %734 }
 0x105   : >> { %v737_v61 = vpop.permute.xlu1 %736  ;;  %v781_v25 = vsel %vm774_vm5, %v733_v57, %v735_v36 }
 0x106   : >> { %v782_v55 = vsel %vm774_vm5, %v735_v36, %v737_v61 }
 0x107   : >> { %4122 = vmatprep.subr.msk.bf16.mxu0 %vm5095_vm15, %v782_v55 }
 0x108   : >> { %4124 = vmatpush1.bf16.msk.msra.mxu0 %vm5103_vm0, %v781_v25  ;;  %v739_v60 = vpop.permute.xlu0 %738  ;;  %v5257_v25 = vcombine.low %v8948_v0, %v8947_v1  ;;  %v8994_v0 = vld [vmem:[#allocation48_spill] sm:$0xff] }
 0x109   : >> { %v5219_v58 = vpop.permute.xlu1 %740  ;;  %v783_v35 = vsel %vm774_vm5, %v737_v61, %v739_v60 }
 0x10a   : >> { %v784_v20 = vsel %vm774_vm5, %v739_v60, %v5219_v58 }
 0x10b   : >> { %4170 = vmatprep.subr.msk.bf16.mxu1 %vm5095_vm15, %v784_v20  ;;  %v576_v20 = vsel %vm571_vm3, %v5116_v32, %v5114_v17 }
 0x10c   : >> { %4172 = vmatpush1.bf16.msk.msra.mxu1 %vm5103_vm0, %v783_v35  ;;  %v5230_v38 = vpop.permute.xlu0 %742 }
 0x10d   : >> { %v5228_v63 = vpop.permute.xlu1 %744 }
 0x110   : >> { %v747_v26 = vpop.permute.xlu0 %746 }
 0x111   : >> { %v749_v27 = vpop.permute.xlu1 %748 }
 0x112   : >> { %v787_v45 = vsel %vm774_vm5, %v747_v26, %v749_v27 }
 0x114   : >> { %v751_v24 = vpop.permute.xlu0 %750 }
 0x115   : >> { %v753_v16 = vpop.permute.xlu1 %752  ;;  %v788_v19 = vsel %vm774_vm5, %v749_v27, %v751_v24 }
 0x116   : >> { %4126 = vmatprep.subr.msk.bf16.mxu0 %vm5095_vm15, %v788_v19  ;;  %v789_v29 = vsel %vm774_vm5, %v751_v24, %v753_v16  ;;  %v575_v24 = vsel %vm571_vm3, %v5101_v39, %v5116_v32  ;;  %v581_v19 = vsel %vm571_vm3, %v5136_v15, %v5134_v41  ;;  %v580_v39 = vsel %vm571_vm3, %v5125_v23, %v5136_v15 }
 0x117   : >> { %4128 = vmatpush1.bf16.msk.msra.mxu0 %vm5103_vm0, %v787_v45  ;;  %v8963_v45 = vmov 0   ;;  %v5299_v32 = vcombine.low %v8946_v2, %v8945_v4  ;;  %v5316_v23 = vcombine.high %v8944_v5, %v8943_v6  ;;  %v591_v15 = vsel %vm571_vm3, %v5178_v12, %v5176_v14 }
 0x118   : >> { %v5240_v42 = vpop.permute.xlu0 %754  ;;  %v868_v22 = vsel %vm864_vm13, 65537, %v8963_v45 }
 0x119   : >> { %v5238_v46 = vpop.permute.xlu1 %756  ;;  %v790_v49 = vsel %vm774_vm5, %v753_v16, %v5240_v42  ;;  %v5273_v16 = vcombine.high %v8946_v2, %v8945_v4 }
 0x11a   : >> { %4174 = vmatprep.subr.msk.bf16.mxu1 %vm5095_vm15, %v790_v49  ;;  %v586_v49 = vsel %vm571_vm3, %v5156_v33, %v5154_v31 }
 0x11b   : >> { %4176 = vmatpush1.bf16.msk.msra.mxu1 %vm5103_vm0, %v789_v29  ;;  %v8970_v29 = vld [vmem:[#allocation46_spill] sm:$0xff] }
 0x11c   : >> { %v5249_v52 = vpop.permute.xlu0 %758 }
 0x11d   : >> { %v761_v57 = vpop.permute.xlu1 %760 }
 0x120   : >> { %v763_v61 = vpop.permute.xlu0 %762 }
 0x121   : >> { %v765_v56 = vpop.permute.xlu1 %764  ;;  %v793_v55 = vsel %vm774_vm5, %v761_v57, %v763_v61  ;;  %v779_v57 = vsel %vm774_vm5, %v5197_v50, %v5192_v47  ;;  %v785_v50 = vsel %vm774_vm5, %v5219_v58, %v5230_v38  ;;  %v8974_v58 = vld [vmem:[#allocation19_spill] sm:$0xff] }
 0x122   : >> { %v794_v36 = vsel %vm774_vm5, %v763_v61, %v765_v56 }
 0x123   : >> { %4130 = vmatprep.subr.msk.bf16.mxu0 %vm5095_vm15, %v794_v36 }
 0x124   : >> { %4132 = vmatpush1.bf16.msk.msra.mxu0 %vm5103_vm0, %v793_v55  ;;  %v767_v35 = vpop.permute.xlu0 %766 }
 0x125   : >> { %v5261_v60 = vpop.permute.xlu1 %768  ;;  %4198 = vmatprep.subr.msk.bf16.mxu0 %vm5095_vm15, %v576_v20  ;;  %v795_v26 = vsel %vm774_vm5, %v765_v56, %v767_v35  ;;  %v786_v56 = vsel %vm774_vm5, %v5230_v38, %v5228_v63  ;;  %v792_v63 = vsel %vm774_vm5, %v5238_v46, %v5249_v52  ;;  %v8975_v38 = vld [vmem:[#allocation18_spill] sm:$0xff] }
 0x126   : >> { %v796_v27 = vsel %vm774_vm5, %v767_v35, %v5261_v60  ;;  %v5465_v52 = vcombine.high %v8975_v38, %v8974_v58 }
 0x127   : >> { %1187 = vmatmul.mubr.bf16.vlgmr.msra.gmra.mrb[0].mxu0 %v5257_v25  ;;  %4178 = vmatprep.subr.msk.bf16.mxu1 %vm5095_vm15, %v796_v27 }
 0x128   : >> { %4180 = vmatpush1.bf16.msk.msra.mxu1 %vm5103_vm0, %v795_v26  ;;  %4200 = vmatpush1.bf16.msk.msra.mxu0 %vm5103_vm0, %v575_v24  ;;  %v791_v24 = vsel %vm774_vm5, %v5240_v42, %v5238_v46  ;;  %v5492_v42 = vcombine.low %v8975_v38, %v8974_v58 }
 0x129   : >> { %4202 = vmatprep.subr.msk.bf16.mxu0 %vm5095_vm15, %v581_v19  ;;  %1733 = vmatprep.subr.bf16.mxu1 %v8963_v45  ;;  %v8976_v19 = vld [vmem:[#allocation21_spill] sm:$0xff] }
 0x12a   : >> { %4134 = vmatprep.mubr.msk.bf16.mxu0 %vm1105_vm9, %v5273_v16 }
 0x12b   : >> { %1380 = vmatmul.mubr.bf16.vlgmr.msra.gmra.mrb[0].mxu1 %v5257_v25 }
 0x12c   : >> { %4204 = vmatpush1.bf16.msk.msra.mxu0 %vm5103_vm0, %v580_v39  ;;  %4246 = vmatpush1.bf16.msk.msra.mxu1 %vm5103_vm0, %v5114_v17  ;;  %v585_v17 = vsel %vm571_vm3, %v5145_v18, %v5156_v33  ;;  %v590_v18 = vsel %vm571_vm3, %v5165_v51, %v5178_v12  ;;  %v773_v33 = vpop.permute.xlu1 %772  ;;  %v8967_v51 = vld [vmem:[#allocation16_spill] sm:$0xff] }
 0x12d   : >> { %4206 = vmatprep.subr.msk.bf16.mxu0 %vm5095_vm15, %v586_v49  ;;  %1735 = vmatprep.subr.bf16.mxu1 %v8963_v45  ;;  %v5456_v20 = vcombine.low %v8967_v51, %v8938_v13  ;;  %v8977_v39 = vld [vmem:[#allocation20_spill] sm:$0xff] }
 0x12e   : >> { %4182 = vmatprep.mubr.msk.bf16.mxu1 %vm1105_vm9, %v5273_v16  ;;  %v5500_v49 = vcombine.high %v8977_v39, %v8976_v19 }
 0x12f   : >> { %1197 = vmatmul.mubr.bf16.gmra.mrb[4].mxu0 %v5299_v32 }
 0x130   : >> { %4208 = vmatpush1.bf16.msk.msra.mxu0 %vm5103_vm0, %v585_v17  ;;  %4248 = vmatpush1.bf16.msk.msra.mxu1 %vm5103_vm0, %v5134_v41  ;;  %v5341_v41 = vcombine.low %v8944_v5, %v8943_v6  ;;  %v822_v12 = vpop.permute.xlu1 %821  ;;  %v8978_v17 = vld [vmem:[#allocation23_spill] sm:$0xff] }
 0x131   : >> { %4210 = vmatprep.subr.msk.bf16.mxu0 %vm5095_vm15, %v591_v15  ;;  %1737 = vmatprep.subr.bf16.mxu1 %v8963_v45  ;;  %vm831_vm15 = vcmask 949248   ;;  %v8979_v15 = vld [vmem:[#allocation22_spill] sm:$0xff] }
 0x132   : >> { %4135 = vmatprep.mubr.msk.bf16.mxu0 %vm1105_vm9, %v5316_v23  ;;  %v838_v61 = vsel %vm831_vm15, %v786_v56, %v822_v12 }
 0x133   : >> { %1390 = vmatmul.mubr.bf16.gmra.mrb[4].mxu1 %v5299_v32 }
 0x134   : >> { %4212 = vmatpush1.bf16.msk.msra.mxu0 %vm5103_vm0, %v590_v18  ;;  %4250 = vmatpush1.bf16.msk.msra.mxu1 %vm5103_vm0, %v5154_v31  ;;  %v893_v31 = vrot.slane %v868_v22, %v5068_v37  ;;  %v826_v35 = vpop.permute.xlu1 %825  ;;  %v5527_v18 = vcombine.low %v8979_v15, %v8978_v17 }
 0x135   : >> { %1548 = vmatprep.subr.bf16.mxu0 %v4854_v40  ;;  %1739 = vmatprep.subr.bf16.mxu1 %v8963_v45  ;;  %v5368_v40 = vpop.permute.xlu0 %770 }
 0x136   : >> { %4183 = vmatprep.mubr.msk.bf16.mxu1 %vm1105_vm9, %v5316_v23  ;;  %vm5394_vm13 = vcmp.eq.s16.totalorder %v893_v31, 0  ;;  %v798_v55 = vsel %vm774_vm5, %v5368_v40, %v773_v33  ;;  %v797_v46 = vsel %vm774_vm5, %v5261_v60, %v5368_v40  ;;  %v5513_v60 = vcombine.low %v8977_v39, %v8976_v19  ;;  %v8980_v40 = vld [vmem:[#allocation26_spill] sm:$0xff] }
 0x137   : >> { %1207 = vmatmul.mubr.bf16.gmra.mrb[8].mxu0 %v5341_v41  ;;  %v846_v26 = vsel %vm831_vm15, %v798_v55, %v826_v35 }
 0x138   : >> { %1549 = vmatpush1.bf16.msra.mxu0 %v4911_v48  ;;  %4252 = vmatpush1.bf16.msk.msra.mxu1 %vm5103_vm0, %v5176_v14  ;;  %v5373_v48 = vcombine.low %v8942_v7, %v8941_v8  ;;  %vm4489_vm0 = vmmov 1   ;;  %v5414_v14 = vcombine.high %v8967_v51, %v8938_v13 }
 0x139   : >> { %1550 = vmatprep.subr.bf16.mxu0 %v4851_v34  ;;  %4136 = vmatprep.mubr.msk.bf16.mxu0 %vm1105_vm9, %v5352_v10  ;;  %v5381_v34 = vcombine.high %v8940_v9, %v8939_v11  ;;  %vm865_vm12 = vmpackc.low %vm4489_vm0, %vm4489_vm0 }
 0x13a   : >> { %1741 = vmatprep.subr.bf16.mxu1 %v8963_v45 }
 0x13b   : >> { %1400 = vmatmul.mubr.bf16.gmra.mrb[8].mxu1 %v5341_v41 }
 0x13c   : >> { %1551 = vmatpush1.bf16.msra.mxu0 %v4938_v54  ;;  %4184 = vmatprep.mubr.msk.bf16.mxu1 %vm1105_vm9, %v5352_v10  ;;  %v820_v54 = vpop.permute.xlu0 %819 }
 0x13d   : >> { %1552 = vmatprep.subr.bf16.mxu0 %v4874_v30  ;;  %1742 = vmatpush1.bf16.msra.mxu1 %v4864_v62  ;;  %v889_v62 = vrot.slane %v868_v22, %v5071_v28  ;;  %v5405_v30 = vcombine.low %v8940_v9, %v8939_v11  ;;  %v8981_v22 = vld [vmem:[#allocation25_spill] sm:$0xff] }
 0x13e   : >> { %1743 = vmatprep.subr.bf16.mxu1 %v8963_v45  ;;  %v5533_v31 = vcombine.high %v8981_v22, %v8980_v40  ;;  %v5541_v33 = vcombine.low %v8981_v22, %v8980_v40 }
 0x13f   : >> { %1217 = vmatmul.mubr.bf16.gmra.mrb[12].mxu0 %v5373_v48  ;;  %vm5418_vm0 = vcmp.eq.s16.totalorder %v889_v62, 0  ;;  %v8983_v62 = vld [vmem:[#allocation27_spill] sm:$0xff] }
 0x140   : >> { %1553 = vmatpush1.bf16.msra.mxu0 %v4965_v3  ;;  %4137 = vmatprep.mubr.msk.bf16.mxu0 %vm1105_vm9, %v5381_v34  ;;  %v780_v3 = vsel %vm774_vm5, %v5192_v47, %v5208_v53  ;;  %v824_v36 = vpop.permute.xlu0 %823  ;;  %vm2951_vm5 = vcmask 826368  }
 0x141   : >> { %1554 = vmatprep.subr.bf16.mxu0 %v4884_v44  ;;  %1744 = vmatpush1.bf16.msra.mxu1 %v4859_v43  ;;  %v869_v44 = vsel %vm865_vm12, 65537, %v8963_v45  ;;  %v834_v43 = vsel %vm831_vm15, %v780_v3, %v820_v54  ;;  %v842_v27 = vsel %vm831_vm15, %v792_v63, %v824_v36  ;;  %v8991_v63 = vld [vmem:[#allocation35_spill] sm:$0xff]  ;;  %vm3192_vm15 = vcmask 957440  }
 0x142   : >> { %1745 = vmatprep.subr.bf16.mxu1 %v8963_v45 }
 0x143   : >> { %1410 = vmatmul.mubr.bf16.gmra.mrb[12].mxu1 %v5373_v48 }
 0x144   : >> { %1555 = vmatpush1.bf16.msra.mxu0 %v4992_v59  ;;  %4185 = vmatprep.mubr.msk.bf16.mxu1 %vm1105_vm9, %v5381_v34  ;;  %v897_v59 = vrot.slane %v869_v44, %v5071_v28  ;;  %v8971_v28 = vld [vmem:[#allocation47_spill] sm:$0xff]  ;;  %v8984_v44 = vld [vmem:[#allocation30_spill] sm:$0xff] }
 0x145   : >> { %4214 = vmatprep.subr.msk.bf16.mxu0 %vm5394_vm13, %v834_v43  ;;  %1746 = vmatpush1.bf16.msra.mxu1 %v8970_v29  ;;  %v8985_v43 = vld [vmem:[#allocation29_spill] sm:$0xff]  ;;  %v8986_v29 = vld [vmem:[#allocation32_spill] sm:$0xff] }
 0x146   : >> { %1747 = vmatprep.subr.bf16.mxu1 %v8963_v45  ;;  %vm5441_vm12 = vcmp.eq.s16.totalorder %v897_v59, 0  ;;  %v5569_v53 = vcombine.low %v8985_v43, %v8984_v44  ;;  %v8987_v59 = vld [vmem:[#allocation31_spill] sm:$0xff] }
 0x147   : >> { %1227 = vmatmul.mubr.bf16.gmra.mrb[16].mxu0 %v5405_v30  ;;  %v5583_v56 = vcombine.low %v8987_v59, %v8986_v29 }
 0x148   : >> { %4216 = vmatpush1.bf16.msk.msra.mxu0 %vm5418_vm0, %v779_v57  ;;  %4138 = vmatprep.mubr.msk.bf16.mxu0 %vm1105_vm9, %v5414_v14  ;;  %v5575_v57 = vcombine.high %v8987_v59, %v8986_v29 }
 0x149   : >> { %4218 = vmatprep.subr.msk.bf16.mxu0 %vm5394_vm13, %v838_v61  ;;  %1748 = vmatpush1.bf16.msra.mxu1 %v8971_v28  ;;  %v8988_v61 = vld [vmem:[#allocation34_spill] sm:$0xff] }
 0x14a   : >> { %1749 = vmatprep.subr.bf16.mxu1 %v8963_v45 }
 0x14b   : >> { %1420 = vmatmul.mubr.bf16.gmra.mrb[16].mxu1 %v5405_v30 }
 0x14c   : >> { %4220 = vmatpush1.bf16.msk.msra.mxu0 %vm5418_vm0, %v785_v50  ;;  %4186 = vmatprep.mubr.msk.bf16.mxu1 %vm1105_vm9, %v5414_v14  ;;  %v8990_v50 = vld [vmem:[#allocation36_spill] sm:$0xff] }
 0x14d   : >> { %4222 = vmatprep.subr.msk.bf16.mxu0 %vm5394_vm13, %v842_v27  ;;  %4254 = vmatpush1.bf16.msk.msra.mxu1 %vm5441_vm12, %v820_v54  ;;  %v8982_v54 = vld [vmem:[#allocation28_spill] sm:$0xff]  ;;  %v5601_v55 = vcombine.high %v8991_v63, %v8990_v50  ;;  %v8992_v27 = vld [vmem:[#allocation38_spill] sm:$0xff] }
 0x14e   : >> { %1751 = vmatprep.subr.bf16.mxu1 %v8963_v45  ;;  %v5547_v37 = vcombine.high %v8983_v62, %v8982_v54  ;;  %v5555_v3 = vcombine.low %v8983_v62, %v8982_v54 }
 0x14f   : >> { %1237 = vmatmul.mubr.bf16.gmra.mrb[20].mxu0 %v5456_v20 }
 0x150   : >> { %4224 = vmatpush1.bf16.msk.msra.mxu0 %vm5418_vm0, %v791_v24  ;;  %4139 = vmatprep.mubr.msk.bf16.mxu0 %vm1105_vm9, %v5465_v52 }
 0x151   : >> { %4226 = vmatprep.subr.msk.bf16.mxu0 %vm5394_vm13, %v846_v26  ;;  %4256 = vmatpush1.bf16.msk.msra.mxu1 %vm5441_vm12, %v822_v12  ;;  %v5561_v12 = vcombine.high %v8985_v43, %v8984_v44  ;;  %v8993_v26 = vld [vmem:[#allocation37_spill] sm:$0xff]  ;;  %vm3841_vm13 = vcmask 130048  }
 0x152   : >> { %1753 = vmatprep.subr.bf16.mxu1 %v8963_v45  ;;  %v5615_v24 = vcombine.high %v8993_v26, %v8992_v27 }
 0x153   : >> { %1430 = vmatmul.mubr.bf16.gmra.mrb[20].mxu1 %v5456_v20 }
 0x154   : >> { %4228 = vmatpush1.bf16.msk.msra.mxu0 %vm5418_vm0, %v797_v46  ;;  %4187 = vmatprep.mubr.msk.bf16.mxu1 %vm1105_vm9, %v5465_v52  ;;  %v5624_v46 = vcombine.low %v8993_v26, %v8992_v27 }
 0x155   : >> { %4258 = vmatpush1.bf16.msk.msra.mxu1 %vm5441_vm12, %v824_v36  ;;  %v8989_v36 = vld [vmem:[#allocation33_spill] sm:$0xff] }
 0x156   : >> { %1755 = vmatprep.subr.bf16.mxu1 %v8963_v45  ;;  %v5519_v45 = vcombine.high %v8979_v15, %v8978_v17  ;;  %v5589_v28 = vcombine.high %v8989_v36, %v8988_v61  ;;  %v5597_v47 = vcombine.low %v8989_v36, %v8988_v61 }
 0x157   : >> { %1247 = vmatmul.mubr.bf16.gmra.mrb[24].mxu0 %v5492_v42 }
 0x158   : >> { %4140 = vmatprep.mubr.msk.bf16.mxu0 %vm1105_vm9, %v5500_v49 }
 0x159   : >> { %4260 = vmatpush1.bf16.msk.msra.mxu1 %vm5441_vm12, %v826_v35  ;;  %v5610_v35 = vcombine.low %v8991_v63, %v8990_v50 }
 0x15b   : >> { %1440 = vmatmul.mubr.bf16.gmra.mrb[24].mxu1 %v5492_v42 }
 0x15c   : >> { %4188 = vmatprep.mubr.msk.bf16.mxu1 %vm1105_vm9, %v5500_v49 }
 0x15f   : >> { %1257 = vmatmul.mubr.bf16.gmra.mrb[28].mxu0 %v5513_v60 }
 0x160   : >> { %4141 = vmatprep.mubr.msk.bf16.mxu0 %vm1105_vm9, %v5519_v45 }
 0x163   : >> { %1450 = vmatmul.mubr.bf16.gmra.mrb[28].mxu1 %v5513_v60 }
 0x164   : >> { %4189 = vmatprep.mubr.msk.bf16.mxu1 %vm1105_vm9, %v5519_v45 }
 0x167   : >> { %1267 = vmatmul.mubr.bf16.gmra.mrb[32].mxu0 %v5527_v18 }
 0x168   : >> { %4142 = vmatprep.mubr.msk.bf16.mxu0 %vm1105_vm9, %v5533_v31 }
 0x16b   : >> { %1460 = vmatmul.mubr.bf16.gmra.mrb[32].mxu1 %v5527_v18 }
 0x16c   : >> { %4190 = vmatprep.mubr.msk.bf16.mxu1 %vm1105_vm9, %v5533_v31 }
 0x16f   : >> { %1277 = vmatmul.mubr.bf16.gmra.mrb[36].mxu0 %v5541_v33 }
 0x170   : >> { %4143 = vmatprep.mubr.msk.bf16.mxu0 %vm1105_vm9, %v5547_v37 }
 0x173   : >> { %1470 = vmatmul.mubr.bf16.gmra.mrb[36].mxu1 %v5541_v33 }
 0x174   : >> { %4191 = vmatprep.mubr.msk.bf16.mxu1 %vm1105_vm9, %v5547_v37 }
 0x177   : >> { %1287 = vmatmul.mubr.bf16.gmra.mrb[40].mxu0 %v5555_v3 }
 0x178   : >> { %4144 = vmatprep.mubr.msk.bf16.mxu0 %vm1105_vm9, %v5561_v12 }
 0x17b   : >> { %1480 = vmatmul.mubr.bf16.gmra.mrb[40].mxu1 %v5555_v3 }
 0x17c   : >> { %4192 = vmatprep.mubr.msk.bf16.mxu1 %vm1105_vm9, %v5561_v12 }
 0x17f   : >> { %1297 = vmatmul.mubr.bf16.gmra.mrb[44].mxu0 %v5569_v53 }
 0x180   : >> { %4145 = vmatprep.mubr.msk.bf16.mxu0 %vm1105_vm9, %v5575_v57 }
 0x183   : >> { %1490 = vmatmul.mubr.bf16.gmra.mrb[44].mxu1 %v5569_v53 }
 0x184   : >> { %4193 = vmatprep.mubr.msk.bf16.mxu1 %vm1105_vm9, %v5575_v57 }
 0x187   : >> { %1307 = vmatmul.mubr.bf16.gmra.mrb[48].mxu0 %v5583_v56 }
 0x188   : >> { %4146 = vmatprep.mubr.msk.bf16.mxu0 %vm1105_vm9, %v5589_v28 }
 0x18b   : >> { %1500 = vmatmul.mubr.bf16.gmra.mrb[48].mxu1 %v5583_v56 }
 0x18c   : >> { %4194 = vmatprep.mubr.msk.bf16.mxu1 %vm1105_vm9, %v5589_v28 }
 0x18f   : >> { %1317 = vmatmul.mubr.bf16.gmra.mrb[52].mxu0 %v5597_v47 }
 0x190   : >> { %4147 = vmatprep.mubr.msk.bf16.mxu0 %vm1105_vm9, %v5601_v55 }
 0x193   : >> { %1510 = vmatmul.mubr.bf16.gmra.mrb[52].mxu1 %v5597_v47 }
 0x194   : >> { %4195 = vmatprep.mubr.msk.bf16.mxu1 %vm1105_vm9, %v5601_v55 }
 0x197   : >> { %1327 = vmatmul.mubr.bf16.gmra.mrb[56].mxu0 %v5610_v35 }
 0x198   : >> { %4148 = vmatprep.mubr.msk.bf16.mxu0 %vm1105_vm9, %v5615_v24 }
 0x19b   : >> { %1520 = vmatmul.mubr.bf16.gmra.mrb[56].mxu1 %v5610_v35 }
 0x19c   : >> { %4196 = vmatprep.mubr.msk.bf16.mxu1 %vm1105_vm9, %v5615_v24 }
 0x19f   : >> { %1337 = vmatmul.mubr.bf16.gmra.mrb[60].mxu0 %v5624_v46 }
 0x1a0   : >> { %4229 = vmatprep.mubr.msk.bf16.mxu0 %vm1105_vm9, %v8994_v0 }
 0x1a3   : >> { %1530 = vmatmul.mubr.bf16.gmra.mrb[60].mxu1 %v5624_v46 }
 0x1a4   : >> { %4261 = vmatprep.mubr.msk.bf16.mxu1 %vm1105_vm9, %v8994_v0 }
 0x1a7   : >> { %1573 = vmatmul.mubr.bf16.vlgmr.msra.gmra.mrb[64].mxu0 %v5257_v25 }
 0x1a8   : >> { %4230 = vmatprep.mubr.msk.bf16.mxu0 %vm1105_vm9, %v5273_v16 }
 0x1ab   : >> { %1766 = vmatmul.mubr.bf16.vlgmr.msra.gmra.mrb[64].mxu1 %v5257_v25 }
 0x1ac   : >> { %4262 = vmatprep.mubr.msk.bf16.mxu1 %vm1105_vm9, %v5273_v16 }
 0x1af   : >> { %1583 = vmatmul.mubr.bf16.gmra.mrb[68].mxu0 %v5299_v32 }
 0x1b0   : >> { %4231 = vmatprep.mubr.msk.bf16.mxu0 %vm1105_vm9, %v5316_v23 }
 0x1b3   : >> { %1774 = vmatmul.mubr.bf16.gmra.mrb[68].mxu1 %v5299_v32 }
 0x1b4   : >> { %4263 = vmatprep.mubr.msk.bf16.mxu1 %vm1105_vm9, %v5316_v23 }
 0x1b7   : >> { %1593 = vmatmul.mubr.bf16.gmra.mrb[72].mxu0 %v5341_v41 }
 0x1b8   : >> { %4232 = vmatprep.mubr.msk.bf16.mxu0 %vm1105_vm9, %v5352_v10 }
 0x1bb   : >> { %1782 = vmatmul.mubr.bf16.gmra.mrb[72].mxu1 %v5341_v41 }
 0x1bc   : >> { %4264 = vmatprep.mubr.msk.bf16.mxu1 %vm1105_vm9, %v5352_v10 }
 0x1bf   : >> { %1603 = vmatmul.mubr.bf16.gmra.mrb[76].mxu0 %v5373_v48 }
 0x1c0   : >> { %4233 = vmatprep.mubr.msk.bf16.mxu0 %vm1105_vm9, %v5381_v34 }
 0x1c3   : >> { %1790 = vmatmul.mubr.bf16.gmra.mrb[76].mxu1 %v5373_v48 }
 0x1c4   : >> { %4265 = vmatprep.mubr.msk.bf16.mxu1 %vm1105_vm9, %v5381_v34 }
 0x1c7   : >> { %1613 = vmatmul.mubr.bf16.gmra.mrb[80].mxu0 %v5405_v30 }
 0x1c8   : >> { %4234 = vmatprep.mubr.msk.bf16.mxu0 %vm1105_vm9, %v5414_v14 }
 0x1cb   : >> { %1798 = vmatmul.mubr.bf16.gmra.mrb[80].mxu1 %v5405_v30 }
 0x1cc   : >> { %4266 = vmatprep.mubr.msk.bf16.mxu1 %vm1105_vm9, %v5414_v14 }
 0x1cf   : >> { %1623 = vmatmul.mubr.bf16.gmra.mrb[84].mxu0 %v5456_v20 }
 0x1d0   : >> { %4235 = vmatprep.mubr.msk.bf16.mxu0 %vm1105_vm9, %v5465_v52 }
 0x1d3   : >> { %1806 = vmatmul.mubr.bf16.gmra.mrb[84].mxu1 %v5456_v20 }
 0x1d4   : >> { %4267 = vmatprep.mubr.msk.bf16.mxu1 %vm1105_vm9, %v5465_v52 }
 0x1d7   : >> { %1633 = vmatmul.mubr.bf16.gmra.mrb[88].mxu0 %v5492_v42 }
 0x1d8   : >> { %4236 = vmatprep.mubr.msk.bf16.mxu0 %vm1105_vm9, %v5500_v49 }
 0x1db   : >> { %1814 = vmatmul.mubr.bf16.gmra.mrb[88].mxu1 %v5492_v42 }
 0x1dc   : >> { %4268 = vmatprep.mubr.msk.bf16.mxu1 %vm1105_vm9, %v5500_v49 }
 0x1df   : >> { %1643 = vmatmul.mubr.bf16.gmra.mrb[92].mxu0 %v5513_v60 }
 0x1e0   : >> { %4237 = vmatprep.mubr.msk.bf16.mxu0 %vm1105_vm9, %v5519_v45 }
 0x1e3   : >> { %1822 = vmatmul.mubr.bf16.gmra.mrb[92].mxu1 %v5513_v60 }
 0x1e4   : >> { %4269 = vmatprep.mubr.msk.bf16.mxu1 %vm1105_vm9, %v5519_v45 }
 0x1e7   : >> { %1653 = vmatmul.mubr.bf16.gmra.mrb[96].mxu0 %v5527_v18 }
 0x1e8   : >> { %4238 = vmatprep.mubr.msk.bf16.mxu0 %vm1105_vm9, %v5533_v31 }
 0x1eb   : >> { %1830 = vmatmul.mubr.bf16.gmra.mrb[96].mxu1 %v5527_v18 }
 0x1ec   : >> { %4270 = vmatprep.mubr.msk.bf16.mxu1 %vm1105_vm9, %v5533_v31 }
 0x1ef   : >> { %1663 = vmatmul.mubr.bf16.gmra.mrb[100].mxu0 %v5541_v33 }
 0x1f0   : >> { %4239 = vmatprep.mubr.msk.bf16.mxu0 %vm1105_vm9, %v5547_v37 }
 0x1f3   : >> { %1838 = vmatmul.mubr.bf16.gmra.mrb[100].mxu1 %v5541_v33 }
 0x1f4   : >> { %4271 = vmatprep.mubr.msk.bf16.mxu1 %vm1105_vm9, %v5547_v37 }
 0x1f7   : >> { %1673 = vmatmul.mubr.bf16.gmra.mrb[104].mxu0 %v5555_v3 }
 0x1f8   : >> { %4240 = vmatprep.mubr.msk.bf16.mxu0 %vm1105_vm9, %v5561_v12 }
 0x1fa   : >> { %v5698_v0 = vpop.f32.mrb[0].mxu0 }
 0x1fb   : >> { %8995 = vst [vmem:[#allocation46_spill] sm:$0xff] %v5698_v0  ;;  %v5700_v25 = vpop.f32.mrb[1].mxu0  ;;  %1846 = vmatmul.mubr.bf16.gmra.mrb[104].mxu1 %v5555_v3 }
 0x1fc   : >> { %v5703_v16 = vpop.f32.mrb[2].mxu0  ;;  %4272 = vmatprep.mubr.msk.bf16.mxu1 %vm1105_vm9, %v5561_v12 }
 0x1fd   : >> { %8996 = vst [vmem:[#allocation47_spill] sm:$0xff] %v5703_v16  ;;  %v5707_v32 = vpop.f32.mrb[3].mxu0 }
 0x1fe   : >> { %v5709_v23 = vpop.f32.mrb[0].mxu1 }
 0x1ff   : >> { %v5711_v41 = vpop.f32.mrb[1].mxu1  ;;  %1683 = vmatmul.mubr.bf16.gmra.mrb[108].mxu0 %v5569_v53 }
 0x200   : >> { %v5714_v10 = vpop.f32.mrb[2].mxu1  ;;  %4241 = vmatprep.mubr.msk.bf16.mxu0 %vm1105_vm9, %v5575_v57 }
 0x201   : >> { %v5718_v48 = vpop.f32.mrb[3].mxu1 }
 0x202   : >> { %v5720_v34 = vpop.f32.mrb[4].mxu0 }
 0x203   : >> { %8997 = vst [vmem:[#allocation48_spill] sm:$0xff] %v5720_v34  ;;  %v5722_v30 = vpop.f32.mrb[5].mxu0  ;;  %1854 = vmatmul.mubr.bf16.gmra.mrb[108].mxu1 %v5569_v53 }
 0x204   : >> { %v5725_v14 = vpop.f32.mrb[6].mxu0  ;;  %4273 = vmatprep.mubr.msk.bf16.mxu1 %vm1105_vm9, %v5575_v57 }
 0x205   : >> { %8998 = vst [vmem:[#allocation49_spill] sm:$0xff] %v5725_v14  ;;  %v5729_v20 = vpop.f32.mrb[7].mxu0 }
 0x206   : >> { %v5731_v52 = vpop.f32.mrb[4].mxu1 }
 0x207   : >> { %v5733_v42 = vpop.f32.mrb[5].mxu1  ;;  %1693 = vmatmul.mubr.bf16.gmra.mrb[112].mxu0 %v5583_v56 }
 0x208   : >> { %v5736_v49 = vpop.f32.mrb[6].mxu1  ;;  %4242 = vmatprep.mubr.msk.bf16.mxu0 %vm1105_vm9, %v5589_v28 }
 0x209   : >> { %v5740_v60 = vpop.f32.mrb[7].mxu1 }
 0x20a   : >> { %v5742_v45 = vpop.f32.mrb[8].mxu0 }
 0x20b   : >> { %8999 = vst [vmem:[#allocation50_spill] sm:$0xff] %v5742_v45  ;;  %v5744_v18 = vpop.f32.mrb[9].mxu0  ;;  %1862 = vmatmul.mubr.bf16.gmra.mrb[112].mxu1 %v5583_v56 }
 0x20c   : >> { %v5747_v31 = vpop.f32.mrb[10].mxu0  ;;  %4274 = vmatprep.mubr.msk.bf16.mxu1 %vm1105_vm9, %v5589_v28 }
 0x20d   : >> { %9000 = vst [vmem:[#allocation51_spill] sm:$0xff] %v5747_v31  ;;  %v5751_v33 = vpop.f32.mrb[11].mxu0 }
 0x20e   : >> { %v5753_v37 = vpop.f32.mrb[8].mxu1 }
 0x20f   : >> { %v5755_v3 = vpop.f32.mrb[9].mxu1  ;;  %1703 = vmatmul.mubr.bf16.gmra.mrb[116].mxu0 %v5597_v47 }
 0x210   : >> { %v5758_v12 = vpop.f32.mrb[10].mxu1  ;;  %4243 = vmatprep.mubr.msk.bf16.mxu0 %vm1105_vm9, %v5601_v55 }
 0x211   : >> { %v5762_v53 = vpop.f32.mrb[11].mxu1 }
 0x212   : >> { %v5764_v57 = vpop.f32.mrb[12].mxu0 }
 0x213   : >> { %9001 = vst [vmem:[#allocation52_spill] sm:$0xff] %v5764_v57  ;;  %v5766_v56 = vpop.f32.mrb[13].mxu0  ;;  %1870 = vmatmul.mubr.bf16.gmra.mrb[116].mxu1 %v5597_v47 }
 0x214   : >> { %v5769_v28 = vpop.f32.mrb[14].mxu0  ;;  %4275 = vmatprep.mubr.msk.bf16.mxu1 %vm1105_vm9, %v5601_v55 }
 0x215   : >> { %9002 = vst [vmem:[#allocation53_spill] sm:$0xff] %v5769_v28  ;;  %v5773_v1 = vpop.f32.mrb[15].mxu0 }
 0x216   : >> { %v5775_v2 = vpop.f32.mrb[12].mxu1 }
 0x217   : >> { %v5777_v4 = vpop.f32.mrb[13].mxu1  ;;  %1713 = vmatmul.mubr.bf16.gmra.mrb[120].mxu0 %v5610_v35 }
 0x218   : >> { %v5780_v5 = vpop.f32.mrb[14].mxu1  ;;  %4244 = vmatprep.mubr.msk.bf16.mxu0 %vm1105_vm9, %v5615_v24 }
 0x219   : >> { %v5784_v6 = vpop.f32.mrb[15].mxu1 }
 0x21a   : >> { %v5786_v47 = vpop.f32.mrb[16].mxu0 }
 0x21b   : >> { %9003 = vst [vmem:[#allocation54_spill] sm:$0xff] %v5786_v47  ;;  %v5788_v7 = vpop.f32.mrb[17].mxu0  ;;  %1878 = vmatmul.mubr.bf16.gmra.mrb[120].mxu1 %v5610_v35 }
 0x21c   : >> { %9004 = vst [vmem:[#allocation55_spill] sm:$0xff] %v5788_v7  ;;  %v5791_v55 = vpop.f32.mrb[18].mxu0  ;;  %4276 = vmatprep.mubr.msk.bf16.mxu1 %vm1105_vm9, %v5615_v24  ;;  %vm3481_vm9 = vcmask 7168  }
 0x21d   : >> { %9005 = vst [vmem:[#allocation56_spill] sm:$0xff] %v5791_v55  ;;  %v5795_v8 = vpop.f32.mrb[19].mxu0 }
 0x21e   : >> { %9006 = vst [vmem:[#allocation57_spill] sm:$0xff] %v5795_v8  ;;  %v5797_v9 = vpop.f32.mrb[16].mxu1 }
 0x21f   : >> { %9007 = vst [vmem:[#allocation58_spill] sm:$0xff] %v5797_v9  ;;  %v5799_v11 = vpop.f32.mrb[17].mxu1  ;;  %1723 = vmatmul.mubr.bf16.gmra.mrb[124].mxu0 %v5624_v46 }
 0x220   : >> { %9008 = vst [vmem:[#allocation59_spill] sm:$0xff] %v5799_v11  ;;  %v5802_v13 = vpop.f32.mrb[18].mxu1 }
 0x221   : >> { %9009 = vst [vmem:[#allocation60_spill] sm:$0xff] %v5802_v13  ;;  %v5804_v15 = vpop.f32.mrb[19].mxu1 }
 0x222   : >> { %9010 = vst [vmem:[#allocation61_spill] sm:$0xff] %v5804_v15  ;;  %v5806_v17 = vpop.f32.mrb[20].mxu0 }
 0x223   : >> { %9011 = vst [vmem:[#allocation62_spill] sm:$0xff] %v5806_v17  ;;  %v5808_v35 = vpop.f32.mrb[21].mxu0  ;;  %1886 = vmatmul.mubr.bf16.gmra.mrb[124].mxu1 %v5624_v46 }
 0x224   : >> { %9012 = vst [vmem:[#allocation63_spill] sm:$0xff] %v5808_v35  ;;  %v5811_v19 = vpop.f32.mrb[22].mxu0 }
 0x225   : >> { %9013 = vst [vmem:[#allocation64_spill] sm:$0xff] %v5811_v19  ;;  %v5813_v24 = vpop.f32.mrb[23].mxu0 }
 0x226   : >> { %9014 = vst [vmem:[#allocation65_spill] sm:$0xff] %v5813_v24  ;;  %v5815_v21 = vpop.f32.mrb[20].mxu1 }
 0x227   : >> { %9015 = vst [vmem:[#allocation66_spill] sm:$0xff] %v5815_v21  ;;  %v5817_v22 = vpop.f32.mrb[21].mxu1 }
 0x228   : >> { %9016 = vst [vmem:[#allocation67_spill] sm:$0xff] %v5817_v22  ;;  %v5819_v26 = vpop.f32.mrb[22].mxu1 }
 0x229   : >> { %9017 = vst [vmem:[#allocation68_spill] sm:$0xff] %v5819_v26  ;;  %v5821_v27 = vpop.f32.mrb[23].mxu1 }
 0x22a   : >> { %9018 = vst [vmem:[#allocation69_spill] sm:$0xff] %v5821_v27  ;;  %v5823_v29 = vpop.f32.mrb[24].mxu0 }
 0x22b   : >> { %9019 = vst [vmem:[#allocation70_spill] sm:$0xff] %v5823_v29  ;;  %v5825_v36 = vpop.f32.mrb[25].mxu0 }
 0x22c   : >> { %9020 = vst [vmem:[#allocation71_spill] sm:$0xff] %v5825_v36  ;;  %v5827_v38 = vpop.f32.mrb[26].mxu0 }
 0x22d   : >> { %9021 = vst [vmem:[#allocation72_spill] sm:$0xff] %v5827_v38  ;;  %v5829_v39 = vpop.f32.mrb[27].mxu0 }
 0x22e   : >> { %9022 = vst [vmem:[#allocation73_spill] sm:$0xff] %v5829_v39  ;;  %v5831_v46 = vpop.f32.mrb[24].mxu1 }
 0x22f   : >> { %9023 = vst [vmem:[#allocation74_spill] sm:$0xff] %v5831_v46  ;;  %v5833_v40 = vpop.f32.mrb[25].mxu1 }
 0x230   : >> { %9024 = vst [vmem:[#allocation75_spill] sm:$0xff] %v5833_v40  ;;  %v5835_v43 = vpop.f32.mrb[26].mxu1 }
 0x231   : >> { %9025 = vst [vmem:[#allocation76_spill] sm:$0xff] %v5835_v43  ;;  %v5837_v44 = vpop.f32.mrb[27].mxu1 }
 0x232   : >> { %9026 = vst [vmem:[#allocation77_spill] sm:$0xff] %v5837_v44  ;;  %v5839_v50 = vpop.f32.mrb[28].mxu0 }
 0x233   : >> { %9027 = vst [vmem:[#allocation78_spill] sm:$0xff] %v5839_v50  ;;  %v5841_v51 = vpop.f32.mrb[29].mxu0 }
 0x234   : >> { %9028 = vst [vmem:[#allocation79_spill] sm:$0xff] %v5841_v51  ;;  %v5843_v54 = vpop.f32.mrb[30].mxu0 }
 0x235   : >> { %9029 = vst [vmem:[#allocation80_spill] sm:$0xff] %v5843_v54  ;;  %v5845_v58 = vpop.f32.mrb[31].mxu0 }
 0x236   : >> { %9030 = vst [vmem:[#allocation81_spill] sm:$0xff] %v5845_v58  ;;  %v5847_v59 = vpop.f32.mrb[28].mxu1 }
 0x237   : >> { %9031 = vst [vmem:[#allocation82_spill] sm:$0xff] %v5847_v59  ;;  %v5849_v61 = vpop.f32.mrb[29].mxu1 }
 0x238   : >> { %9032 = vst [vmem:[#allocation83_spill] sm:$0xff] %v5849_v61  ;;  %v5851_v62 = vpop.f32.mrb[30].mxu1 }
 0x239   : >> { %9033 = vst [vmem:[#allocation84_spill] sm:$0xff] %v5851_v62  ;;  %v5853_v63 = vpop.f32.mrb[31].mxu1 }
 0x23a   : >> { %9034 = vst [vmem:[#allocation85_spill] sm:$0xff] %v5853_v63  ;;  %v1268_v38 = vpop.f32.mrb[32].mxu0 }
 0x23b   : >> { %2103 = vrot.lane.b32.xlu0 %v1268_v38, %s4484_s5  ;;  %v1270_v29 = vpop.f32.mrb[33].mxu0 }
 0x23c   : >> { %2105 = vrot.lane.b32.xlu1 %v1270_v29, %s4484_s5  ;;  %v1272_v50 = vpop.f32.mrb[34].mxu0 }
 0x23d   : >> { %v1274_v19 = vpop.f32.mrb[35].mxu0 }
 0x23e   : >> { %v1461_v17 = vpop.f32.mrb[32].mxu1 }
 0x23f   : >> { %2107 = vrot.lane.b32.xlu0 %v1461_v17, %s4484_s5  ;;  %v1463_v54 = vpop.f32.mrb[33].mxu1 }
 0x240   : >> { %2109 = vrot.lane.b32.xlu1 %v1463_v54, %s4484_s5  ;;  %v1465_v55 = vpop.f32.mrb[34].mxu1 }
 0x241   : >> { %v1467_v47 = vpop.f32.mrb[35].mxu1 }
 0x242   : >> { %v1278_v28 = vpop.f32.mrb[36].mxu0 }
 0x243   : >> { %2115 = vrot.lane.b32.xlu0 %v1272_v50, %s4484_s5  ;;  %v1280_v57 = vpop.f32.mrb[37].mxu0 }
 0x244   : >> { %2117 = vrot.lane.b32.xlu1 %v1274_v19, %s4484_s5  ;;  %v1282_v38 = vpop.f32.mrb[38].mxu0 }
 0x245   : >> { %v1284_v31 = vpop.f32.mrb[39].mxu0 }
 0x246   : >> { %v1471_v45 = vpop.f32.mrb[36].mxu1 }
 0x247   : >> { %2119 = vrot.lane.b32.xlu0 %v1465_v55, %s4484_s5  ;;  %v1473_v29 = vpop.f32.mrb[37].mxu1 }
 0x248   : >> { %2121 = vrot.lane.b32.xlu1 %v1467_v47, %s4484_s5  ;;  %v1475_v17 = vpop.f32.mrb[38].mxu1 }
 0x249   : >> { %v1477_v14 = vpop.f32.mrb[39].mxu1 }
 0x24a   : >> { %v1288_v34 = vpop.f32.mrb[40].mxu0 }
 0x24b   : >> { %2127 = vrot.lane.b32.xlu0 %v1278_v28, %s4484_s5  ;;  %v1290_v54 = vpop.f32.mrb[41].mxu0 }
 0x24c   : >> { %2129 = vrot.lane.b32.xlu1 %v1280_v57, %s4484_s5  ;;  %v1292_v50 = vpop.f32.mrb[42].mxu0 }
 0x24d   : >> { %v1294_v16 = vpop.f32.mrb[43].mxu0 }
 0x24e   : >> { %v1481_v0 = vpop.f32.mrb[40].mxu1 }
 0x24f   : >> { %2131 = vrot.lane.b32.xlu0 %v1471_v45, %s4484_s5  ;;  %v1483_v19 = vpop.f32.mrb[41].mxu1 }
 0x250   : >> { %2133 = vrot.lane.b32.xlu1 %v1473_v29, %s4484_s5  ;;  %v1485_v55 = vpop.f32.mrb[42].mxu1 }
 0x251   : >> { %v1487_v62 = vpop.f32.mrb[43].mxu1 }
 0x252   : >> { %v1298_v63 = vpop.f32.mrb[44].mxu0 }
 0x253   : >> { %2139 = vrot.lane.b32.xlu0 %v1282_v38, %s4484_s5  ;;  %v1300_v47 = vpop.f32.mrb[45].mxu0 }
 0x254   : >> { %2141 = vrot.lane.b32.xlu1 %v1284_v31, %s4484_s5  ;;  %v1302_v28 = vpop.f32.mrb[46].mxu0 }
 0x255   : >> { %v1304_v58 = vpop.f32.mrb[47].mxu0 }
 0x256   : >> { %v1491_v61 = vpop.f32.mrb[44].mxu1 }
 0x257   : >> { %2143 = vrot.lane.b32.xlu0 %v1475_v17, %s4484_s5  ;;  %v1493_v57 = vpop.f32.mrb[45].mxu1 }
 0x258   : >> { %2145 = vrot.lane.b32.xlu1 %v1477_v14, %s4484_s5  ;;  %v1495_v45 = vpop.f32.mrb[46].mxu1 }
 0x259   : >> { %v1497_v51 = vpop.f32.mrb[47].mxu1 }
 0x25a   : >> { %v1308_v59 = vpop.f32.mrb[48].mxu0 }
 0x25b   : >> { %2151 = vrot.lane.b32.xlu0 %v1288_v34, %s4484_s5  ;;  %v1310_v29 = vpop.f32.mrb[49].mxu0 }
 0x25c   : >> { %2153 = vrot.lane.b32.xlu1 %v1290_v54, %s4484_s5  ;;  %v1312_v38 = vpop.f32.mrb[50].mxu0 }
 0x25d   : >> { %v1314_v43 = vpop.f32.mrb[51].mxu0 }
 0x25e   : >> { %v1501_v44 = vpop.f32.mrb[48].mxu1 }
 0x25f   : >> { %2155 = vrot.lane.b32.xlu0 %v1481_v0, %s4484_s5  ;;  %v1503_v31 = vpop.f32.mrb[49].mxu1 }
 0x260   : >> { %2157 = vrot.lane.b32.xlu1 %v1483_v19, %s4484_s5  ;;  %v1505_v17 = vpop.f32.mrb[50].mxu1 }
 0x261   : >> { %v1507_v39 = vpop.f32.mrb[51].mxu1 }
 0x262   : >> { %v1318_v40 = vpop.f32.mrb[52].mxu0 }
 0x263   : >> { %2163 = vrot.lane.b32.xlu0 %v1292_v50, %s4484_s5  ;;  %v1320_v14 = vpop.f32.mrb[53].mxu0 }
 0x264   : >> { %2165 = vrot.lane.b32.xlu1 %v1294_v16, %s4484_s5  ;;  %v5877_v34 = vpop.f32.mrb[54].mxu0 }
 0x265   : >> { %v5879_v36 = vpop.f32.mrb[55].mxu0 }
 0x266   : >> { %v1511_v54 = vpop.f32.mrb[52].mxu1 }
 0x267   : >> { %2167 = vrot.lane.b32.xlu0 %v1485_v55, %s4484_s5  ;;  %v1513_v46 = vpop.f32.mrb[53].mxu1 }
 0x268   : >> { %2169 = vrot.lane.b32.xlu1 %v1487_v62, %s4484_s5  ;;  %v5883_v0 = vpop.f32.mrb[54].mxu1 }
 0x269   : >> { %v5885_v19 = vpop.f32.mrb[55].mxu1 }
 0x26a   : >> { %v5887_v26 = vpop.f32.mrb[56].mxu0 }
 0x26b   : >> { %2175 = vrot.lane.b32.xlu0 %v1298_v63, %s4484_s5  ;;  %v5890_v50 = vpop.f32.mrb[57].mxu0 }
 0x26c   : >> { %2177 = vrot.lane.b32.xlu1 %v1300_v47, %s4484_s5  ;;  %v5893_v16 = vpop.f32.mrb[58].mxu0 }
 0x26d   : >> { %v5895_v27 = vpop.f32.mrb[59].mxu0 }
 0x26e   : >> { %v5897_v55 = vpop.f32.mrb[56].mxu1 }
 0x26f   : >> { %2179 = vrot.lane.b32.xlu0 %v1491_v61, %s4484_s5  ;;  %v5900_v62 = vpop.f32.mrb[57].mxu1 }
 0x270   : >> { %2181 = vrot.lane.b32.xlu1 %v1493_v57, %s4484_s5  ;;  %v5903_v24 = vpop.f32.mrb[58].mxu1 }
 0x271   : >> { %v5905_v22 = vpop.f32.mrb[59].mxu1 }
 0x272   : >> { %v5907_v63 = vpop.f32.mrb[60].mxu0 }
 0x273   : >> { %2187 = vrot.lane.b32.xlu0 %v1302_v28, %s4484_s5  ;;  %v5910_v47 = vpop.f32.mrb[61].mxu0 }
 0x274   : >> { %2189 = vrot.lane.b32.xlu1 %v1304_v58, %s4484_s5  ;;  %v5913_v35 = vpop.f32.mrb[62].mxu0 }
 0x275   : >> { %v5915_v21 = vpop.f32.mrb[63].mxu0 }
 0x276   : >> { %v5917_v61 = vpop.f32.mrb[60].mxu1 }
 0x277   : >> { %2191 = vrot.lane.b32.xlu0 %v1495_v45, %s4484_s5  ;;  %v5920_v57 = vpop.f32.mrb[61].mxu1 }
 0x278   : >> { %2193 = vrot.lane.b32.xlu1 %v1497_v51, %s4484_s5  ;;  %v5923_v13 = vpop.f32.mrb[62].mxu1 }
 0x279   : >> { %v5925_v15 = vpop.f32.mrb[63].mxu1 }
 0x27a   : >> { %v5927_v28 = vpop.f32.mrb[64].mxu0 }
 0x27b   : >> { %9035 = vst [vmem:[#allocation86_spill] sm:$0xff] %v5927_v28  ;;  %2199 = vrot.lane.b32.xlu0 %v1308_v59, %s4484_s5  ;;  %v5930_v58 = vpop.f32.mrb[65].mxu0 }
 0x27c   : >> { %9036 = vst [vmem:[#allocation87_spill] sm:$0xff] %v5930_v58  ;;  %2201 = vrot.lane.b32.xlu1 %v1310_v29, %s4484_s5  ;;  %v5933_v8 = vpop.f32.mrb[66].mxu0 }
 0x27d   : >> { %9037 = vst [vmem:[#allocation88_spill] sm:$0xff] %v5933_v8  ;;  %v5935_v11 = vpop.f32.mrb[67].mxu0 }
 0x27e   : >> { %9038 = vst [vmem:[#allocation89_spill] sm:$0xff] %v5935_v11  ;;  %v5937_v45 = vpop.f32.mrb[64].mxu1 }
 0x27f   : >> { %9039 = vst [vmem:[#allocation90_spill] sm:$0xff] %v5937_v45  ;;  %2203 = vrot.lane.b32.xlu0 %v1501_v44, %s4484_s5  ;;  %v1769_v51 = vpop.f32.mrb[65].mxu1 }
 0x280   : >> { %2205 = vrot.lane.b32.xlu1 %v1503_v31, %s4484_s5  ;;  %v5941_v7 = vpop.f32.mrb[66].mxu1 }
 0x281   : >> { %9040 = vst [vmem:[#allocation91_spill] sm:$0xff] %v5941_v7  ;;  %v1772_v28 = vpop.f32.mrb[67].mxu1 }
 0x282   : >> { %v5943_v9 = vpop.f32.mrb[68].mxu0 }
 0x283   : >> { %9041 = vst [vmem:[#allocation92_spill] sm:$0xff] %v5943_v9  ;;  %2211 = vrot.lane.b32.xlu0 %v1312_v38, %s4484_s5  ;;  %v5946_v59 = vpop.f32.mrb[69].mxu0 }
 0x284   : >> { %9042 = vst [vmem:[#allocation93_spill] sm:$0xff] %v5946_v59  ;;  %2213 = vrot.lane.b32.xlu1 %v1314_v43, %s4484_s5  ;;  %v5949_v29 = vpop.f32.mrb[70].mxu0 }
 0x285   : >> { %9043 = vst [vmem:[#allocation94_spill] sm:$0xff] %v5949_v29  ;;  %v5951_v11 = vpop.f32.mrb[71].mxu0 }
 0x286   : >> { %9044 = vst [vmem:[#allocation95_spill] sm:$0xff] %v5951_v11  ;;  %v5953_v8 = vpop.f32.mrb[68].mxu1 }
 0x287   : >> { %9045 = vst [vmem:[#allocation96_spill] sm:$0xff] %v5953_v8  ;;  %2215 = vrot.lane.b32.xlu0 %v1505_v17, %s4484_s5  ;;  %v1777_v44 = vpop.f32.mrb[69].mxu1 }
 0x288   : >> { %2217 = vrot.lane.b32.xlu1 %v1507_v39, %s4484_s5  ;;  %v5957_v31 = vpop.f32.mrb[70].mxu1 }
 0x289   : >> { %9046 = vst [vmem:[#allocation97_spill] sm:$0xff] %v5957_v31  ;;  %v1780_v28 = vpop.f32.mrb[71].mxu1 }
 0x28a   : >> { %v5959_v51 = vpop.f32.mrb[72].mxu0 }
 0x28b   : >> { %9047 = vst [vmem:[#allocation98_spill] sm:$0xff] %v5959_v51  ;;  %2223 = vrot.lane.b32.xlu0 %v1318_v40, %s4484_s5  ;;  %v5962_v38 = vpop.f32.mrb[73].mxu0 }
 0x28c   : >> { %9048 = vst [vmem:[#allocation99_spill] sm:$0xff] %v5962_v38  ;;  %2225 = vrot.lane.b32.xlu1 %v1320_v14, %s4484_s5  ;;  %v5965_v43 = vpop.f32.mrb[74].mxu0 }
 0x28d   : >> { %9049 = vst [vmem:[#allocation100_spill] sm:$0xff] %v5965_v43  ;;  %v5967_v11 = vpop.f32.mrb[75].mxu0 }
 0x28e   : >> { %9050 = vst [vmem:[#allocation101_spill] sm:$0xff] %v5967_v11  ;;  %v5969_v29 = vpop.f32.mrb[72].mxu1 }
 0x28f   : >> { %9051 = vst [vmem:[#allocation102_spill] sm:$0xff] %v5969_v29  ;;  %2227 = vrot.lane.b32.xlu0 %v1511_v54, %s4484_s5  ;;  %v1785_v39 = vpop.f32.mrb[73].mxu1 }
 0x290   : >> { %2229 = vrot.lane.b32.xlu1 %v1513_v46, %s4484_s5  ;;  %v5973_v17 = vpop.f32.mrb[74].mxu1 }
 0x291   : >> { %9052 = vst [vmem:[#allocation103_spill] sm:$0xff] %v5973_v17  ;;  %v1788_v44 = vpop.f32.mrb[75].mxu1 }
 0x292   : >> { %v5975_v28 = vpop.f32.mrb[76].mxu0 }
 0x293   : >> { %9053 = vst [vmem:[#allocation104_spill] sm:$0xff] %v5975_v28  ;;  %2235 = vrot.lane.b32.xlu0 %v5877_v34, %s4484_s5  ;;  %v5979_v40 = vpop.f32.mrb[77].mxu0 }
 0x294   : >> { %9054 = vst [vmem:[#allocation105_spill] sm:$0xff] %v5979_v40  ;;  %2237 = vrot.lane.b32.xlu1 %v5879_v36, %s4484_s5  ;;  %v5983_v14 = vpop.f32.mrb[78].mxu0 }
 0x295   : >> { %9055 = vst [vmem:[#allocation106_spill] sm:$0xff] %v5983_v14  ;;  %v5985_v11 = vpop.f32.mrb[79].mxu0 }
 0x296   : >> { %9056 = vst [vmem:[#allocation107_spill] sm:$0xff] %v5985_v11  ;;  %v5987_v54 = vpop.f32.mrb[76].mxu1 }
 0x297   : >> { %9057 = vst [vmem:[#allocation108_spill] sm:$0xff] %v5987_v54  ;;  %2239 = vrot.lane.b32.xlu0 %v5883_v0, %s4484_s5  ;;  %v1793_v46 = vpop.f32.mrb[77].mxu1 }
 0x298   : >> { %2241 = vrot.lane.b32.xlu1 %v5885_v19, %s4484_s5  ;;  %v5993_v39 = vpop.f32.mrb[78].mxu1 }
 0x299   : >> { %9058 = vst [vmem:[#allocation109_spill] sm:$0xff] %v5993_v39  ;;  %v1796_v34 = vpop.f32.mrb[79].mxu1 }
 0x29a   : >> { %v5995_v44 = vpop.f32.mrb[80].mxu0 }
 0x29b   : >> { %9059 = vst [vmem:[#allocation110_spill] sm:$0xff] %v5995_v44  ;;  %2247 = vrot.lane.b32.xlu0 %v5887_v26, %s4484_s5  ;;  %v5999_v36 = vpop.f32.mrb[81].mxu0 }
 0x29c   : >> { %9060 = vst [vmem:[#allocation111_spill] sm:$0xff] %v5999_v36  ;;  %2249 = vrot.lane.b32.xlu1 %v5890_v50, %s4484_s5  ;;  %v6003_v11 = vpop.f32.mrb[82].mxu0 }
 0x29d   : >> { %9061 = vst [vmem:[#allocation112_spill] sm:$0xff] %v6003_v11  ;;  %v6005_v0 = vpop.f32.mrb[83].mxu0 }
 0x29e   : >> { %9062 = vst [vmem:[#allocation113_spill] sm:$0xff] %v6005_v0  ;;  %v6007_v46 = vpop.f32.mrb[80].mxu1 }
 0x29f   : >> { %9063 = vst [vmem:[#allocation114_spill] sm:$0xff] %v6007_v46  ;;  %2251 = vrot.lane.b32.xlu0 %v5897_v55, %s4484_s5  ;;  %v1801_v19 = vpop.f32.mrb[81].mxu1 }
 0x2a0   : >> { %2253 = vrot.lane.b32.xlu1 %v5900_v62, %s4484_s5  ;;  %v6013_v34 = vpop.f32.mrb[82].mxu1 }
 0x2a1   : >> { %9064 = vst [vmem:[#allocation115_spill] sm:$0xff] %v6013_v34  ;;  %v1804_v26 = vpop.f32.mrb[83].mxu1 }
 0x2a2   : >> { %v6015_v36 = vpop.f32.mrb[84].mxu0 }
 0x2a3   : >> { %9065 = vst [vmem:[#allocation116_spill] sm:$0xff] %v6015_v36  ;;  %2259 = vrot.lane.b32.xlu0 %v5893_v16, %s4484_s5  ;;  %v6019_v50 = vpop.f32.mrb[85].mxu0 }
 0x2a4   : >> { %9066 = vst [vmem:[#allocation117_spill] sm:$0xff] %v6019_v50  ;;  %2261 = vrot.lane.b32.xlu1 %v5895_v27, %s4484_s5  ;;  %v6023_v0 = vpop.f32.mrb[86].mxu0 }
 0x2a5   : >> { %9067 = vst [vmem:[#allocation118_spill] sm:$0xff] %v6023_v0  ;;  %v6025_v55 = vpop.f32.mrb[87].mxu0 }
 0x2a6   : >> { %9068 = vst [vmem:[#allocation119_spill] sm:$0xff] %v6025_v55  ;;  %v6027_v19 = vpop.f32.mrb[84].mxu1 }
 0x2a7   : >> { %9069 = vst [vmem:[#allocation120_spill] sm:$0xff] %v6027_v19  ;;  %2263 = vrot.lane.b32.xlu0 %v5903_v24, %s4484_s5  ;;  %v1809_v62 = vpop.f32.mrb[85].mxu1 }
 0x2a8   : >> { %2265 = vrot.lane.b32.xlu1 %v5905_v22, %s4484_s5  ;;  %v6033_v26 = vpop.f32.mrb[86].mxu1 }
 0x2a9   : >> { %9070 = vst [vmem:[#allocation121_spill] sm:$0xff] %v6033_v26  ;;  %v1812_v16 = vpop.f32.mrb[87].mxu1 }
 0x2aa   : >> { %v6035_v50 = vpop.f32.mrb[88].mxu0 }
 0x2ab   : >> { %9071 = vst [vmem:[#allocation122_spill] sm:$0xff] %v6035_v50  ;;  %2271 = vrot.lane.b32.xlu0 %v5907_v63, %s4484_s5  ;;  %v6039_v27 = vpop.f32.mrb[89].mxu0 }
 0x2ac   : >> { %9072 = vst [vmem:[#allocation123_spill] sm:$0xff] %v6039_v27  ;;  %2273 = vrot.lane.b32.xlu1 %v5910_v47, %s4484_s5  ;;  %v6043_v55 = vpop.f32.mrb[90].mxu0 }
 0x2ad   : >> { %9073 = vst [vmem:[#allocation124_spill] sm:$0xff] %v6043_v55  ;;  %v6045_v24 = vpop.permute.xlu0 %2103  ;;  %v6047_v62 = vpop.f32.mrb[91].mxu0 }
 0x2ae   : >> { %9074 = vst [vmem:[#allocation125_spill] sm:$0xff] %v6045_v24  ;;  %9075 = vst [vmem:[#allocation126_spill] sm:$0xff] %v6047_v62  ;;  %v2106_v22 = vpop.permute.xlu1 %2105  ;;  %v6049_v0 = vpop.f32.mrb[88].mxu1 }
 0x2af   : >> { %9076 = vst [vmem:[#allocation127_spill] sm:$0xff] %v6049_v0  ;;  %2275 = vrot.lane.b32.xlu0 %v5917_v61, %s4484_s5  ;;  %v1817_v16 = vpop.f32.mrb[89].mxu1 }
 0x2b0   : >> { %2277 = vrot.lane.b32.xlu1 %v5920_v57, %s4484_s5  ;;  %v6055_v63 = vpop.f32.mrb[90].mxu1 }
 0x2b1   : >> { %9077 = vst [vmem:[#allocation128_spill] sm:$0xff] %v6055_v63  ;;  %v2108_v27 = vpop.permute.xlu0 %2107  ;;  %v1820_v47 = vpop.f32.mrb[91].mxu1 }
 0x2b2   : >> { %v6057_v50 = vpop.permute.xlu1 %2109  ;;  %v6059_v55 = vpop.f32.mrb[92].mxu0  ;;  %v2296_v47 = vsel %vm571_vm3, %v2106_v22, %v2108_v27 }
 0x2b3   : >> { %9078 = vst [vmem:[#allocation129_spill] sm:$0xff] %v6057_v50  ;;  %9079 = vst [vmem:[#allocation130_spill] sm:$0xff] %v6059_v55  ;;  %2283 = vrot.lane.b32.xlu0 %v5913_v35, %s4484_s5  ;;  %v6063_v62 = vpop.f32.mrb[93].mxu0  ;;  %v2295_v55 = vsel %vm571_vm3, %v6045_v24, %v2106_v22  ;;  %v2297_v22 = vsel %vm571_vm3, %v2108_v27, %v6057_v50 }
 0x2b4   : >> { %9080 = vst [vmem:[#allocation131_spill] sm:$0xff] %v6063_v62  ;;  %2285 = vrot.lane.b32.xlu1 %v5915_v21, %s4484_s5  ;;  %v6067_v61 = vpop.f32.mrb[94].mxu0  ;;  %v2504_v26 = vadd.f32 %v2295_v55, %v5700_v25  ;;  %v2506_v25 = vadd.f32 %v2297_v22, %v5711_v41 }
 0x2b5   : >> { %9081 = vst [vmem:[#allocation132_spill] sm:$0xff] %v6067_v61  ;;  %v6069_v16 = vpop.permute.xlu0 %2115  ;;  %v6071_v57 = vpop.f32.mrb[95].mxu0  ;;  %v2505_v61 = vadd.f32 %v2296_v47, %v5709_v23 }
 0x2b6   : >> { %9082 = vst [vmem:[#allocation133_spill] sm:$0xff] %v6069_v16  ;;  %9083 = vst [vmem:[#allocation134_spill] sm:$0xff] %v6071_v57  ;;  %v2118_v63 = vpop.permute.xlu1 %2117  ;;  %v6074_v0 = vpop.f32.mrb[92].mxu1 }
 0x2b7   : >> { %9084 = vst [vmem:[#allocation135_spill] sm:$0xff] %v6074_v0  ;;  %2287 = vrot.lane.b32.xlu0 %v5923_v13, %s4484_s5  ;;  %v1825_v35 = vpop.f32.mrb[93].mxu1  ;;  %v2300_v55 = vsel %vm571_vm3, %v6069_v16, %v2118_v63 }
 0x2b8   : >> { %2289 = vrot.lane.b32.xlu1 %v5925_v15, %s4484_s5  ;;  %v6082_v21 = vpop.f32.mrb[94].mxu1  ;;  %v2511_v36 = vadd.f32 %v2300_v55, %v5707_v32 }
 0x2b9   : >> { %9085 = vst [vmem:[#allocation136_spill] sm:$0xff] %v6082_v21  ;;  %v2120_v57 = vpop.permute.xlu0 %2119  ;;  %v1828_v62 = vpop.f32.mrb[95].mxu1 }
 0x2ba   : >> { %v6086_v19 = vpop.permute.xlu1 %2121  ;;  %v6088_v0 = vpop.f32.mrb[96].mxu0  ;;  %v2301_v14 = vsel %vm571_vm3, %v2118_v63, %v2120_v57 }
 0x2bb   : >> { %9086 = vst [vmem:[#allocation137_spill] sm:$0xff] %v6086_v19  ;;  %2731 = vrot.lane.b32.xlu0 %v2505_v61, %s4490_s22  ;;  %v6093_v13 = vpop.f32.mrb[97].mxu0  ;;  %v2302_v41 = vsel %vm571_vm3, %v2120_v57, %v6086_v19 }
 0x2bc   : >> { %2729 = vrot.lane.b32.xlu1 %v2504_v26, %s4490_s22  ;;  %v6096_v15 = vpop.f32.mrb[98].mxu0 }
 0x2bd   : >> { %v6098_v23 = vpop.permute.xlu0 %2127  ;;  %v6100_v62 = vpop.f32.mrb[99].mxu0 }
 0x2be   : >> { %9087 = vst [vmem:[#allocation138_spill] sm:$0xff] %v6098_v23  ;;  %v2130_v47 = vpop.permute.xlu1 %2129  ;;  %v6105_v27 = vpop.f32.mrb[96].mxu1 }
 0x2bf   : >> { %3261 = vrot.lane.b32.xlu0 %v2505_v61, %s4491_s7  ;;  %v1833_v35 = vpop.f32.mrb[97].mxu1 }
 0x2c0   : >> { %2733 = vrot.lane.b32.xlu1 %v2506_v25, %s4490_s22  ;;  %v6109_v21 = vpop.f32.mrb[98].mxu1  ;;  %v2513_v35 = vadd.f32 %v2302_v41, %v5718_v48  ;;  %v2512_v41 = vadd.f32 %v2301_v14, %v5714_v10  ;;  %v2305_v14 = vsel %vm571_vm3, %v6098_v23, %v2130_v47 }
 0x2c1   : >> { %v2132_v34 = vpop.permute.xlu0 %2131  ;;  %v1836_v11 = vpop.f32.mrb[99].mxu1  ;;  %v2518_v8 = vadd.f32 %v2305_v14, %v5722_v30 }
 0x2c2   : >> { %v6114_v22 = vpop.permute.xlu1 %2133  ;;  %v6116_v46 = vpop.f32.mrb[100].mxu0 }
 0x2c3   : >> { %9088 = vst [vmem:[#allocation139_spill] sm:$0xff] %v6114_v22  ;;  %2743 = vrot.lane.b32.xlu0 %v2511_v36, %s4490_s22  ;;  %v6119_v44 = vpop.f32.mrb[101].mxu0 }
 0x2c4   : >> { %3259 = vrot.lane.b32.xlu1 %v2504_v26, %s4491_s7  ;;  %v6122_v61 = vpop.f32.mrb[102].mxu0 }
 0x2c5   : >> { %v6125_v32 = vpop.permute.xlu0 %2139  ;;  %v6127_v11 = vpop.f32.mrb[103].mxu0 }
 0x2c6   : >> { %9089 = vst [vmem:[#allocation140_spill] sm:$0xff] %v6125_v32  ;;  %v6129_v55 = vpop.permute.xlu1 %2141  ;;  %v6131_v39 = vpop.f32.mrb[100].mxu1 }
 0x2c7   : >> { %2747 = vrot.lane.b32.xlu0 %v2513_v35, %s4490_s22  ;;  %v1841_v54 = vpop.f32.mrb[101].mxu1 }
 0x2c8   : >> { %3263 = vrot.lane.b32.xlu1 %v2506_v25, %s4491_s7  ;;  %v6136_v26 = vpop.f32.mrb[102].mxu1  ;;  %v2306_v25 = vsel %vm571_vm3, %v2130_v47, %v2132_v34  ;;  %v2307_v47 = vsel %vm571_vm3, %v2132_v34, %v6114_v22 }
 0x2c9   : >> { %v6138_v40 = vpop.permute.xlu0 %2143  ;;  %v1844_v48 = vpop.f32.mrb[103].mxu1  ;;  %v2519_v38 = vadd.f32 %v2306_v25, %v5731_v52  ;;  %v2520_v30 = vadd.f32 %v2307_v47, %v5733_v42 }
 0x2ca   : >> { %v6141_v28 = vpop.permute.xlu1 %2145  ;;  %v6143_v17 = vpop.f32.mrb[104].mxu0 }
 0x2cb   : >> { %9090 = vst [vmem:[#allocation141_spill] sm:$0xff] %v6141_v28  ;;  %3273 = vrot.lane.b32.xlu0 %v2511_v36, %s4491_s7  ;;  %v6146_v43 = vpop.f32.mrb[105].mxu0 }
 0x2cc   : >> { %2745 = vrot.lane.b32.xlu1 %v2512_v41, %s4490_s22  ;;  %v6149_v54 = vpop.f32.mrb[106].mxu0 }
 0x2cd   : >> { %v6151_v63 = vpop.permute.xlu0 %2151  ;;  %v6153_v57 = vpop.f32.mrb[107].mxu0 }
 0x2ce   : >> { %9091 = vst [vmem:[#allocation142_spill] sm:$0xff] %v6151_v63  ;;  %v6156_v48 = vpop.permute.xlu1 %2153  ;;  %v6158_v10 = vpop.f32.mrb[104].mxu1 }
 0x2cf   : >> { %3277 = vrot.lane.b32.xlu0 %v2513_v35, %s4491_s7  ;;  %v1849_v36 = vpop.f32.mrb[105].mxu1 }
 0x2d0   : >> { %3275 = vrot.lane.b32.xlu1 %v2512_v41, %s4491_s7  ;;  %v6164_v29 = vpop.f32.mrb[106].mxu1 }
 0x2d1   : >> { %v6167_v51 = vpop.permute.xlu0 %2155  ;;  %v1852_v31 = vpop.f32.mrb[107].mxu1 }
 0x2d2   : >> { %v6170_v59 = vpop.permute.xlu1 %2157  ;;  %v6172_v9 = vpop.f32.mrb[108].mxu0 }
 0x2d3   : >> { %9092 = vst [vmem:[#allocation143_spill] sm:$0xff] %v6170_v59  ;;  %2759 = vrot.lane.b32.xlu0 %v2519_v38, %s4490_s22  ;;  %v6177_v35 = vpop.f32.mrb[109].mxu0 }
 0x2d4   : >> { %2757 = vrot.lane.b32.xlu1 %v2518_v8, %s4490_s22  ;;  %v6180_v41 = vpop.f32.mrb[110].mxu0 }
 0x2d5   : >> { %v6182_v52 = vpop.permute.xlu0 %2163  ;;  %v6184_v31 = vpop.f32.mrb[111].mxu0 }
 0x2d6   : >> { %9093 = vst [vmem:[#allocation144_spill] sm:$0xff] %v6182_v52  ;;  %v6187_v25 = vpop.permute.xlu1 %2165  ;;  %v6189_v14 = vpop.f32.mrb[108].mxu1 }
 0x2d7   : >> { %3289 = vrot.lane.b32.xlu0 %v2519_v38, %s4491_s7  ;;  %v1857_v34 = vpop.f32.mrb[109].mxu1 }
 0x2d8   : >> { %2761 = vrot.lane.b32.xlu1 %v2520_v30, %s4490_s22  ;;  %v6193_v36 = vpop.f32.mrb[110].mxu1  ;;  %v2310_v34 = vsel %vm571_vm3, %v6125_v32, %v6129_v55  ;;  %v2312_v32 = vsel %vm571_vm3, %v6138_v40, %v6141_v28 }
 0x2d9   : >> { %v6195_v23 = vpop.permute.xlu0 %2167  ;;  %v1860_v22 = vpop.f32.mrb[111].mxu1  ;;  %v2525_v19 = vadd.f32 %v2310_v34, %v5729_v20  ;;  %v2311_v34 = vsel %vm571_vm3, %v6129_v55, %v6138_v40 }
 0x2da   : >> { %v6197_v16 = vpop.permute.xlu1 %2169  ;;  %v6202_v42 = vpop.f32.mrb[112].mxu0  ;;  %v2526_v28 = vadd.f32 %v2311_v34, %v5736_v49 }
 0x2db   : >> { %9094 = vst [vmem:[#allocation145_spill] sm:$0xff] %v6197_v16  ;;  %2111 = vrot.lane.b32.xlu0 %v6088_v0, %s4484_s5  ;;  %v6206_v38 = vpop.f32.mrb[113].mxu0 }
 0x2dc   : >> { %3287 = vrot.lane.b32.xlu1 %v2518_v8, %s4491_s7  ;;  %v6213_v22 = vpop.f32.mrb[114].mxu0 }
 0x2dd   : >> { %v6204_v47 = vpop.permute.xlu0 %2175  ;;  %9096 = vst [vmem:[#allocation147_spill] sm:$0xff] %v6213_v22  ;;  %v6217_v0 = vpop.f32.mrb[115].mxu0 }
 0x2de   : >> { %9095 = vst [vmem:[#allocation146_spill] sm:$0xff] %v6204_v47  ;;  %v6211_v24 = vpop.permute.xlu1 %2177  ;;  %9097 = vst [vmem:[#allocation148_spill] sm:$0xff] %v6217_v0  ;;  %v6219_v8 = vpop.f32.mrb[112].mxu1 }
 0x2df   : >> { %1926 = vrot.lane.b32.xlu0 %v6093_v13, %s4483_s4  ;;  %9098 = vst [vmem:[#allocation149_spill] sm:$0xff] %v6219_v8  ;;  %v1865_v7 = vpop.f32.mrb[113].mxu1 }
 0x2e0   : >> { %3291 = vrot.lane.b32.xlu1 %v2520_v30, %s4491_s7  ;;  %v6225_v58 = vpop.f32.mrb[114].mxu1  ;;  %v2527_v7 = vadd.f32 %v2312_v32, %v5740_v60 }
 0x2e1   : >> { %v6223_v45 = vpop.permute.xlu0 %2179  ;;  %9099 = vst [vmem:[#allocation150_spill] sm:$0xff] %v6225_v58  ;;  %v1868_v22 = vpop.f32.mrb[115].mxu1 }
 0x2e2   : >> { %v6230_v50 = vpop.permute.xlu1 %2181 }
 0x2e3   : >> { %9100 = vst [vmem:[#allocation151_spill] sm:$0xff] %v6230_v50  ;;  %2771 = vrot.lane.b32.xlu0 %v2525_v19, %s4490_s22 }
 0x2e4   : >> { %1928 = vrot.lane.b32.xlu1 %v6105_v27, %s4483_s4 }
 0x2e5   : >> { %v6236_v30 = vpop.permute.xlu0 %2187 }
 0x2e6   : >> { %9101 = vst [vmem:[#allocation152_spill] sm:$0xff] %v6236_v30  ;;  %v6238_v20 = vpop.permute.xlu1 %2189 }
 0x2e7   : >> { %2775 = vrot.lane.b32.xlu0 %v2527_v7, %s4490_s22 }
 0x2e8   : >> { %2113 = vrot.lane.b32.xlu1 %v6093_v13, %s4484_s5 }
 0x2e9   : >> { %v6246_v22 = vpop.permute.xlu0 %2191 }
 0x2ea   : >> { %v6249_v27 = vpop.permute.xlu1 %2193 }
 0x2eb   : >> { %9102 = vst [vmem:[#allocation153_spill] sm:$0xff] %v6249_v27  ;;  %3301 = vrot.lane.b32.xlu0 %v2525_v19, %s4491_s7  ;;  %v2316_v19 = vsel %vm571_vm3, %v6156_v48, %v6167_v51 }
 0x2ec   : >> { %2773 = vrot.lane.b32.xlu1 %v2526_v28, %s4490_s22 }
 0x2ed   : >> { %v6253_v60 = vpop.permute.xlu0 %2199 }
 0x2ee   : >> { %9103 = vst [vmem:[#allocation154_spill] sm:$0xff] %v6253_v60  ;;  %v6255_v32 = vpop.permute.xlu1 %2201 }
 0x2ef   : >> { %3305 = vrot.lane.b32.xlu0 %v2527_v7, %s4491_s7 }
 0x2f0   : >> { %3303 = vrot.lane.b32.xlu1 %v2526_v28, %s4491_s7  ;;  %v2315_v28 = vsel %vm571_vm3, %v6151_v63, %v6156_v48  ;;  %v2317_v48 = vsel %vm571_vm3, %v6167_v51, %v6170_v59  ;;  %v6299_v63 = vpop.f32.mrb[116].mxu1 }
 0x2f1   : >> { %v6259_v40 = vpop.permute.xlu0 %2203  ;;  %v2532_v0 = vadd.f32 %v2315_v28, %v5744_v18  ;;  %9108 = vst [vmem:[#allocation159_spill] sm:$0xff] %v6299_v63  ;;  %v2534_v28 = vadd.f32 %v2317_v48, %v5755_v3  ;;  %v2320_v3 = vsel %vm571_vm3, %v6182_v52, %v6187_v25 }
 0x2f2   : >> { %v6261_v13 = vpop.permute.xlu1 %2205 }
 0x2f3   : >> { %2123 = vrot.lane.b32.xlu0 %v6096_v15, %s4484_s5  ;;  %v6281_v15 = vpop.f32.mrb[116].mxu0 }
 0x2f4   : >> { %1932 = vrot.lane.b32.xlu1 %v6109_v21, %s4483_s4  ;;  %v2533_v21 = vadd.f32 %v2316_v19, %v5753_v37  ;;  %v6286_v34 = vpop.f32.mrb[117].mxu0  ;;  %v1873_v37 = vpop.f32.mrb[117].mxu1 }
 0x2f5   : >> { %v6267_v49 = vpop.permute.xlu0 %2211  ;;  %9105 = vst [vmem:[#allocation156_spill] sm:$0xff] %v6286_v34  ;;  %v6291_v8 = vpop.f32.mrb[118].mxu0 }
 0x2f6   : >> { %9104 = vst [vmem:[#allocation155_spill] sm:$0xff] %v6267_v49  ;;  %v6272_v55 = vpop.permute.xlu1 %2213  ;;  %9106 = vst [vmem:[#allocation157_spill] sm:$0xff] %v6291_v8  ;;  %v6304_v18 = vpop.f32.mrb[118].mxu1 }
 0x2f7   : >> { %1930 = vrot.lane.b32.xlu0 %v6100_v62, %s4483_s4  ;;  %9110 = vst [vmem:[#allocation161_spill] sm:$0xff] %v6304_v18  ;;  %v1876_v34 = vpop.f32.mrb[119].mxu1 }
 0x2f8   : >> { %2125 = vrot.lane.b32.xlu1 %v6100_v62, %s4484_s5  ;;  %v6297_v62 = vpop.f32.mrb[119].mxu0 }
 0x2f9   : >> { %v6284_v7 = vpop.permute.xlu0 %2215  ;;  %9107 = vst [vmem:[#allocation158_spill] sm:$0xff] %v6297_v62 }
 0x2fa   : >> { %v6289_v58 = vpop.permute.xlu1 %2217 }
 0x2fb   : >> { %2787 = vrot.lane.b32.xlu0 %v2533_v21, %s4490_s22 }
 0x2fc   : >> { %2785 = vrot.lane.b32.xlu1 %v2532_v0, %s4490_s22 }
 0x2fd   : >> { %v6302_v19 = vpop.permute.xlu0 %2223 }
 0x2fe   : >> { %9109 = vst [vmem:[#allocation160_spill] sm:$0xff] %v6302_v19  ;;  %v6307_v8 = vpop.permute.xlu1 %2225 }
 0x2ff   : >> { %3317 = vrot.lane.b32.xlu0 %v2533_v21, %s4491_s7  ;;  %v2539_v21 = vadd.f32 %v2320_v3, %v5751_v33  ;;  %v2321_v33 = vsel %vm571_vm3, %v6187_v25, %v6195_v23 }
 0x300   : >> { %2789 = vrot.lane.b32.xlu1 %v2534_v28, %s4490_s22 }
 0x301   : >> { %v6311_v51 = vpop.permute.xlu0 %2227 }
 0x302   : >> { %v6313_v59 = vpop.permute.xlu1 %2229 }
 0x303   : >> { %2135 = vrot.lane.b32.xlu0 %v6116_v46, %s4484_s5  ;;  %v2322_v46 = vsel %vm571_vm3, %v6195_v23, %v6197_v16  ;;  %v2540_v16 = vadd.f32 %v2321_v33, %v5758_v12  ;;  %v6370_v12 = vpop.f32.mrb[120].mxu1 }
 0x304   : >> { %3315 = vrot.lane.b32.xlu1 %v2532_v0, %s4491_s7  ;;  %v2541_v52 = vadd.f32 %v2322_v46, %v5762_v53  ;;  %v6357_v53 = vpop.f32.mrb[120].mxu0 }
 0x305   : >> { %v6318_v37 = vpop.permute.xlu0 %2235  ;;  %9114 = vst [vmem:[#allocation165_spill] sm:$0xff] %v6357_v53  ;;  %v6361_v23 = vpop.f32.mrb[121].mxu0 }
 0x306   : >> { %9111 = vst [vmem:[#allocation162_spill] sm:$0xff] %v6318_v37  ;;  %v6323_v34 = vpop.permute.xlu1 %2237  ;;  %9116 = vst [vmem:[#allocation167_spill] sm:$0xff] %v6361_v23  ;;  %v6365_v18 = vpop.f32.mrb[122].mxu0 }
 0x307   : >> { %1934 = vrot.lane.b32.xlu0 %v6119_v44, %s4483_s4 }
 0x308   : >> { %3319 = vrot.lane.b32.xlu1 %v2534_v28, %s4491_s7 }
 0x309   : >> { %v6329_v48 = vpop.permute.xlu0 %2239 }
 0x30a   : >> { %v6334_v0 = vpop.permute.xlu1 %2241 }
 0x30b   : >> { %2799 = vrot.lane.b32.xlu0 %v2539_v21, %s4490_s22 }
 0x30c   : >> { %1936 = vrot.lane.b32.xlu1 %v6131_v39, %s4483_s4 }
 0x30d   : >> { %v6340_v62 = vpop.permute.xlu0 %2247 }
 0x30e   : >> { %9112 = vst [vmem:[#allocation163_spill] sm:$0xff] %v6340_v62  ;;  %v6342_v28 = vpop.permute.xlu1 %2249 }
 0x30f   : >> { %2803 = vrot.lane.b32.xlu0 %v2541_v52, %s4490_s22 }
 0x310   : >> { %2137 = vrot.lane.b32.xlu1 %v6119_v44, %s4484_s5  ;;  %v6368_v44 = vpop.f32.mrb[123].mxu0 }
 0x311   : >> { %v6350_v3 = vpop.permute.xlu0 %2251  ;;  %9117 = vst [vmem:[#allocation168_spill] sm:$0xff] %v6368_v44  ;;  %v2325_v44 = vsel %vm571_vm3, %v6204_v47, %v6211_v24 }
 0x312   : >> { %v6353_v39 = vpop.permute.xlu1 %2253 }
 0x313   : >> { %9113 = vst [vmem:[#allocation164_spill] sm:$0xff] %v6353_v39  ;;  %3329 = vrot.lane.b32.xlu0 %v2539_v21, %s4491_s7  ;;  %v1881_v21 = vpop.f32.mrb[121].mxu1 }
 0x314   : >> { %2801 = vrot.lane.b32.xlu1 %v2540_v16, %s4490_s22  ;;  %v6377_v63 = vpop.f32.mrb[122].mxu1 }
 0x315   : >> { %v6359_v46 = vpop.permute.xlu0 %2259  ;;  %9119 = vst [vmem:[#allocation170_spill] sm:$0xff] %v6377_v63  ;;  %v1884_v23 = vpop.f32.mrb[123].mxu1 }
 0x316   : >> { %9115 = vst [vmem:[#allocation166_spill] sm:$0xff] %v6359_v46  ;;  %v6363_v25 = vpop.permute.xlu1 %2261  ;;  %v6403_v23 = vadd.f32 %v2325_v44, %v5766_v56 }
 0x317   : >> { %3333 = vrot.lane.b32.xlu0 %v2541_v52, %s4491_s7 }
 0x318   : >> { %3331 = vrot.lane.b32.xlu1 %v2540_v16, %s4491_s7  ;;  %v2326_v16 = vsel %vm571_vm3, %v6211_v24, %v6223_v45  ;;  %9122 = vst [vmem:[#allocation173_spill] sm:$0xff] %v6403_v23  ;;  %v2327_v24 = vsel %vm571_vm3, %v6223_v45, %v6230_v50  ;;  %v2330_v45 = vsel %vm571_vm3, %v6236_v30, %v6238_v20 }
 0x319   : >> { %v6373_v33 = vpop.permute.xlu0 %2263  ;;  %v2332_v30 = vsel %vm571_vm3, %v6246_v22, %v6249_v27 }
 0x31a   : >> { %v6375_v53 = vpop.permute.xlu1 %2265 }
 0x31b   : >> { %9118 = vst [vmem:[#allocation169_spill] sm:$0xff] %v6375_v53  ;;  %2147 = vrot.lane.b32.xlu0 %v6122_v61, %s4484_s5  ;;  %v6398_v61 = vadd.f32 %v2326_v16, %v5775_v2  ;;  %v6417_v2 = vadd.f32 %v2327_v24, %v5777_v4  ;;  %v6434_v4 = vpop.f32.mrb[124].mxu0  ;;  %v6436_v24 = vpop.f32.mrb[124].mxu1 }
 0x31c   : >> { %1940 = vrot.lane.b32.xlu1 %v6136_v26, %s4483_s4 }
 0x31d   : >> { %v6383_v52 = vpop.permute.xlu0 %2271  ;;  %9121 = vst [vmem:[#allocation172_spill] sm:$0xff] %v6398_v61  ;;  %9125 = vst [vmem:[#allocation176_spill] sm:$0xff] %v6417_v2 }
 0x31e   : >> { %9120 = vst [vmem:[#allocation171_spill] sm:$0xff] %v6383_v52  ;;  %v6388_v21 = vpop.permute.xlu1 %2273 }
 0x31f   : >> { %1938 = vrot.lane.b32.xlu0 %v6127_v11, %s4483_s4 }
 0x320   : >> { %2149 = vrot.lane.b32.xlu1 %v6127_v11, %s4484_s5 }
 0x321   : >> { %v6400_v26 = vpop.permute.xlu0 %2275 }
 0x322   : >> { %v6405_v63 = vpop.permute.xlu1 %2277 }
 0x323   : >> { %9123 = vst [vmem:[#allocation174_spill] sm:$0xff] %v6405_v63  ;;  %2815 = vrot.lane.b32.xlu0 %v6398_v61, %s4490_s22  ;;  %v6443_v61 = vadd.f32 %v2330_v45, %v5773_v1 }
 0x324   : >> { %2813 = vrot.lane.b32.xlu1 %v6403_v23, %s4490_s22 }
 0x325   : >> { %v6414_v11 = vpop.permute.xlu0 %2283  ;;  %9127 = vst [vmem:[#allocation178_spill] sm:$0xff] %v6443_v61 }
 0x326   : >> { %9124 = vst [vmem:[#allocation175_spill] sm:$0xff] %v6414_v11  ;;  %v6419_v16 = vpop.permute.xlu1 %2285 }
 0x327   : >> { %2159 = vrot.lane.b32.xlu0 %v6143_v17, %s4484_s5  ;;  %v6440_v17 = vpop.f32.mrb[125].mxu0 }
 0x328   : >> { %2817 = vrot.lane.b32.xlu1 %v6417_v2, %s4490_s22  ;;  %v1889_v2 = vpop.f32.mrb[125].mxu1  ;;  %v6452_v50 = vpop.f32.mrb[126].mxu0 }
 0x329   : >> { %v6425_v56 = vpop.permute.xlu0 %2287  ;;  %9129 = vst [vmem:[#allocation180_spill] sm:$0xff] %v6452_v50  ;;  %v6459_v1 = vpop.f32.mrb[126].mxu1 }
 0x32a   : >> { %v6430_v44 = vpop.permute.xlu1 %2289  ;;  %v6461_v2 = vpop.f32.mrb[127].mxu0 }
 0x32b   : >> { %9126 = vst [vmem:[#allocation177_spill] sm:$0xff] %v6430_v44  ;;  %1942 = vrot.lane.b32.xlu0 %v6146_v43, %s4483_s4  ;;  %v1892_v45 = vpop.f32.mrb[127].mxu1 }
 0x32c   : >> { %1944 = vrot.lane.b32.xlu1 %v6158_v10, %s4483_s4  ;;  %v2331_v10 = vsel %vm571_vm3, %v6238_v20, %v6246_v22 }
 0x32d   : >> { %v6445_v23 = vpop.permute.xlu0 %2731  ;;  %v6471_v50 = vadd.f32 %v2331_v10, %v5780_v5 }
 0x32e   : >> { %v6450_v47 = vpop.permute.xlu1 %2729 }
 0x32f   : >> { %9128 = vst [vmem:[#allocation179_spill] sm:$0xff] %v6450_v47  ;;  %2827 = vrot.lane.b32.xlu0 %v6443_v61, %s4490_s22  ;;  %v6466_v47 = vadd.f32 %v2332_v30, %v5784_v6  ;;  %9131 = vst [vmem:[#allocation182_spill] sm:$0xff] %v6471_v50  ;;  %v2335_v61 = vsel %vm571_vm3, %v6253_v60, %v6255_v32 }
 0x330   : >> { %2161 = vrot.lane.b32.xlu1 %v6146_v43, %s4484_s5 }
 0x331   : >> { %9130 = vst [vmem:[#allocation181_spill] sm:$0xff] %v6466_v47  ;;  %v6468_v27 = vpop.permute.xlu0 %3261 }
 0x332   : >> { %v6473_v20 = vpop.permute.xlu1 %2733 }
 0x333   : >> { %2831 = vrot.lane.b32.xlu0 %v6466_v47, %s4490_s22  ;;  %v2954_v5 = vsel %vm2951_vm5, %v6445_v23, %v6473_v20  ;;  %v2336_v47 = vsel %vm571_vm3, %v6255_v32, %v6259_v40  ;;  %v2337_v32 = vsel %vm571_vm3, %v6259_v40, %v6261_v13 }
 0x334   : >> { %2829 = vrot.lane.b32.xlu1 %v6471_v50, %s4490_s22 }
 0x335   : >> { %v6480_v43 = vpop.permute.xlu0 %2743 }
 0x336   : >> { %9132 = vst [vmem:[#allocation183_spill] sm:$0xff] %v6480_v43  ;;  %v6486_v6 = vpop.permute.xlu1 %3259 }
 0x337   : >> { %v3483_v30 = vsel %vm3481_vm9, %v6486_v6, %v6468_v27  ;;  %2171 = vrot.lane.b32.xlu0 %v6149_v54, %s4484_s5 }
 0x338   : >> { %v3722_v10 = vsel %vm4820_vm14, %v2954_v5, %v3483_v30  ;;  %1948 = vrot.lane.b32.xlu1 %v6164_v29, %s4483_s4  ;;  %v9134_v29 = vld [vmem:[#allocation58_spill] sm:$0xff]  ;;  %v9137_v30 = vld [vmem:[#allocation55_spill] sm:$0xff] }
 0x339   : >> { %3837 = vst [vmem:[%s6484_s14 + $0x10] sm:$0xff] %v3722_v10  ;;  %v6501_v45 = vpop.permute.xlu0 %2747  ;;  %v6516_v54 = vadd.f32 %v2336_v47, %v9134_v29  ;;  %v6521_v10 = vadd.f32 %v2335_v61, %v9137_v30  ;;  %v9139_v47 = vld [vmem:[#allocation59_spill] sm:$0xff] }
 0x33a   : >> { %v6506_v50 = vpop.permute.xlu1 %3263  ;;  %v6535_v29 = vadd.f32 %v2337_v32, %v9139_v47  ;;  %v2340_v47 = vsel %vm571_vm3, %v6267_v49, %v6272_v55 }
 0x33b   : >> { %1946 = vrot.lane.b32.xlu0 %v6153_v57, %s4483_s4  ;;  %9135 = vst [vmem:[#allocation58_spill] sm:$0xff] %v6516_v54  ;;  %9138 = vst [vmem:[#allocation55_spill] sm:$0xff] %v6521_v10 }
 0x33c   : >> { %2173 = vrot.lane.b32.xlu1 %v6153_v57, %s4484_s5  ;;  %9140 = vst [vmem:[#allocation59_spill] sm:$0xff] %v6535_v29 }
 0x33d   : >> { %v6518_v5 = vpop.permute.xlu0 %3273 }
 0x33e   : >> { %9136 = vst [vmem:[#allocation184_spill] sm:$0xff] %v6518_v5  ;;  %v6523_v43 = vpop.permute.xlu1 %2745 }
 0x33f   : >> { %2843 = vrot.lane.b32.xlu0 %v6516_v54, %s4490_s22  ;;  %v2960_v61 = vsel %vm2951_vm5, %v6523_v43, %v6501_v45 }
 0x340   : >> { %2841 = vrot.lane.b32.xlu1 %v6521_v10, %s4490_s22  ;;  %v2341_v10 = vsel %vm571_vm3, %v6272_v55, %v6284_v7 }
 0x341   : >> { %v6532_v57 = vpop.permute.xlu0 %3277 }
 0x342   : >> { %v6537_v60 = vpop.permute.xlu1 %3275 }
 0x343   : >> { %v3489_v40 = vsel %vm3481_vm9, %v6518_v5, %v6537_v60  ;;  %2183 = vrot.lane.b32.xlu0 %v6172_v9, %s4484_s5  ;;  %v9143_v9 = vld [vmem:[#allocation57_spill] sm:$0xff] }
 0x344   : >> { %v3729_v30 = vsel %vm4820_vm14, %v2960_v61, %v3489_v40  ;;  %2845 = vrot.lane.b32.xlu1 %v6535_v29, %s4490_s22  ;;  %v6564_v61 = vadd.f32 %v2340_v47, %v9143_v9 }
 0x345   : >> { %3845 = vst [vmem:[%s6484_s14 + $0x48] sm:$0xff] %v3729_v30  ;;  %v6552_v32 = vpop.permute.xlu0 %2759  ;;  %v2342_v30 = vsel %vm571_vm3, %v6284_v7, %v6289_v58 }
 0x346   : >> { %9141 = vst [vmem:[#allocation185_spill] sm:$0xff] %v6552_v32  ;;  %v6557_v54 = vpop.permute.xlu1 %2757  ;;  %9144 = vst [vmem:[#allocation57_spill] sm:$0xff] %v6564_v61 }
 0x347   : >> { %9142 = vst [vmem:[#allocation186_spill] sm:$0xff] %v6557_v54  ;;  %1950 = vrot.lane.b32.xlu0 %v6177_v35, %s4483_s4  ;;  %v9147_v54 = vld [vmem:[#allocation60_spill] sm:$0xff] }
 0x348   : >> { %1952 = vrot.lane.b32.xlu1 %v6189_v14, %s4483_s4  ;;  %v9145_v14 = vld [vmem:[#allocation61_spill] sm:$0xff]  ;;  %v6586_v49 = vadd.f32 %v2341_v10, %v9147_v54 }
 0x349   : >> { %v6566_v40 = vpop.permute.xlu0 %3289  ;;  %v6581_v47 = vadd.f32 %v2342_v30, %v9145_v14  ;;  %v2346_v14 = vsel %vm571_vm3, %v6307_v8, %v6311_v51 }
 0x34a   : >> { %v6571_v29 = vpop.permute.xlu1 %2761  ;;  %9148 = vst [vmem:[#allocation60_spill] sm:$0xff] %v6586_v49 }
 0x34b   : >> { %2855 = vrot.lane.b32.xlu0 %v6564_v61, %s4490_s22  ;;  %9146 = vst [vmem:[#allocation61_spill] sm:$0xff] %v6581_v47  ;;  %v2966_v55 = vsel %vm2951_vm5, %v6552_v32, %v6571_v29  ;;  %v2351_v32 = vsel %vm571_vm3, %v6323_v34, %v6329_v48 }
 0x34c   : >> { %2185 = vrot.lane.b32.xlu1 %v6177_v35, %s4484_s5 }
 0x34d   : >> { %v6583_v9 = vpop.permute.xlu0 %2111 }
 0x34e   : >> { %v6588_v5 = vpop.permute.xlu1 %3287 }
 0x34f   : >> { %9149 = vst [vmem:[#allocation187_spill] sm:$0xff] %v6588_v5  ;;  %v3495_v7 = vsel %vm3481_vm9, %v6588_v5, %v6566_v40  ;;  %2859 = vrot.lane.b32.xlu0 %v6581_v47, %s4490_s22  ;;  %v9153_v47 = vld [vmem:[#allocation63_spill] sm:$0xff] }
 0x350   : >> { %v3736_v35 = vsel %vm4820_vm14, %v2966_v55, %v3495_v7  ;;  %2857 = vrot.lane.b32.xlu1 %v6586_v49, %s4490_s22  ;;  %v2345_v7 = vsel %vm571_vm3, %v6302_v19, %v6307_v8  ;;  %v2347_v8 = vsel %vm571_vm3, %v6311_v51, %v6313_v59 }
 0x351   : >> { %3852 = vst [vmem:[%s6484_s14 + $0x80] sm:$0xff] %v3736_v35  ;;  %v6603_v54 = vpop.permute.xlu0 %1926  ;;  %v6631_v49 = vadd.f32 %v2345_v7, %v9153_v47  ;;  %v2350_v7 = vsel %vm571_vm3, %v6318_v37, %v6323_v34 }
 0x352   : >> { %v6605_v10 = vpop.permute.xlu1 %3291 }
 0x353   : >> { %2195 = vrot.lane.b32.xlu0 %v6180_v41, %s4484_s5  ;;  %v9151_v41 = vld [vmem:[#allocation66_spill] sm:$0xff]  ;;  %9154 = vst [vmem:[#allocation63_spill] sm:$0xff] %v6631_v49 }
 0x354   : >> { %1956 = vrot.lane.b32.xlu1 %v6193_v36, %s4483_s4  ;;  %v6626_v36 = vadd.f32 %v2346_v14, %v9151_v41  ;;  %v9156_v14 = vld [vmem:[#allocation67_spill] sm:$0xff] }
 0x355   : >> { %v6611_v30 = vpop.permute.xlu0 %2771  ;;  %v6645_v41 = vadd.f32 %v2347_v8, %v9156_v14 }
 0x356   : >> { %9150 = vst [vmem:[#allocation188_spill] sm:$0xff] %v6611_v30  ;;  %v6616_v55 = vpop.permute.xlu1 %1928  ;;  %9152 = vst [vmem:[#allocation66_spill] sm:$0xff] %v6626_v36 }
 0x357   : >> { %1954 = vrot.lane.b32.xlu0 %v6184_v31, %s4483_s4  ;;  %9157 = vst [vmem:[#allocation67_spill] sm:$0xff] %v6645_v41 }
 0x358   : >> { %2197 = vrot.lane.b32.xlu1 %v6184_v31, %s4484_s5 }
 0x359   : >> { %v6628_v35 = vpop.permute.xlu0 %2775 }
 0x35a   : >> { %v6633_v61 = vpop.permute.xlu1 %2113 }
 0x35b   : >> { %2871 = vrot.lane.b32.xlu0 %v6626_v36, %s4490_s22 }
 0x35c   : >> { %2869 = vrot.lane.b32.xlu1 %v6631_v49, %s4490_s22  ;;  %v9160_v49 = vld [vmem:[#allocation65_spill] sm:$0xff] }
 0x35d   : >> { %v6642_v31 = vpop.permute.xlu0 %3301  ;;  %v6673_v30 = vadd.f32 %v2350_v7, %v9160_v49  ;;  %v9162_v49 = vld [vmem:[#allocation69_spill] sm:$0xff] }
 0x35e   : >> { %9155 = vst [vmem:[#allocation189_spill] sm:$0xff] %v6642_v31  ;;  %v6647_v47 = vpop.permute.xlu1 %2773 }
 0x35f   : >> { %9158 = vst [vmem:[#allocation190_spill] sm:$0xff] %v6647_v47  ;;  %2207 = vrot.lane.b32.xlu0 %v6202_v42, %s4484_s5  ;;  %v2972_v8 = vsel %vm2951_vm5, %v6647_v47, %v6628_v35  ;;  %v2352_v47 = vsel %vm571_vm3, %v6329_v48, %v6334_v0 }
 0x360   : >> { %2873 = vrot.lane.b32.xlu1 %v6645_v41, %s4490_s22  ;;  %v9159_v41 = vld [vmem:[#allocation149_spill] sm:$0xff] }
 0x361   : >> { %v6653_v51 = vpop.permute.xlu0 %3305  ;;  %9161 = vst [vmem:[#allocation149_spill] sm:$0xff] %v6673_v30 }
 0x362   : >> { %v6658_v36 = vpop.permute.xlu1 %3303 }
 0x363   : >> { %v3501_v14 = vsel %vm3481_vm9, %v6642_v31, %v6658_v36  ;;  %1958 = vrot.lane.b32.xlu0 %v6206_v38, %s4483_s4 }
 0x364   : >> { %v3743_v42 = vsel %vm4820_vm14, %v2972_v8, %v3501_v14  ;;  %1960 = vrot.lane.b32.xlu1 %v9159_v41, %s4483_s4  ;;  %v6691_v41 = vadd.f32 %v2352_v47, %v9162_v49  ;;  %v9164_v8 = vld [vmem:[#allocation68_spill] sm:$0xff]  ;;  %v9169_v47 = vld [vmem:[#allocation150_spill] sm:$0xff]  ;;  %v2356_v49 = vsel %vm571_vm3, %v6342_v28, %v6350_v3 }
 0x365   : >> { %3859 = vst [vmem:[%s6484_s14 + $0xb8] sm:$0xff] %v3743_v42  ;;  %v6676_v5 = vpop.permute.xlu0 %2123  ;;  %v6696_v14 = vadd.f32 %v2351_v32, %v9164_v8 }
 0x366   : >> { %v6681_v31 = vpop.permute.xlu1 %1932  ;;  %9163 = vst [vmem:[#allocation65_spill] sm:$0xff] %v6691_v41 }
 0x367   : >> { %2883 = vrot.lane.b32.xlu0 %v6673_v30, %s4490_s22  ;;  %9165 = vst [vmem:[#allocation69_spill] sm:$0xff] %v6696_v14 }
 0x368   : >> { %2209 = vrot.lane.b32.xlu1 %v6206_v38, %s4484_s5  ;;  %v9168_v38 = vld [vmem:[#allocation147_spill] sm:$0xff] }
 0x369   : >> { %v6693_v7 = vpop.permute.xlu0 %1930 }
 0x36a   : >> { %v6698_v42 = vpop.permute.xlu1 %2125 }
 0x36b   : >> { %2887 = vrot.lane.b32.xlu0 %v6691_v41, %s4490_s22  ;;  %v2355_v41 = vsel %vm571_vm3, %v6340_v62, %v6342_v28  ;;  %v2357_v28 = vsel %vm571_vm3, %v6350_v3, %v6353_v39  ;;  %v9178_v3 = vld [vmem:[#allocation75_spill] sm:$0xff] }
 0x36c   : >> { %2885 = vrot.lane.b32.xlu1 %v6696_v14, %s4490_s22  ;;  %v9172_v14 = vld [vmem:[#allocation148_spill] sm:$0xff] }
 0x36d   : >> { %v6704_v34 = vpop.permute.xlu0 %2787 }
 0x36e   : >> { %9166 = vst [vmem:[#allocation68_spill] sm:$0xff] %v6704_v34  ;;  %v6706_v48 = vpop.permute.xlu1 %2785 }
 0x36f   : >> { %9167 = vst [vmem:[#allocation191_spill] sm:$0xff] %v6706_v48  ;;  %2219 = vrot.lane.b32.xlu0 %v9168_v38, %s4484_s5  ;;  %v9173_v38 = vld [vmem:[#allocation74_spill] sm:$0xff]  ;;  %v9175_v48 = vld [vmem:[#allocation71_spill] sm:$0xff] }
 0x370   : >> { %1964 = vrot.lane.b32.xlu1 %v9169_v47, %s4483_s4  ;;  %v6727_v47 = vadd.f32 %v2356_v49, %v9173_v38  ;;  %v6732_v37 = vadd.f32 %v2355_v41, %v9175_v48  ;;  %v6755_v49 = vadd.f32 %v2357_v28, %v9178_v3  ;;  %v9183_v28 = vld [vmem:[#allocation159_spill] sm:$0xff]  ;;  %v9184_v3 = vld [vmem:[#allocation73_spill] sm:$0xff] }
 0x371   : >> { %v6712_v32 = vpop.permute.xlu0 %3317 }
 0x372   : >> { %9170 = vst [vmem:[#allocation147_spill] sm:$0xff] %v6712_v32  ;;  %v6717_v8 = vpop.permute.xlu1 %2789  ;;  %9174 = vst [vmem:[#allocation148_spill] sm:$0xff] %v6727_v47 }
 0x373   : >> { %9171 = vst [vmem:[#allocation150_spill] sm:$0xff] %v6717_v8  ;;  %1962 = vrot.lane.b32.xlu0 %v9172_v14, %s4483_s4  ;;  %9176 = vst [vmem:[#allocation74_spill] sm:$0xff] %v6732_v37  ;;  %v2978_v62 = vsel %vm2951_vm5, %v6704_v34, %v6717_v8  ;;  %v9190_v34 = vld [vmem:[#allocation76_spill] sm:$0xff] }
 0x374   : >> { %2221 = vrot.lane.b32.xlu1 %v9172_v14, %s4484_s5  ;;  %9179 = vst [vmem:[#allocation75_spill] sm:$0xff] %v6755_v49 }
 0x375   : >> { %v6729_v30 = vpop.permute.xlu0 %2135 }
 0x376   : >> { %v6734_v19 = vpop.permute.xlu1 %3315 }
 0x377   : >> { %9177 = vst [vmem:[#allocation71_spill] sm:$0xff] %v6734_v19  ;;  %v3507_v14 = vsel %vm3481_vm9, %v6734_v19, %v6712_v32  ;;  %2899 = vrot.lane.b32.xlu0 %v6727_v47, %s4490_s22  ;;  %v2361_v19 = vsel %vm571_vm3, %v6363_v25, %v6373_v33 }
 0x378   : >> { %v3750_v41 = vsel %vm4820_vm14, %v2978_v62, %v3507_v14  ;;  %2897 = vrot.lane.b32.xlu1 %v6732_v37, %s4490_s22  ;;  %v2360_v62 = vsel %vm571_vm3, %v6359_v46, %v6363_v25  ;;  %v6797_v46 = vadd.f32 %v2361_v19, %v9190_v34  ;;  %v9195_v34 = vld [vmem:[#allocation157_spill] sm:$0xff] }
 0x379   : >> { %3866 = vst [vmem:[%s6484_s14 + $0xf0] sm:$0xff] %v3750_v41  ;;  %v6752_v48 = vpop.permute.xlu0 %1934  ;;  %v9182_v41 = vld [vmem:[#allocation156_spill] sm:$0xff]  ;;  %v6775_v37 = vadd.f32 %v2360_v62, %v9184_v3  ;;  %v9187_v62 = vld [vmem:[#allocation77_spill] sm:$0xff] }
 0x37a   : >> { %v6757_v38 = vpop.permute.xlu1 %3319  ;;  %9191 = vst [vmem:[#allocation76_spill] sm:$0xff] %v6797_v46 }
 0x37b   : >> { %9180 = vst [vmem:[#allocation192_spill] sm:$0xff] %v6757_v38  ;;  %2231 = vrot.lane.b32.xlu0 %v6281_v15, %s4484_s5  ;;  %9185 = vst [vmem:[#allocation156_spill] sm:$0xff] %v6775_v37 }
 0x37c   : >> { %2901 = vrot.lane.b32.xlu1 %v6755_v49, %s4490_s22  ;;  %v2362_v49 = vsel %vm571_vm3, %v6373_v33, %v6375_v53 }
 0x37d   : >> { %v6763_v47 = vpop.permute.xlu0 %2799 }
 0x37e   : >> { %9181 = vst [vmem:[#allocation193_spill] sm:$0xff] %v6763_v47  ;;  %v6768_v14 = vpop.permute.xlu1 %1936 }
 0x37f   : >> { %1966 = vrot.lane.b32.xlu0 %v9182_v41, %s4483_s4 }
 0x380   : >> { %1968 = vrot.lane.b32.xlu1 %v9183_v28, %s4483_s4  ;;  %v6792_v28 = vadd.f32 %v2362_v49, %v9187_v62  ;;  %v9196_v62 = vld [vmem:[#allocation161_spill] sm:$0xff] }
 0x381   : >> { %v6777_v15 = vpop.permute.xlu0 %2803 }
 0x382   : >> { %9186 = vst [vmem:[#allocation159_spill] sm:$0xff] %v6777_v15  ;;  %v6782_v47 = vpop.permute.xlu1 %2137  ;;  %9188 = vst [vmem:[#allocation73_spill] sm:$0xff] %v6792_v28 }
 0x383   : >> { %2911 = vrot.lane.b32.xlu0 %v6775_v37, %s4490_s22 }
 0x384   : >> { %2233 = vrot.lane.b32.xlu1 %v9182_v41, %s4484_s5 }
 0x385   : >> { %v6794_v3 = vpop.permute.xlu0 %3329 }
 0x386   : >> { %9189 = vst [vmem:[#allocation77_spill] sm:$0xff] %v6794_v3  ;;  %v6799_v8 = vpop.permute.xlu1 %2801 }
 0x387   : >> { %9192 = vst [vmem:[#allocation194_spill] sm:$0xff] %v6799_v8  ;;  %2915 = vrot.lane.b32.xlu0 %v6792_v28, %s4490_s22  ;;  %v2984_v49 = vsel %vm2951_vm5, %v6799_v8, %v6777_v15 }
 0x388   : >> { %2913 = vrot.lane.b32.xlu1 %v6797_v46, %s4490_s22  ;;  %v2366_v46 = vsel %vm571_vm3, %v6388_v21, %v6400_v26 }
 0x389   : >> { %v6805_v25 = vpop.permute.xlu0 %3333 }
 0x38a   : >> { %9193 = vst [vmem:[#allocation195_spill] sm:$0xff] %v6805_v25  ;;  %v6807_v33 = vpop.permute.xlu1 %3331 }
 0x38b   : >> { %9194 = vst [vmem:[#allocation196_spill] sm:$0xff] %v6807_v33  ;;  %v3513_v19 = vsel %vm3481_vm9, %v6794_v3, %v6807_v33  ;;  %2243 = vrot.lane.b32.xlu0 %v9195_v34, %s4484_s5  ;;  %v2365_v3 = vsel %vm571_vm3, %v6383_v52, %v6388_v21  ;;  %v9197_v34 = vld [vmem:[#allocation158_spill] sm:$0xff]  ;;  %v2367_v21 = vsel %vm571_vm3, %v6400_v26, %v6405_v63 }
 0x38c   : >> { %v3757_v41 = vsel %vm4820_vm14, %v2984_v49, %v3513_v19  ;;  %1972 = vrot.lane.b32.xlu1 %v9196_v62, %s4483_s4  ;;  %v9198_v49 = vld [vmem:[#allocation82_spill] sm:$0xff]  ;;  %v9200_v62 = vld [vmem:[#allocation79_spill] sm:$0xff] }
 0x38d   : >> { %3873 = vst [vmem:[%s6484_s14 + $0x128] sm:$0xff] %v3757_v41  ;;  %v6822_v28 = vpop.permute.xlu0 %2147  ;;  %v6837_v19 = vadd.f32 %v2366_v46, %v9198_v49  ;;  %v6842_v22 = vadd.f32 %v2365_v3, %v9200_v62  ;;  %v9203_v46 = vld [vmem:[#allocation83_spill] sm:$0xff]  ;;  %v9206_v3 = vld [vmem:[#allocation165_spill] sm:$0xff]  ;;  %v2370_v62 = vsel %vm571_vm3, %v6414_v11, %v6419_v16 }
 0x38e   : >> { %v6827_v37 = vpop.permute.xlu1 %1940  ;;  %v6856_v49 = vadd.f32 %v2367_v21, %v9203_v46  ;;  %v9209_v21 = vld [vmem:[#allocation81_spill] sm:$0xff] }
 0x38f   : >> { %1970 = vrot.lane.b32.xlu0 %v9197_v34, %s4483_s4  ;;  %9199 = vst [vmem:[#allocation157_spill] sm:$0xff] %v6837_v19  ;;  %9201 = vst [vmem:[#allocation161_spill] sm:$0xff] %v6842_v22  ;;  %v6876_v46 = vadd.f32 %v2370_v62, %v9209_v21 }
 0x390   : >> { %2245 = vrot.lane.b32.xlu1 %v9197_v34, %s4484_s5  ;;  %9204 = vst [vmem:[#allocation82_spill] sm:$0xff] %v6856_v49 }
 0x391   : >> { %v6839_v41 = vpop.permute.xlu0 %1938  ;;  %9210 = vst [vmem:[#allocation165_spill] sm:$0xff] %v6876_v46 }
 0x392   : >> { %v6844_v8 = vpop.permute.xlu1 %2149 }
 0x393   : >> { %2927 = vrot.lane.b32.xlu0 %v6837_v19, %s4490_s22 }
 0x394   : >> { %2925 = vrot.lane.b32.xlu1 %v6842_v22, %s4490_s22  ;;  %v9214_v22 = vld [vmem:[#allocation84_spill] sm:$0xff] }
 0x395   : >> { %v6853_v34 = vpop.permute.xlu0 %2815 }
 0x396   : >> { %9202 = vst [vmem:[#allocation158_spill] sm:$0xff] %v6853_v34  ;;  %v6858_v52 = vpop.permute.xlu1 %2813  ;;  %v9208_v34 = vld [vmem:[#allocation167_spill] sm:$0xff] }
 0x397   : >> { %9205 = vst [vmem:[#allocation79_spill] sm:$0xff] %v6858_v52  ;;  %2255 = vrot.lane.b32.xlu0 %v9206_v3, %s4484_s5 }
 0x398   : >> { %2929 = vrot.lane.b32.xlu1 %v6856_v49, %s4490_s22  ;;  %v2372_v49 = vsel %vm571_vm3, %v6425_v56, %v6430_v44 }
 0x399   : >> { %v6864_v26 = vpop.permute.xlu0 %2159 }
 0x39a   : >> { %v6869_v19 = vpop.permute.xlu1 %2817 }
 0x39b   : >> { %9207 = vst [vmem:[#allocation83_spill] sm:$0xff] %v6869_v19  ;;  %1974 = vrot.lane.b32.xlu0 %v9208_v34, %s4483_s4  ;;  %v2371_v19 = vsel %vm571_vm3, %v6419_v16, %v6425_v56 }
 0x39c   : >> { %1976 = vrot.lane.b32.xlu1 %v6370_v12, %s4483_s4  ;;  %v9211_v12 = vld [vmem:[#allocation85_spill] sm:$0xff]  ;;  %v6898_v11 = vadd.f32 %v2371_v19, %v9214_v22 }
 0x39d   : >> { %v6878_v3 = vpop.permute.xlu0 %1942  ;;  %v6893_v62 = vadd.f32 %v2372_v49, %v9211_v12  ;;  %v9219_v49 = vld [vmem:[#allocation168_spill] sm:$0xff] }
 0x39e   : >> { %v6883_v52 = vpop.permute.xlu1 %1944  ;;  %9215 = vst [vmem:[#allocation85_spill] sm:$0xff] %v6898_v11 }
 0x39f   : >> { %2939 = vrot.lane.b32.xlu0 %v6876_v46, %s4490_s22  ;;  %9212 = vst [vmem:[#allocation167_spill] sm:$0xff] %v6893_v62 }
 0x3a0   : >> { %2257 = vrot.lane.b32.xlu1 %v9208_v34, %s4484_s5  ;;  %v9218_v34 = vld [vmem:[#allocation170_spill] sm:$0xff] }
 0x3a1   : >> { %v6895_v21 = vpop.permute.xlu0 %2827 }
 0x3a2   : >> { %9213 = vst [vmem:[#allocation81_spill] sm:$0xff] %v6895_v21  ;;  %v6900_v44 = vpop.permute.xlu1 %2161 }
 0x3a3   : >> { %2943 = vrot.lane.b32.xlu0 %v6893_v62, %s4490_s22 }
 0x3a4   : >> { %2941 = vrot.lane.b32.xlu1 %v6898_v11, %s4490_s22  ;;  %v9227_v11 = vld [vmem:[#allocation87_spill] sm:$0xff] }
 0x3a5   : >> { %v6906_v16 = vpop.permute.xlu0 %2831 }
 0x3a6   : >> { %9216 = vst [vmem:[#allocation84_spill] sm:$0xff] %v6906_v16  ;;  %v6908_v56 = vpop.permute.xlu1 %2829 }
 0x3a7   : >> { %9217 = vst [vmem:[#allocation197_spill] sm:$0xff] %v6908_v56  ;;  %2267 = vrot.lane.b32.xlu0 %v6365_v18, %s4484_s5  ;;  %v9223_v56 = vld [vmem:[#allocation180_spill] sm:$0xff] }
 0x3a8   : >> { %1980 = vrot.lane.b32.xlu1 %v9218_v34, %s4483_s4 }
 0x3a9   : >> { %v6914_v22 = vpop.permute.xlu0 %2171 }
 0x3aa   : >> { %v6916_v19 = vpop.permute.xlu1 %1948 }
 0x3ab   : >> { %1978 = vrot.lane.b32.xlu0 %v9219_v49, %s4483_s4 }
 0x3ac   : >> { %2269 = vrot.lane.b32.xlu1 %v9219_v49, %s4484_s5 }
 0x3ad   : >> { %v6922_v12 = vpop.permute.xlu0 %1946 }
 0x3ae   : >> { %v6924_v62 = vpop.permute.xlu1 %2173 }
 0x3af   : >> { %2279 = vrot.lane.b32.xlu0 %v6434_v4, %s4484_s5 }
 0x3b0   : >> { %1984 = vrot.lane.b32.xlu1 %v6436_v24, %s4483_s4  ;;  %v9224_v24 = vld [vmem:[#allocation129_spill] sm:$0xff] }
 0x3b1   : >> { %v6930_v18 = vpop.permute.xlu0 %2843 }
 0x3b2   : >> { %9220 = vst [vmem:[#allocation170_spill] sm:$0xff] %v6930_v18  ;;  %v6932_v34 = vpop.permute.xlu1 %2841  ;;  %v2298_v18 = vsel %vm571_vm3, %v9224_v24, %v6583_v9  ;;  %v9228_v24 = vld [vmem:[#allocation90_spill] sm:$0xff] }
 0x3b3   : >> { %9221 = vst [vmem:[#allocation168_spill] sm:$0xff] %v6932_v34  ;;  %1982 = vrot.lane.b32.xlu0 %v6440_v17, %s4483_s4 }
 0x3b4   : >> { %2281 = vrot.lane.b32.xlu1 %v6440_v17, %s4484_s5  ;;  %v2299_v17 = vsel %vm571_vm3, %v6583_v9, %v6633_v61  ;;  %v2509_v9 = vadd.f32 %v6633_v61, %v9228_v24  ;;  %v9233_v24 = vld [vmem:[#allocation91_spill] sm:$0xff] }
 0x3b5   : >> { %v6938_v49 = vpop.permute.xlu0 %2183  ;;  %v2508_v46 = vadd.f32 %v2299_v17, %v9227_v11  ;;  %v9232_v17 = vld [vmem:[#allocation88_spill] sm:$0xff] }
 0x3b6   : >> { %v6940_v16 = vpop.permute.xlu1 %2845 }
 0x3b7   : >> { %9222 = vst [vmem:[#allocation198_spill] sm:$0xff] %v6940_v16  ;;  %2291 = vrot.lane.b32.xlu0 %v9223_v56, %s4484_s5  ;;  %v9225_v56 = vld [vmem:[#allocation86_spill] sm:$0xff] }
 0x3b8   : >> { %1988 = vrot.lane.b32.xlu1 %v6459_v1, %s4483_s4  ;;  %v2507_v1 = vadd.f32 %v2298_v18, %v9225_v56 }
 0x3b9   : >> { %v6946_v4 = vpop.permute.xlu0 %1950 }
 0x3ba   : >> { %v6951_v34 = vpop.permute.xlu1 %1952 }
 0x3bb   : >> { %1986 = vrot.lane.b32.xlu0 %v6461_v2, %s4483_s4  ;;  %s8616_s4 = scalar_lea.hbm (%p347_p11), %s8665_s2, %s4308_s23 }
 0x3bc   : >> { %2293 = vrot.lane.b32.xlu1 %v6461_v2, %s4484_s5  ;;  %v9231_v2 = vld [vmem:[#allocation137_spill] sm:$0xff] }
 0x3bd   : >> { %v6961_v16 = vpop.permute.xlu0 %2855  ;;  %v2303_v18 = vsel %vm571_vm3, %v9231_v2, %v6676_v5  ;;  %v2516_v2 = vadd.f32 %v6698_v42, %v9233_v24  ;;  %v9237_v24 = vld [vmem:[#allocation46_spill] sm:$0xff] }
 0x3be   : >> { %9226 = vst [vmem:[#allocation180_spill] sm:$0xff] %v6961_v16  ;;  %v6964_v21 = vpop.permute.xlu1 %2185  ;;  %v2514_v56 = vadd.f32 %v2303_v18, %v9232_v17  ;;  %v9235_v17 = vld [vmem:[#allocation125_spill] sm:$0xff] }
 0x3bf   : >> { %2735 = vrot.lane.b32.xlu0 %v2507_v1, %s4490_s22 }
 0x3c0   : >> { %2737 = vrot.lane.b32.xlu1 %v2508_v46, %s4490_s22 }
 0x3c1   : >> { %v6970_v63 = vpop.permute.xlu0 %2859 }
 0x3c2   : >> { %9229 = vst [vmem:[#allocation129_spill] sm:$0xff] %v6970_v63  ;;  %v6972_v15 = vpop.permute.xlu1 %2857 }
 0x3c3   : >> { %9230 = vst [vmem:[#allocation86_spill] sm:$0xff] %v6972_v15  ;;  %2739 = vrot.lane.b32.xlu0 %v2509_v9, %s4490_s22 }
 0x3c4   : >> { %3267 = vrot.lane.b32.xlu1 %v2508_v46, %s4491_s7  ;;  %v1991_v46 = vsel %vm442_vm2, %v6603_v54, %v6616_v55  ;;  %v1992_v55 = vsel %vm442_vm2, %v6693_v7, %v6681_v31  ;;  %v2304_v31 = vsel %vm571_vm3, %v6676_v5, %v6698_v42  ;;  %v9245_v5 = vld [vmem:[#allocation139_spill] sm:$0xff] }
 0x3c5   : >> { %v6979_v11 = vpop.permute.xlu0 %2195  ;;  %v2487_v15 = vsel %vm571_vm3, %v1991_v46, %v9235_v17  ;;  %v2308_v42 = vsel %vm571_vm3, %v9245_v5, %v6729_v30  ;;  %v9248_v5 = vld [vmem:[#allocation96_spill] sm:$0xff] }
 0x3c6   : >> { %v6982_v16 = vpop.permute.xlu1 %1956  ;;  %v2503_v25 = vadd.f32 %v2487_v15, %v9237_v24  ;;  %v9241_v24 = vld [vmem:[#allocation47_spill] sm:$0xff] }
 0x3c7   : >> { %3209 = vrot.lane.b32.xlu0 %v2509_v9, %s4492_s16 }
 0x3c8   : >> { %2749 = vrot.lane.b32.xlu1 %v2514_v56, %s4490_s22 }
 0x3c9   : >> { %v6986_v61 = vpop.permute.xlu0 %1954 }
 0x3ca   : >> { %v6990_v63 = vpop.permute.xlu1 %2197 }
 0x3cb   : >> { %3265 = vrot.lane.b32.xlu0 %v2507_v1, %s4491_s7 }
 0x3cc   : >> { %2753 = vrot.lane.b32.xlu1 %v2516_v2, %s4490_s22 }
 0x3cd   : >> { %v6997_v18 = vpop.permute.xlu0 %2871 }
 0x3ce   : >> { %9234 = vst [vmem:[#allocation87_spill] sm:$0xff] %v6997_v18  ;;  %v7001_v33 = vpop.permute.xlu1 %2869 }
 0x3cf   : >> { %9236 = vst [vmem:[#allocation90_spill] sm:$0xff] %v7001_v33  ;;  %3269 = vrot.lane.b32.xlu0 %v2509_v9, %s4491_s7  ;;  %v9239_v9 = vld [vmem:[#allocation133_spill] sm:$0xff]  ;;  %v2523_v33 = vadd.f32 %v6782_v47, %v9248_v5 }
 0x3d0   : >> { %3211 = vrot.lane.b32.xlu1 %v2516_v2, %s4492_s16  ;;  %v2488_v17 = vsel %vm571_vm3, %v1992_v55, %v9239_v9  ;;  %v9254_v5 = vld [vmem:[#allocation97_spill] sm:$0xff] }
 0x3d1   : >> { %v7006_v32 = vpop.permute.xlu0 %2207 }
 0x3d2   : >> { %v7008_v54 = vpop.permute.xlu1 %2873 }
 0x3d3   : >> { %9238 = vst [vmem:[#allocation137_spill] sm:$0xff] %v7008_v54  ;;  %2727 = vrot.lane.b32.xlu0 %v2503_v25, %s4490_s22  ;;  %v2510_v54 = vadd.f32 %v2488_v17, %v9241_v24  ;;  %v9246_v24 = vld [vmem:[#allocation92_spill] sm:$0xff] }
 0x3d4   : >> { %3279 = vrot.lane.b32.xlu1 %v2514_v56, %s4491_s7  ;;  %v9242_v56 = vld [vmem:[#allocation89_spill] sm:$0xff] }
 0x3d5   : >> { %v7015_v1 = vpop.permute.xlu0 %1958  ;;  %v2515_v55 = vadd.f32 %v2304_v31, %v9242_v56  ;;  %v2521_v31 = vadd.f32 %v2308_v42, %v9246_v24 }
 0x3d6   : >> { %v7017_v46 = vpop.permute.xlu1 %1960 }
 0x3d7   : >> { %3144 = vrot.lane.b32.xlu0 %v2503_v25, %s4493_s17 }
 0x3d8   : >> { %3283 = vrot.lane.b32.xlu1 %v2516_v2, %s4491_s7 }
 0x3d9   : >> { %v7023_v15 = vpop.permute.xlu0 %2883 }
 0x3da   : >> { %9240 = vst [vmem:[#allocation88_spill] sm:$0xff] %v7023_v15  ;;  %v7029_v7 = vpop.permute.xlu1 %2209 }
 0x3db   : >> { %3257 = vrot.lane.b32.xlu0 %v2503_v25, %s4491_s7  ;;  %v2309_v25 = vsel %vm571_vm3, %v6729_v30, %v6782_v47 }
 0x3dc   : >> { %2741 = vrot.lane.b32.xlu1 %v2510_v54, %s4490_s22 }
 0x3dd   : >> { %v7034_v9 = vpop.permute.xlu0 %2887 }
 0x3de   : >> { %9243 = vst [vmem:[#allocation91_spill] sm:$0xff] %v7034_v9  ;;  %v7036_v18 = vpop.permute.xlu1 %2885  ;;  %v9247_v9 = vld [vmem:[#allocation93_spill] sm:$0xff] }
 0x3df   : >> { %9244 = vst [vmem:[#allocation125_spill] sm:$0xff] %v7036_v18  ;;  %2751 = vrot.lane.b32.xlu0 %v2515_v55, %s4490_s22  ;;  %v2522_v18 = vadd.f32 %v2309_v25, %v9247_v9  ;;  %v9252_v25 = vld [vmem:[#allocation94_spill] sm:$0xff] }
 0x3e0   : >> { %3146 = vrot.lane.b32.xlu1 %v2510_v54, %s4493_s17 }
 0x3e1   : >> { %v7040_v2 = vpop.permute.xlu0 %2219 }
 0x3e2   : >> { %v7045_v17 = vpop.permute.xlu1 %1964 }
 0x3e3   : >> { %3281 = vrot.lane.b32.xlu0 %v2515_v55, %s4491_s7 }
 0x3e4   : >> { %3271 = vrot.lane.b32.xlu1 %v2510_v54, %s4491_s7  ;;  %v9251_v54 = vld [vmem:[#allocation141_spill] sm:$0xff] }
 0x3e5   : >> { %v7053_v56 = vpop.permute.xlu0 %1962  ;;  %v2313_v42 = vsel %vm571_vm3, %v9251_v54, %v6822_v28 }
 0x3e6   : >> { %v7056_v15 = vpop.permute.xlu1 %2221  ;;  %v2528_v24 = vadd.f32 %v2313_v42, %v9252_v25  ;;  %v9256_v25 = vld [vmem:[#allocation138_spill] sm:$0xff] }
 0x3e7   : >> { %2763 = vrot.lane.b32.xlu0 %v2521_v31, %s4490_s22 }
 0x3e8   : >> { %2765 = vrot.lane.b32.xlu1 %v2522_v18, %s4490_s22 }
 0x3e9   : >> { %v7062_v30 = vpop.permute.xlu0 %2899 }
 0x3ea   : >> { %9249 = vst [vmem:[#allocation46_spill] sm:$0xff] %v7062_v30  ;;  %v7064_v55 = vpop.permute.xlu1 %2897  ;;  %v2530_v30 = vadd.f32 %v6844_v8, %v9254_v5  ;;  %v9257_v5 = vld [vmem:[#allocation48_spill] sm:$0xff] }
 0x3eb   : >> { %9250 = vst [vmem:[#allocation133_spill] sm:$0xff] %v7064_v55  ;;  %2767 = vrot.lane.b32.xlu0 %v2523_v33, %s4490_s22 }
 0x3ec   : >> { %3295 = vrot.lane.b32.xlu1 %v2522_v18, %s4491_s7  ;;  %v1993_v18 = vsel %vm442_vm2, %v6752_v48, %v6768_v14  ;;  %v1994_v14 = vsel %vm442_vm2, %v6839_v41, %v6827_v37  ;;  %v2314_v37 = vsel %vm571_vm3, %v6822_v28, %v6844_v8  ;;  %v9265_v8 = vld [vmem:[#allocation143_spill] sm:$0xff] }
 0x3ed   : >> { %v7071_v9 = vpop.permute.xlu0 %2231  ;;  %v2318_v28 = vsel %vm571_vm3, %v9265_v8, %v6864_v26  ;;  %v9271_v8 = vld [vmem:[#allocation102_spill] sm:$0xff] }
 0x3ee   : >> { %v7074_v38 = vpop.permute.xlu1 %2901 }
 0x3ef   : >> { %9253 = vst [vmem:[#allocation47_spill] sm:$0xff] %v7074_v38  ;;  %3213 = vrot.lane.b32.xlu0 %v2523_v33, %s4492_s16  ;;  %v2489_v38 = vsel %vm571_vm3, %v1993_v18, %v9256_v25 }
 0x3f0   : >> { %2777 = vrot.lane.b32.xlu1 %v2528_v24, %s4490_s22  ;;  %v2517_v53 = vadd.f32 %v2489_v38, %v9257_v5  ;;  %v9261_v5 = vld [vmem:[#allocation49_spill] sm:$0xff] }
 0x3f1   : >> { %v7078_v47 = vpop.permute.xlu0 %1966 }
 0x3f2   : >> { %v7082_v54 = vpop.permute.xlu1 %1968 }
 0x3f3   : >> { %3293 = vrot.lane.b32.xlu0 %v2521_v31, %s4491_s7 }
 0x3f4   : >> { %2781 = vrot.lane.b32.xlu1 %v2530_v30, %s4490_s22 }
 0x3f5   : >> { %v7089_v42 = vpop.permute.xlu0 %2911 }
 0x3f6   : >> { %9255 = vst [vmem:[#allocation89_spill] sm:$0xff] %v7089_v42  ;;  %v7093_v55 = vpop.permute.xlu1 %2233 }
 0x3f7   : >> { %3297 = vrot.lane.b32.xlu0 %v2523_v33, %s4491_s7  ;;  %v9260_v33 = vld [vmem:[#allocation140_spill] sm:$0xff] }
 0x3f8   : >> { %3215 = vrot.lane.b32.xlu1 %v2530_v30, %s4492_s16  ;;  %v2490_v25 = vsel %vm571_vm3, %v1994_v14, %v9260_v33 }
 0x3f9   : >> { %v7098_v39 = vpop.permute.xlu0 %2915 }
 0x3fa   : >> { %9258 = vst [vmem:[#allocation139_spill] sm:$0xff] %v7098_v39  ;;  %v7100_v48 = vpop.permute.xlu1 %2913  ;;  %v2524_v39 = vadd.f32 %v2490_v25, %v9261_v5  ;;  %v9267_v5 = vld [vmem:[#allocation98_spill] sm:$0xff] }
 0x3fb   : >> { %9259 = vst [vmem:[#allocation92_spill] sm:$0xff] %v7100_v48  ;;  %2755 = vrot.lane.b32.xlu0 %v2517_v53, %s4490_s22 }
 0x3fc   : >> { %3307 = vrot.lane.b32.xlu1 %v2528_v24, %s4491_s7  ;;  %v9262_v24 = vld [vmem:[#allocation95_spill] sm:$0xff] }
 0x3fd   : >> { %v7107_v31 = vpop.permute.xlu0 %2243  ;;  %v2529_v14 = vadd.f32 %v2314_v37, %v9262_v24  ;;  %v2535_v37 = vadd.f32 %v2318_v28, %v9267_v5 }
 0x3fe   : >> { %v7109_v18 = vpop.permute.xlu1 %1972 }
 0x3ff   : >> { %3148 = vrot.lane.b32.xlu0 %v2517_v53, %s4493_s17 }
 0x400   : >> { %3311 = vrot.lane.b32.xlu1 %v2530_v30, %s4491_s7 }
 0x401   : >> { %v7115_v38 = vpop.permute.xlu0 %1970 }
 0x402   : >> { %v7121_v41 = vpop.permute.xlu1 %2245 }
 0x403   : >> { %3285 = vrot.lane.b32.xlu0 %v2517_v53, %s4491_s7  ;;  %v2319_v53 = vsel %vm571_vm3, %v6864_v26, %v6900_v44 }
 0x404   : >> { %2769 = vrot.lane.b32.xlu1 %v2524_v39, %s4490_s22 }
 0x405   : >> { %v7126_v33 = vpop.permute.xlu0 %2927 }
 0x406   : >> { %9263 = vst [vmem:[#allocation93_spill] sm:$0xff] %v7126_v33  ;;  %v7128_v48 = vpop.permute.xlu1 %2925  ;;  %v9269_v33 = vld [vmem:[#allocation99_spill] sm:$0xff] }
 0x407   : >> { %9264 = vst [vmem:[#allocation96_spill] sm:$0xff] %v7128_v48  ;;  %2779 = vrot.lane.b32.xlu0 %v2529_v14, %s4490_s22  ;;  %v2536_v48 = vadd.f32 %v2319_v53, %v9269_v33  ;;  %v9275_v53 = vld [vmem:[#allocation100_spill] sm:$0xff] }
 0x408   : >> { %3150 = vrot.lane.b32.xlu1 %v2524_v39, %s4493_s17 }
 0x409   : >> { %v7132_v30 = vpop.permute.xlu0 %2255 }
 0x40a   : >> { %v7137_v25 = vpop.permute.xlu1 %2929 }
 0x40b   : >> { %9266 = vst [vmem:[#allocation141_spill] sm:$0xff] %v7137_v25  ;;  %3309 = vrot.lane.b32.xlu0 %v2529_v14, %s4491_s7  ;;  %v2537_v25 = vadd.f32 %v6900_v44, %v9271_v8  ;;  %v9277_v8 = vld [vmem:[#allocation103_spill] sm:$0xff] }
 0x40c   : >> { %3299 = vrot.lane.b32.xlu1 %v2524_v39, %s4491_s7  ;;  %v9273_v39 = vld [vmem:[#allocation145_spill] sm:$0xff] }
 0x40d   : >> { %v7145_v24 = vpop.permute.xlu0 %1974  ;;  %v2323_v28 = vsel %vm571_vm3, %v9273_v39, %v6914_v22 }
 0x40e   : >> { %9268 = vst [vmem:[#allocation94_spill] sm:$0xff] %v7145_v24  ;;  %v7148_v42 = vpop.permute.xlu1 %1976  ;;  %v2542_v5 = vadd.f32 %v2323_v28, %v9275_v53  ;;  %v9279_v53 = vld [vmem:[#allocation142_spill] sm:$0xff] }
 0x40f   : >> { %9270 = vst [vmem:[#allocation97_spill] sm:$0xff] %v7148_v42  ;;  %2791 = vrot.lane.b32.xlu0 %v2535_v37, %s4490_s22 }
 0x410   : >> { %2793 = vrot.lane.b32.xlu1 %v2536_v48, %s4490_s22 }
 0x411   : >> { %v7154_v26 = vpop.permute.xlu0 %2939 }
 0x412   : >> { %9272 = vst [vmem:[#allocation138_spill] sm:$0xff] %v7154_v26  ;;  %v7156_v14 = vpop.permute.xlu1 %2257  ;;  %v2544_v26 = vadd.f32 %v6924_v62, %v9277_v8  ;;  %v9280_v8 = vld [vmem:[#allocation50_spill] sm:$0xff] }
 0x413   : >> { %2795 = vrot.lane.b32.xlu0 %v2537_v25, %s4490_s22 }
 0x414   : >> { %3323 = vrot.lane.b32.xlu1 %v2536_v48, %s4491_s7  ;;  %v1995_v48 = vsel %vm442_vm2, %v6878_v3, %v6883_v52  ;;  %v1996_v3 = vsel %vm442_vm2, %v6922_v12, %v6916_v19  ;;  %v2324_v19 = vsel %vm571_vm3, %v6914_v22, %v6924_v62  ;;  %v3484_v62 = vsel %vm3481_vm9, %v6468_v27, %v6506_v50  ;;  %v9291_v22 = vld [vmem:[#allocation151_spill] sm:$0xff]  ;;  %v9293_v27 = vld [vmem:[#allocation104_spill] sm:$0xff] }
 0x415   : >> { %v7163_v33 = vpop.permute.xlu0 %2943 }
 0x416   : >> { %9274 = vst [vmem:[#allocation48_spill] sm:$0xff] %v7163_v33  ;;  %v7166_v24 = vpop.permute.xlu1 %2941  ;;  %v2491_v33 = vsel %vm571_vm3, %v1995_v48, %v9279_v53 }
 0x417   : >> { %9276 = vst [vmem:[#allocation140_spill] sm:$0xff] %v7166_v24  ;;  %3217 = vrot.lane.b32.xlu0 %v2537_v25, %s4492_s16 }
 0x418   : >> { %2805 = vrot.lane.b32.xlu1 %v2542_v5, %s4490_s22 }
 0x419   : >> { %v7170_v44 = vpop.permute.xlu0 %2267 }
 0x41a   : >> { %v7174_v39 = vpop.permute.xlu1 %1980 }
 0x41b   : >> { %9278 = vst [vmem:[#allocation49_spill] sm:$0xff] %v7174_v39  ;;  %3321 = vrot.lane.b32.xlu0 %v2535_v37, %s4491_s7  ;;  %v2531_v39 = vadd.f32 %v2491_v33, %v9280_v8  ;;  %v9286_v8 = vld [vmem:[#allocation51_spill] sm:$0xff] }
 0x41c   : >> { %2809 = vrot.lane.b32.xlu1 %v2544_v26, %s4490_s22 }
 0x41d   : >> { %v7181_v28 = vpop.permute.xlu0 %1978 }
 0x41e   : >> { %v7185_v24 = vpop.permute.xlu1 %2269 }
 0x41f   : >> { %3325 = vrot.lane.b32.xlu0 %v2537_v25, %s4491_s7  ;;  %v9284_v25 = vld [vmem:[#allocation144_spill] sm:$0xff] }
 0x420   : >> { %3219 = vrot.lane.b32.xlu1 %v2544_v26, %s4492_s16  ;;  %v2492_v53 = vsel %vm571_vm3, %v1996_v3, %v9284_v25 }
 0x421   : >> { %v7190_v42 = vpop.permute.xlu0 %2279 }
 0x422   : >> { %v7192_v52 = vpop.permute.xlu1 %1984 }
 0x423   : >> { %9281 = vst [vmem:[#allocation95_spill] sm:$0xff] %v7192_v52  ;;  %2783 = vrot.lane.b32.xlu0 %v2531_v39, %s4490_s22  ;;  %v2538_v52 = vadd.f32 %v2492_v53, %v9286_v8 }
 0x424   : >> { %3335 = vrot.lane.b32.xlu1 %v2542_v5, %s4491_s7  ;;  %v9288_v5 = vld [vmem:[#allocation101_spill] sm:$0xff] }
 0x425   : >> { %v7199_v37 = vpop.permute.xlu0 %1982  ;;  %v2543_v3 = vadd.f32 %v2324_v19, %v9288_v5  ;;  %v2329_v5 = vsel %vm571_vm3, %v6938_v49, %v6964_v21 }
 0x426   : >> { %9282 = vst [vmem:[#allocation143_spill] sm:$0xff] %v7199_v37  ;;  %v7201_v48 = vpop.permute.xlu1 %2281  ;;  %v9294_v37 = vld [vmem:[#allocation105_spill] sm:$0xff] }
 0x427   : >> { %9283 = vst [vmem:[#allocation98_spill] sm:$0xff] %v7201_v48  ;;  %3152 = vrot.lane.b32.xlu0 %v2531_v39, %s4493_s17  ;;  %v9296_v48 = vld [vmem:[#allocation153_spill] sm:$0xff] }
 0x428   : >> { %3339 = vrot.lane.b32.xlu1 %v2544_v26, %s4491_s7 }
 0x429   : >> { %v7207_v33 = vpop.permute.xlu0 %2291 }
 0x42a   : >> { %9285 = vst [vmem:[#allocation99_spill] sm:$0xff] %v7207_v33  ;;  %v7213_v12 = vpop.permute.xlu1 %1988 }
 0x42b   : >> { %9287 = vst [vmem:[#allocation102_spill] sm:$0xff] %v7213_v12  ;;  %3313 = vrot.lane.b32.xlu0 %v2531_v39, %s4491_s7  ;;  %v2328_v39 = vsel %vm571_vm3, %v9291_v22, %v6938_v49  ;;  %v2333_v49 = vsel %vm571_vm3, %v9296_v48, %v6979_v11  ;;  %v3490_v48 = vsel %vm3481_vm9, %v6537_v60, %v6532_v57 }
 0x42c   : >> { %2797 = vrot.lane.b32.xlu1 %v2538_v52, %s4490_s22 }
 0x42d   : >> { %v7218_v25 = vpop.permute.xlu0 %1986 }
 0x42e   : >> { %9289 = vst [vmem:[#allocation145_spill] sm:$0xff] %v7218_v25  ;;  %v7220_v26 = vpop.permute.xlu1 %2293 }
 0x42f   : >> { %9290 = vst [vmem:[#allocation100_spill] sm:$0xff] %v7220_v26  ;;  %2807 = vrot.lane.b32.xlu0 %v2543_v3, %s4490_s22  ;;  %v7241_v26 = vadd.f32 %v2328_v39, %v9293_v27  ;;  %v9301_v27 = vld [vmem:[#allocation146_spill] sm:$0xff] }
 0x430   : >> { %3154 = vrot.lane.b32.xlu1 %v2538_v52, %s4493_s17 }
 0x431   : >> { %v2736_v53 = vpop.permute.xlu0 %2735 }
 0x432   : >> { %v2955_v8 = vsel %vm2951_vm5, %v6473_v20, %v2736_v53  ;;  %v2738_v19 = vpop.permute.xlu1 %2737  ;;  %v7244_v20 = vadd.f32 %v2329_v5, %v9294_v37 }
 0x433   : >> { %v3723_v12 = vsel %vm4824_vm4, %v2955_v8, %v3484_v62  ;;  %3337 = vrot.lane.b32.xlu0 %v2543_v3, %s4491_s7  ;;  %v9299_v62 = vld [vmem:[#allocation106_spill] sm:$0xff]  ;;  %v1997_v8 = vsel %vm442_vm2, %v6946_v4, %v6951_v34 }
 0x434   : >> { %3838 = vst [vmem:[%s6484_s14 + $0x18] sm:$0xff] %v3723_v12  ;;  %3327 = vrot.lane.b32.xlu1 %v2538_v52, %s4491_s7  ;;  %9295 = vst [vmem:[#allocation103_spill] sm:$0xff] %v7244_v20  ;;  %v9297_v52 = vld [vmem:[#allocation108_spill] sm:$0xff]  ;;  %v7258_v39 = vadd.f32 %v2333_v49, %v9299_v62  ;;  %v2493_v49 = vsel %vm571_vm3, %v1997_v8, %v9301_v27  ;;  %v1998_v8 = vsel %vm442_vm2, %v6986_v61, %v6982_v16  ;;  %v9307_v61 = vld [vmem:[#allocation53_spill] sm:$0xff] }
 0x435   : >> { %v2740_v22 = vpop.permute.xlu0 %2739  ;;  %v7255_v12 = vadd.f32 %v6964_v21, %v9297_v52  ;;  %v9302_v52 = vld [vmem:[#allocation109_spill] sm:$0xff]  ;;  %v9306_v27 = vld [vmem:[#allocation152_spill] sm:$0xff] }
 0x436   : >> { %v3268_v33 = vpop.permute.xlu1 %3267  ;;  %9300 = vst [vmem:[#allocation50_spill] sm:$0xff] %v7258_v39  ;;  %v7282_v34 = vadd.f32 %v6990_v63, %v9302_v52  ;;  %v2494_v52 = vsel %vm571_vm3, %v1998_v8, %v9306_v27 }
 0x437   : >> { %2819 = vrot.lane.b32.xlu0 %v7241_v26, %s4490_s22  ;;  %9298 = vst [vmem:[#allocation142_spill] sm:$0xff] %v7255_v12 }
 0x438   : >> { %2821 = vrot.lane.b32.xlu1 %v7244_v20, %s4490_s22  ;;  %9303 = vst [vmem:[#allocation144_spill] sm:$0xff] %v7282_v34 }
 0x439   : >> { %v3210_v3 = vpop.permute.xlu0 %3209 }
 0x43a   : >> { %v7260_v37 = vpop.permute.xlu1 %2749 }
 0x43b   : >> { %v2961_v21 = vsel %vm2951_vm5, %v6501_v45, %v7260_v37  ;;  %2823 = vrot.lane.b32.xlu0 %v7255_v12, %s4490_s22  ;;  %v2956_v45 = vsel %vm2951_vm5, %v2736_v53, %v2738_v19 }
 0x43c   : >> { %v3730_v5 = vsel %vm4824_vm4, %v2961_v21, %v3490_v48  ;;  %2833 = vrot.lane.b32.xlu1 %v7258_v39, %s4490_s22  ;;  %v9305_v21 = vld [vmem:[#allocation52_spill] sm:$0xff] }
 0x43d   : >> { %3846 = vst [vmem:[%s6484_s14 + $0x50] sm:$0xff] %v3730_v5  ;;  %v3266_v60 = vpop.permute.xlu0 %3265  ;;  %v7298_v53 = vadd.f32 %v2493_v49, %v9305_v21  ;;  %v2334_v49 = vsel %vm571_vm3, %v6979_v11, %v6990_v63  ;;  %v2957_v21 = vsel %vm2951_vm5, %v2738_v19, %v2740_v22  ;;  %v2338_v63 = vsel %vm571_vm3, %v6261_v13, %v7006_v32  ;;  %v9311_v13 = vld [vmem:[#allocation179_spill] sm:$0xff] }
 0x43e   : >> { %v3485_v4 = vsel %vm3481_vm9, %v6506_v50, %v3266_v60  ;;  %v2754_v62 = vpop.permute.xlu1 %2753  ;;  %v3486_v11 = vsel %vm3481_vm9, %v3266_v60, %v3268_v33  ;;  %v9312_v60 = vld [vmem:[#allocation110_spill] sm:$0xff] }
 0x43f   : >> { %v3724_v48 = vsel %vm4828_vm6, %v2956_v45, %v3485_v4  ;;  %3221 = vrot.lane.b32.xlu0 %v7255_v12, %s4492_s16  ;;  %v7309_v45 = vadd.f32 %v2494_v52, %v9307_v61 }
 0x440   : >> { %3839 = vst [vmem:[%s6484_s14 + $0x20] sm:$0xff] %v3724_v48  ;;  %2837 = vrot.lane.b32.xlu1 %v7282_v34, %s4490_s22  ;;  %v9308_v48 = vld [vmem:[#allocation107_spill] sm:$0xff] }
 0x441   : >> { %v3270_v5 = vpop.permute.xlu0 %3269  ;;  %v7319_v8 = vadd.f32 %v2334_v49, %v9308_v48  ;;  %v2339_v49 = vsel %vm571_vm3, %v7006_v32, %v7029_v7  ;;  %v7346_v32 = vadd.f32 %v2338_v63, %v9312_v60  ;;  %v9313_v48 = vld [vmem:[#allocation111_spill] sm:$0xff] }
 0x442   : >> { %v7300_v50 = vpop.permute.xlu1 %3211  ;;  %v3487_v27 = vsel %vm3481_vm9, %v3268_v33, %v3270_v5  ;;  %v2953_v33 = vsel %vm2951_vm5, %v9311_v13, %v6445_v23  ;;  %v2343_v23 = vsel %vm571_vm3, %v6289_v58, %v7040_v2 }
 0x443   : >> { %2811 = vrot.lane.b32.xlu0 %v7298_v53, %s4490_s22 }
 0x444   : >> { %3223 = vrot.lane.b32.xlu1 %v7282_v34, %s4492_s16 }
 0x445   : >> { %v2728_v16 = vpop.permute.xlu0 %2727 }
 0x446   : >> { %v3280_v4 = vpop.permute.xlu1 %3279 }
 0x447   : >> { %3156 = vrot.lane.b32.xlu0 %v7298_v53, %s4493_s17 }
 0x448   : >> { %2825 = vrot.lane.b32.xlu1 %v7309_v45, %s4490_s22 }
 0x449   : >> { %v3145_v52 = vpop.permute.xlu0 %3144 }
 0x44a   : >> { %v3193_v61 = vsel %vm3192_vm15, %v2957_v21, %v3145_v52  ;;  %v3726_v39 = vsel %vm4836_vm8, %v3145_v52, %v3487_v27  ;;  %v3284_v12 = vpop.permute.xlu1 %3283  ;;  %v7349_v21 = vadd.f32 %v2339_v49, %v9313_v48 }
 0x44b   : >> { %v3725_v22 = vsel %vm4832_vm7, %v3193_v61, %v3486_v11  ;;  %3842 = vst.msk [vmem:[%s6484_s14 + $0x30] sm:$0xff] %vm3841_vm13, %v3726_v39  ;;  %2835 = vrot.lane.b32.xlu0 %v7319_v8, %s4490_s22  ;;  %v2952_v39 = vsel %vm2951_vm5, %v2728_v16, %v9311_v13  ;;  %v1999_v16 = vsel %vm442_vm2, %v7015_v1, %v7017_v46  ;;  %v9317_v13 = vld [vmem:[#allocation112_spill] sm:$0xff]  ;;  %v9318_v1 = vld [vmem:[#allocation183_spill] sm:$0xff]  ;;  %v9319_v46 = vld [vmem:[#allocation154_spill] sm:$0xff] }
 0x44c   : >> { %3840 = vst [vmem:[%s6484_s14 + $0x28] sm:$0xff] %v3725_v22  ;;  %3158 = vrot.lane.b32.xlu1 %v7309_v45, %s4493_s17  ;;  %v7377_v60 = vadd.f32 %v2343_v23, %v9317_v13  ;;  %v9321_v13 = vld [vmem:[#allocation184_spill] sm:$0xff] }
 0x44d   : >> { %v3258_v5 = vpop.permute.xlu0 %3257 }
 0x44e   : >> { %v3482_v27 = vsel %vm3481_vm9, %v3258_v5, %v6486_v6  ;;  %v3690_v52 = vsel %vm3481_vm9, %v3210_v3, %v3258_v5  ;;  %v2742_v11 = vpop.permute.xlu1 %2741  ;;  %v9316_v6 = vld [vmem:[#allocation114_spill] sm:$0xff] }
 0x44f   : >> { %v3720_v63 = vsel %vm4812_vm10, %v2952_v39, %v3690_v52  ;;  %v3721_v49 = vsel %vm4816_vm11, %v2953_v33, %v3482_v27  ;;  %2847 = vrot.lane.b32.xlu0 %v7346_v32, %s4490_s22  ;;  %v7371_v3 = vadd.f32 %v7029_v7, %v9316_v6  ;;  %v3491_v33 = vsel %vm3481_vm9, %v6532_v57, %v3280_v4 }
 0x450   : >> { %3835 = vst [vmem:[%s6484_s14] sm:$0xff] %v3720_v63  ;;  %3836 = vst [vmem:[%s6484_s14 + $0x8] sm:$0xff] %v3721_v49  ;;  %2849 = vrot.lane.b32.xlu1 %v7349_v21, %s4490_s22  ;;  %v2959_v57 = vsel %vm2951_vm5, %v9318_v1, %v6523_v43  ;;  %v2958_v23 = vsel %vm2951_vm5, %v2742_v11, %v9318_v1  ;;  %v9323_v1 = vld [vmem:[#allocation155_spill] sm:$0xff] }
 0x451   : >> { %v2752_v58 = vpop.permute.xlu0 %2751 }
 0x452   : >> { %v2962_v5 = vsel %vm2951_vm5, %v7260_v37, %v2752_v58  ;;  %v3147_v48 = vpop.permute.xlu1 %3146  ;;  %v2963_v39 = vsel %vm2951_vm5, %v2752_v58, %v2754_v62  ;;  %v2495_v37 = vsel %vm571_vm3, %v1999_v16, %v9319_v46  ;;  %v9320_v62 = vld [vmem:[#allocation115_spill] sm:$0xff] }
 0x453   : >> { %v3731_v7 = vsel %vm4828_vm6, %v2962_v5, %v3491_v33  ;;  %2851 = vrot.lane.b32.xlu0 %v7371_v3, %s4490_s22  ;;  %v7398_v27 = vadd.f32 %v7056_v15, %v9320_v62  ;;  %v3194_v63 = vsel %vm3192_vm15, %v2963_v39, %v3147_v48  ;;  %v9324_v62 = vld [vmem:[#allocation56_spill] sm:$0xff] }
 0x454   : >> { %3847 = vst [vmem:[%s6484_s14 + $0x58] sm:$0xff] %v3731_v7  ;;  %2861 = vrot.lane.b32.xlu1 %v7377_v60, %s4490_s22 }
 0x455   : >> { %v3282_v52 = vpop.permute.xlu0 %3281 }
 0x456   : >> { %v3492_v49 = vsel %vm3481_vm9, %v3280_v4, %v3282_v52  ;;  %v3493_v43 = vsel %vm3481_vm9, %v3282_v52, %v3284_v12  ;;  %v3272_v6 = vpop.permute.xlu1 %3271  ;;  %v2000_v12 = vsel %vm442_vm2, %v7053_v56, %v7045_v17  ;;  %v3496_v17 = vsel %vm3481_vm9, %v6566_v40, %v6605_v10 }
 0x457   : >> { %v3732_v58 = vsel %vm4832_vm7, %v3194_v63, %v3492_v49  ;;  %v3733_v16 = vsel %vm4836_vm8, %v3147_v48, %v3493_v43  ;;  %v3488_v33 = vsel %vm3481_vm9, %v3272_v6, %v9321_v13  ;;  %v3691_v11 = vsel %vm3481_vm9, %v7300_v50, %v3272_v6  ;;  %3225 = vrot.lane.b32.xlu0 %v7371_v3, %s4492_s16  ;;  %v9322_v50 = vld [vmem:[#allocation54_spill] sm:$0xff] }
 0x458   : >> { %3848 = vst [vmem:[%s6484_s14 + $0x60] sm:$0xff] %v3732_v58  ;;  %3849 = vst.msk [vmem:[%s6484_s14 + $0x68] sm:$0xff] %vm3841_vm13, %v3733_v16  ;;  %v3727_v4 = vsel %vm4812_vm10, %v2958_v23, %v3691_v11  ;;  %v3728_v5 = vsel %vm4816_vm11, %v2959_v57, %v3488_v33  ;;  %2865 = vrot.lane.b32.xlu1 %v7398_v27, %s4490_s22  ;;  %v7428_v48 = vadd.f32 %v2495_v37, %v9322_v50  ;;  %v9325_v23 = vld [vmem:[#allocation113_spill] sm:$0xff]  ;;  %v9326_v16 = vld [vmem:[#allocation116_spill] sm:$0xff] }
 0x459   : >> { %3843 = vst [vmem:[%s6484_s14 + $0x38] sm:$0xff] %v3727_v4  ;;  %3844 = vst [vmem:[%s6484_s14 + $0x40] sm:$0xff] %v3728_v5  ;;  %v2764_v39 = vpop.permute.xlu0 %2763  ;;  %v2496_v57 = vsel %vm571_vm3, %v2000_v12, %v9323_v1  ;;  %v2348_v43 = vsel %vm571_vm3, %v6313_v59, %v7071_v9  ;;  %v9327_v33 = vld [vmem:[#allocation117_spill] sm:$0xff]  ;;  %v2353_v4 = vsel %vm571_vm3, %v6334_v0, %v7107_v31  ;;  %v9328_v50 = vld [vmem:[#allocation120_spill] sm:$0xff] }
 0x45a   : >> { %v2967_v56 = vsel %vm2951_vm5, %v6571_v29, %v2764_v39  ;;  %v2766_v7 = vpop.permute.xlu1 %2765  ;;  %v7447_v40 = vadd.f32 %v2496_v57, %v9324_v62  ;;  %v2344_v29 = vsel %vm571_vm3, %v7040_v2, %v7056_v15  ;;  %v3502_v15 = vsel %vm3481_vm9, %v6658_v36, %v6653_v51  ;;  %v9331_v62 = vld [vmem:[#allocation121_spill] sm:$0xff] }
 0x45b   : >> { %v3737_v46 = vsel %vm4824_vm4, %v2967_v56, %v3496_v17  ;;  %2839 = vrot.lane.b32.xlu0 %v7428_v48, %s4490_s22  ;;  %v7457_v63 = vadd.f32 %v2344_v29, %v9325_v23  ;;  %v2349_v2 = vsel %vm571_vm3, %v7071_v9, %v7093_v55  ;;  %v7480_v36 = vadd.f32 %v2348_v43, %v9326_v16  ;;  %v9329_v17 = vld [vmem:[#allocation118_spill] sm:$0xff] }
 0x45c   : >> { %3853 = vst [vmem:[%s6484_s14 + $0x88] sm:$0xff] %v3737_v46  ;;  %3227 = vrot.lane.b32.xlu1 %v7398_v27, %s4492_s16  ;;  %v7484_v9 = vadd.f32 %v2349_v2, %v9327_v33  ;;  %v2968_v11 = vsel %vm2951_vm5, %v2764_v39, %v2766_v7  ;;  %v7501_v39 = vadd.f32 %v7093_v55, %v9328_v50  ;;  %v9330_v46 = vld [vmem:[#allocation160_spill] sm:$0xff] }
 0x45d   : >> { %v2768_v37 = vpop.permute.xlu0 %2767  ;;  %v7504_v56 = vadd.f32 %v2353_v4, %v9329_v17  ;;  %v2001_v0 = vsel %vm442_vm2, %v7078_v47, %v7082_v54  ;;  %v7519_v29 = vadd.f32 %v7121_v41, %v9331_v62  ;;  %v2002_v47 = vsel %vm442_vm2, %v7115_v38, %v7109_v18  ;;  %v9332_v54 = vld [vmem:[#allocation62_spill] sm:$0xff]  ;;  %v9337_v17 = vld [vmem:[#allocation187_spill] sm:$0xff] }
 0x45e   : >> { %v3296_v52 = vpop.permute.xlu1 %3295  ;;  %v2497_v55 = vsel %vm571_vm3, %v2001_v0, %v9330_v46  ;;  %v9333_v18 = vld [vmem:[#allocation162_spill] sm:$0xff] }
 0x45f   : >> { %3160 = vrot.lane.b32.xlu0 %v7428_v48, %s4493_s17  ;;  %v7529_v43 = vadd.f32 %v2497_v55, %v9332_v54  ;;  %v2498_v38 = vsel %vm571_vm3, %v2002_v47, %v9333_v18  ;;  %v9339_v47 = vld [vmem:[#allocation164_spill] sm:$0xff] }
 0x460   : >> { %2853 = vrot.lane.b32.xlu1 %v7447_v40, %s4490_s22  ;;  %v2358_v54 = vsel %vm571_vm3, %v9339_v47, %v7132_v30  ;;  %v9341_v18 = vld [vmem:[#allocation188_spill] sm:$0xff] }
 0x461   : >> { %v3214_v49 = vpop.permute.xlu0 %3213  ;;  %v9347_v47 = vld [vmem:[#allocation192_spill] sm:$0xff] }
 0x462   : >> { %v7462_v6 = vpop.permute.xlu1 %2777 }
 0x463   : >> { %v2973_v58 = vsel %vm2951_vm5, %v6628_v35, %v7462_v6  ;;  %2863 = vrot.lane.b32.xlu0 %v7457_v63, %s4490_s22 }
 0x464   : >> { %v3744_v59 = vsel %vm4824_vm4, %v2973_v58, %v3502_v15  ;;  %3162 = vrot.lane.b32.xlu1 %v7447_v40, %s4493_s17  ;;  %v2969_v15 = vsel %vm2951_vm5, %v2766_v7, %v2768_v37  ;;  %v9334_v7 = vld [vmem:[#allocation185_spill] sm:$0xff]  ;;  %v9335_v37 = vld [vmem:[#allocation186_spill] sm:$0xff] }
 0x465   : >> { %3860 = vst [vmem:[%s6484_s14 + $0xc0] sm:$0xff] %v3744_v59  ;;  %v3294_v13 = vpop.permute.xlu0 %3293 }
 0x466   : >> { %v3497_v35 = vsel %vm3481_vm9, %v6605_v10, %v3294_v13  ;;  %v2782_v12 = vpop.permute.xlu1 %2781  ;;  %v3498_v59 = vsel %vm3481_vm9, %v3294_v13, %v3296_v52  ;;  %v2354_v13 = vsel %vm571_vm3, %v7107_v31, %v7121_v41  ;;  %v9338_v41 = vld [vmem:[#allocation119_spill] sm:$0xff] }
 0x467   : >> { %v3738_v5 = vsel %vm4828_vm6, %v2968_v11, %v3497_v35  ;;  %2875 = vrot.lane.b32.xlu0 %v7480_v36, %s4490_s22 }
 0x468   : >> { %3854 = vst [vmem:[%s6484_s14 + $0x90] sm:$0xff] %v3738_v5  ;;  %2877 = vrot.lane.b32.xlu1 %v7484_v9, %s4490_s22  ;;  %v9336_v5 = vld [vmem:[#allocation64_spill] sm:$0xff] }
 0x469   : >> { %v3298_v10 = vpop.permute.xlu0 %3297  ;;  %v7555_v50 = vadd.f32 %v2498_v38, %v9336_v5  ;;  %v9342_v38 = vld [vmem:[#allocation122_spill] sm:$0xff] }
 0x46a   : >> { %v7506_v1 = vpop.permute.xlu1 %3215  ;;  %v3499_v2 = vsel %vm3481_vm9, %v3296_v52, %v3298_v10  ;;  %v2965_v52 = vsel %vm2951_vm5, %v9335_v37, %v9334_v7  ;;  %v9344_v7 = vld [vmem:[#allocation169_spill] sm:$0xff] }
 0x46b   : >> { %2879 = vrot.lane.b32.xlu0 %v7501_v39, %s4490_s22 }
 0x46c   : >> { %2889 = vrot.lane.b32.xlu1 %v7504_v56, %s4490_s22 }
 0x46d   : >> { %v2756_v57 = vpop.permute.xlu0 %2755 }
 0x46e   : >> { %v3308_v23 = vpop.permute.xlu1 %3307  ;;  %v2964_v10 = vsel %vm2951_vm5, %v2756_v57, %v9335_v37  ;;  %v7573_v57 = vadd.f32 %v2354_v13, %v9338_v41  ;;  %v2363_v37 = vsel %vm571_vm3, %v9344_v7, %v7170_v44  ;;  %v9346_v41 = vld [vmem:[#allocation127_spill] sm:$0xff] }
 0x46f   : >> { %3229 = vrot.lane.b32.xlu0 %v7501_v39, %s4492_s16 }
 0x470   : >> { %2893 = vrot.lane.b32.xlu1 %v7519_v29, %s4490_s22 }
 0x471   : >> { %v3149_v58 = vpop.permute.xlu0 %3148 }
 0x472   : >> { %v3195_v16 = vsel %vm3192_vm15, %v2969_v15, %v3149_v58  ;;  %v3740_v33 = vsel %vm4836_vm8, %v3149_v58, %v3499_v2  ;;  %v3312_v11 = vpop.permute.xlu1 %3311  ;;  %v2359_v15 = vsel %vm571_vm3, %v7132_v30, %v7156_v14  ;;  %v3503_v2 = vsel %vm3481_vm9, %v6653_v51, %v3308_v23  ;;  %v9340_v30 = vld [vmem:[#allocation190_spill] sm:$0xff] }
 0x473   : >> { %v3739_v35 = vsel %vm4832_vm7, %v3195_v16, %v3498_v59  ;;  %3856 = vst.msk [vmem:[%s6484_s14 + $0xa0] sm:$0xff] %vm3841_vm13, %v3740_v33  ;;  %2867 = vrot.lane.b32.xlu0 %v7529_v43, %s4490_s22  ;;  %v2971_v51 = vsel %vm2951_vm5, %v9341_v18, %v9340_v30  ;;  %v9351_v30 = vld [vmem:[#allocation97_spill] sm:$0xff] }
 0x474   : >> { %3855 = vst [vmem:[%s6484_s14 + $0x98] sm:$0xff] %v3739_v35  ;;  %3231 = vrot.lane.b32.xlu1 %v7519_v29, %s4492_s16 }
 0x475   : >> { %v3286_v4 = vpop.permute.xlu0 %3285 }
 0x476   : >> { %v3494_v0 = vsel %vm3481_vm9, %v3286_v4, %v9337_v17  ;;  %v3692_v46 = vsel %vm3481_vm9, %v3214_v49, %v3286_v4  ;;  %v2770_v55 = vpop.permute.xlu1 %2769 }
 0x477   : >> { %v3734_v62 = vsel %vm4812_vm10, %v2964_v10, %v3692_v46  ;;  %v3735_v31 = vsel %vm4816_vm11, %v2965_v52, %v3494_v0  ;;  %3164 = vrot.lane.b32.xlu0 %v7529_v43, %s4493_s17  ;;  %v2970_v13 = vsel %vm2951_vm5, %v2770_v55, %v9341_v18  ;;  %v9352_v18 = vld [vmem:[#allocation94_spill] sm:$0xff] }
 0x478   : >> { %3850 = vst [vmem:[%s6484_s14 + $0x70] sm:$0xff] %v3734_v62  ;;  %3851 = vst [vmem:[%s6484_s14 + $0x78] sm:$0xff] %v3735_v31  ;;  %2881 = vrot.lane.b32.xlu1 %v7555_v50, %s4490_s22  ;;  %v9345_v62 = vld [vmem:[#allocation189_spill] sm:$0xff] }
 0x479   : >> { %v2780_v49 = vpop.permute.xlu0 %2779 }
 0x47a   : >> { %v2974_v58 = vsel %vm2951_vm5, %v7462_v6, %v2780_v49  ;;  %v3151_v59 = vpop.permute.xlu1 %3150  ;;  %v2975_v16 = vsel %vm2951_vm5, %v2780_v49, %v2782_v12  ;;  %v7597_v6 = vadd.f32 %v2358_v54, %v9342_v38  ;;  %v9343_v12 = vld [vmem:[#allocation123_spill] sm:$0xff]  ;;  %v7631_v49 = vadd.f32 %v7156_v14, %v9346_v41 }
 0x47b   : >> { %v3745_v33 = vsel %vm4828_vm6, %v2974_v58, %v3503_v2  ;;  %2891 = vrot.lane.b32.xlu0 %v7573_v57, %s4490_s22  ;;  %v7600_v35 = vadd.f32 %v2359_v15, %v9343_v12  ;;  %v3196_v4 = vsel %vm3192_vm15, %v2975_v16, %v3151_v59  ;;  %v9348_v54 = vld [vmem:[#allocation147_spill] sm:$0xff]  ;;  %v9349_v2 = vld [vmem:[#allocation124_spill] sm:$0xff] }
 0x47c   : >> { %3861 = vst [vmem:[%s6484_s14 + $0xc8] sm:$0xff] %v3745_v33  ;;  %3166 = vrot.lane.b32.xlu1 %v7555_v50, %s4493_s17  ;;  %v3508_v15 = vsel %vm3481_vm9, %v9348_v54, %v9347_v47  ;;  %v7639_v58 = vadd.f32 %v2363_v37, %v9349_v2  ;;  %v9353_v12 = vld [vmem:[#allocation163_spill] sm:$0xff]  ;;  %v9354_v37 = vld [vmem:[#allocation128_spill] sm:$0xff] }
 0x47d   : >> { %v3310_v52 = vpop.permute.xlu0 %3309  ;;  %v9360_v41 = vld [vmem:[#allocation159_spill] sm:$0xff]  ;;  %v9361_v2 = vld [vmem:[#allocation72_spill] sm:$0xff] }
 0x47e   : >> { %v3504_v5 = vsel %vm3481_vm9, %v3308_v23, %v3310_v52  ;;  %v3505_v10 = vsel %vm3481_vm9, %v3310_v52, %v3312_v11  ;;  %v3300_v17 = vpop.permute.xlu1 %3299  ;;  %v7657_v52 = vadd.f32 %v7185_v24, %v9354_v37  ;;  %v9364_v37 = vld [vmem:[#allocation98_spill] sm:$0xff] }
 0x47f   : >> { %v3746_v0 = vsel %vm4832_vm7, %v3196_v4, %v3504_v5  ;;  %v3747_v46 = vsel %vm4836_vm8, %v3151_v59, %v3505_v10  ;;  %v3500_v31 = vsel %vm3481_vm9, %v3300_v17, %v9345_v62  ;;  %v3693_v55 = vsel %vm3481_vm9, %v7506_v1, %v3300_v17  ;;  %2903 = vrot.lane.b32.xlu0 %v7597_v6, %s4490_s22  ;;  %v9350_v59 = vld [vmem:[#allocation150_spill] sm:$0xff]  ;;  %v9355_v4 = vld [vmem:[#allocation49_spill] sm:$0xff]  ;;  %v9357_v62 = vld [vmem:[#allocation195_spill] sm:$0xff] }
 0x480   : >> { %3862 = vst [vmem:[%s6484_s14 + $0xd0] sm:$0xff] %v3746_v0  ;;  %3863 = vst.msk [vmem:[%s6484_s14 + $0xd8] sm:$0xff] %vm3841_vm13, %v3747_v46  ;;  %v3741_v23 = vsel %vm4812_vm10, %v2970_v13, %v3693_v55  ;;  %v3742_v11 = vsel %vm4816_vm11, %v2971_v51, %v3500_v31  ;;  %2905 = vrot.lane.b32.xlu1 %v7600_v35, %s4490_s22  ;;  %v2003_v51 = vsel %vm442_vm2, %v9352_v18, %v9351_v30  ;;  %v9356_v10 = vld [vmem:[#allocation70_spill] sm:$0xff]  ;;  %v9358_v31 = vld [vmem:[#allocation196_spill] sm:$0xff] }
 0x481   : >> { %3857 = vst [vmem:[%s6484_s14 + $0xa8] sm:$0xff] %v3741_v23  ;;  %3858 = vst [vmem:[%s6484_s14 + $0xb0] sm:$0xff] %v3742_v11  ;;  %v2792_v1 = vpop.permute.xlu0 %2791  ;;  %v2499_v7 = vsel %vm571_vm3, %v2003_v51, %v9353_v12  ;;  %v2004_v5 = vsel %vm442_vm2, %v7181_v28, %v9355_v4  ;;  %v3514_v55 = vsel %vm3481_vm9, %v9358_v31, %v9357_v62  ;;  %v9359_v23 = vld [vmem:[#allocation166_spill] sm:$0xff] }
 0x482   : >> { %v2979_v16 = vsel %vm2951_vm5, %v9350_v59, %v2792_v1  ;;  %v2794_v33 = vpop.permute.xlu1 %2793  ;;  %v7667_v17 = vadd.f32 %v2499_v7, %v9356_v10  ;;  %v2500_v11 = vsel %vm571_vm3, %v2004_v5, %v9359_v23  ;;  %v9362_v12 = vld [vmem:[#allocation126_spill] sm:$0xff]  ;;  %v2369_v4 = vsel %vm571_vm3, %v7190_v42, %v9364_v37 }
 0x483   : >> { %v3751_v14 = vsel %vm4824_vm4, %v2979_v16, %v3508_v15  ;;  %2907 = vrot.lane.b32.xlu0 %v7631_v49, %s4490_s22  ;;  %v7687_v59 = vadd.f32 %v2500_v11, %v9361_v2  ;;  %v2364_v16 = vsel %vm571_vm3, %v7170_v44, %v7185_v24  ;;  %v2980_v30 = vsel %vm2951_vm5, %v2792_v1, %v2794_v33  ;;  %v9363_v44 = vld [vmem:[#allocation174_spill] sm:$0xff]  ;;  %v9370_v2 = vld [vmem:[#allocation143_spill] sm:$0xff] }
 0x484   : >> { %3867 = vst [vmem:[%s6484_s14 + $0xf8] sm:$0xff] %v3751_v14  ;;  %2917 = vrot.lane.b32.xlu1 %v7639_v58, %s4490_s22  ;;  %v7703_v7 = vadd.f32 %v2364_v16, %v9362_v12  ;;  %v2368_v1 = vsel %vm571_vm3, %v9363_v44, %v7190_v42  ;;  %v9365_v5 = vld [vmem:[#allocation130_spill] sm:$0xff]  ;;  %v9369_v42 = vld [vmem:[#allocation95_spill] sm:$0xff] }
 0x485   : >> { %v2796_v38 = vpop.permute.xlu0 %2795  ;;  %v7718_v10 = vadd.f32 %v2368_v1, %v9365_v5  ;;  %v2005_v16 = vsel %vm442_vm2, %v9370_v2, %v9369_v42  ;;  %v9372_v1 = vld [vmem:[#allocation132_spill] sm:$0xff] }
 0x486   : >> { %v3324_v13 = vpop.permute.xlu1 %3323  ;;  %v9376_v2 = vld [vmem:[#allocation136_spill] sm:$0xff] }
 0x487   : >> { %3233 = vrot.lane.b32.xlu0 %v7631_v49, %s4492_s16 }
 0x488   : >> { %2921 = vrot.lane.b32.xlu1 %v7657_v52, %s4490_s22 }
 0x489   : >> { %v3218_v0 = vpop.permute.xlu0 %3217 }
 0x48a   : >> { %v7669_v46 = vpop.permute.xlu1 %2805 }
 0x48b   : >> { %v2985_v28 = vsel %vm2951_vm5, %v9360_v41, %v7669_v46  ;;  %2895 = vrot.lane.b32.xlu0 %v7667_v17, %s4490_s22  ;;  %v9367_v41 = vld [vmem:[#allocation99_spill] sm:$0xff] }
 0x48c   : >> { %v3758_v54 = vsel %vm4824_vm4, %v2985_v28, %v3514_v55  ;;  %3235 = vrot.lane.b32.xlu1 %v7657_v52, %s4492_s16  ;;  %v9366_v55 = vld [vmem:[#allocation131_spill] sm:$0xff]  ;;  %v9368_v28 = vld [vmem:[#allocation177_spill] sm:$0xff] }
 0x48d   : >> { %3874 = vst [vmem:[%s6484_s14 + $0x130] sm:$0xff] %v3758_v54  ;;  %v3322_v15 = vpop.permute.xlu0 %3321  ;;  %v7721_v23 = vadd.f32 %v2369_v4, %v9366_v55  ;;  %v2373_v54 = vsel %vm571_vm3, %v9368_v28, %v9367_v41 }
 0x48e   : >> { %v3509_v18 = vsel %vm3481_vm9, %v9347_v47, %v3322_v15  ;;  %v2810_v51 = vpop.permute.xlu1 %2809  ;;  %v7740_v4 = vadd.f32 %v2373_v54, %v9372_v1  ;;  %v3510_v5 = vsel %vm3481_vm9, %v3322_v15, %v3324_v13  ;;  %v9375_v15 = vld [vmem:[#allocation171_spill] sm:$0xff] }
 0x48f   : >> { %v3752_v14 = vsel %vm4828_vm6, %v2980_v30, %v3509_v18  ;;  %3168 = vrot.lane.b32.xlu0 %v7667_v17, %s4493_s17  ;;  %v9371_v30 = vld [vmem:[#allocation135_spill] sm:$0xff] }
 0x490   : >> { %3868 = vst [vmem:[%s6484_s14 + $0x100] sm:$0xff] %v3752_v14  ;;  %2909 = vrot.lane.b32.xlu1 %v7687_v59, %s4490_s22  ;;  %v7735_v18 = vadd.f32 %v9364_v37, %v9371_v30  ;;  %v2981_v14 = vsel %vm2951_vm5, %v2794_v33, %v2796_v38  ;;  %v9373_v33 = vld [vmem:[#allocation68_spill] sm:$0xff]  ;;  %v9374_v38 = vld [vmem:[#allocation191_spill] sm:$0xff] }
 0x491   : >> { %v3326_v24 = vpop.permute.xlu0 %3325  ;;  %v9377_v30 = vld [vmem:[#allocation100_spill] sm:$0xff] }
 0x492   : >> { %v7708_v47 = vpop.permute.xlu1 %3219  ;;  %v3511_v12 = vsel %vm3481_vm9, %v3324_v13, %v3326_v24  ;;  %v2977_v13 = vsel %vm2951_vm5, %v9374_v38, %v9373_v33  ;;  %v2501_v24 = vsel %vm571_vm3, %v2005_v16, %v9375_v15 }
 0x493   : >> { %2919 = vrot.lane.b32.xlu0 %v7703_v7, %s4490_s22 }
 0x494   : >> { %3170 = vrot.lane.b32.xlu1 %v7687_v59, %s4493_s17 }
 0x495   : >> { %v2784_v31 = vpop.permute.xlu0 %2783 }
 0x496   : >> { %v3336_v11 = vpop.permute.xlu1 %3335 }
 0x497   : >> { %2931 = vrot.lane.b32.xlu0 %v7718_v10, %s4490_s22 }
 0x498   : >> { %2933 = vrot.lane.b32.xlu1 %v7721_v23, %s4490_s22 }
 0x499   : >> { %v3153_v44 = vpop.permute.xlu0 %3152 }
 0x49a   : >> { %v3197_v55 = vsel %vm3192_vm15, %v2981_v14, %v3153_v44  ;;  %v3754_v28 = vsel %vm4836_vm8, %v3153_v44, %v3511_v12  ;;  %v3340_v42 = vpop.permute.xlu1 %3339  ;;  %v7762_v14 = vadd.f32 %v9377_v30, %v9376_v2  ;;  %v2976_v12 = vsel %vm2951_vm5, %v2784_v31, %v9374_v38  ;;  %v9378_v44 = vld [vmem:[#allocation71_spill] sm:$0xff] }
 0x49b   : >> { %v3753_v37 = vsel %vm4832_vm7, %v3197_v55, %v3510_v5  ;;  %3870 = vst.msk [vmem:[%s6484_s14 + $0x110] sm:$0xff] %vm3841_vm13, %v3754_v28  ;;  %2935 = vrot.lane.b32.xlu0 %v7735_v18, %s4490_s22  ;;  %v9379_v28 = vld [vmem:[#allocation102_spill] sm:$0xff] }
 0x49c   : >> { %3869 = vst [vmem:[%s6484_s14 + $0x108] sm:$0xff] %v3753_v37  ;;  %2945 = vrot.lane.b32.xlu1 %v7740_v4, %s4490_s22  ;;  %v9380_v37 = vld [vmem:[#allocation145_spill] sm:$0xff] }
 0x49d   : >> { %v3314_v54 = vpop.permute.xlu0 %3313  ;;  %v2006_v33 = vsel %vm442_vm2, %v9380_v37, %v9379_v28  ;;  %v9384_v28 = vld [vmem:[#allocation193_spill] sm:$0xff] }
 0x49e   : >> { %v3506_v1 = vsel %vm3481_vm9, %v3314_v54, %v9378_v44  ;;  %v3694_v5 = vsel %vm3481_vm9, %v3218_v0, %v3314_v54  ;;  %v2798_v55 = vpop.permute.xlu1 %2797  ;;  %v9381_v0 = vld [vmem:[#allocation78_spill] sm:$0xff]  ;;  %v9382_v54 = vld [vmem:[#allocation175_spill] sm:$0xff] }
 0x49f   : >> { %v3748_v16 = vsel %vm4812_vm10, %v2976_v12, %v3694_v5  ;;  %v3749_v15 = vsel %vm4816_vm11, %v2977_v13, %v3506_v1  ;;  %3237 = vrot.lane.b32.xlu0 %v7735_v18, %s4492_s16  ;;  %v7783_v31 = vadd.f32 %v2501_v24, %v9381_v0  ;;  %v2502_v2 = vsel %vm571_vm3, %v2006_v33, %v9382_v54  ;;  %v9383_v24 = vld [vmem:[#allocation194_spill] sm:$0xff] }
 0x4a0   : >> { %3864 = vst [vmem:[%s6484_s14 + $0xe0] sm:$0xff] %v3748_v16  ;;  %3865 = vst [vmem:[%s6484_s14 + $0xe8] sm:$0xff] %v3749_v15  ;;  %2949 = vrot.lane.b32.xlu1 %v7762_v14, %s4490_s22  ;;  %v3515_v12 = vsel %vm3481_vm9, %v9357_v62, %v3336_v11  ;;  %v2983_v62 = vsel %vm2951_vm5, %v9384_v28, %v9383_v24  ;;  %v2982_v16 = vsel %vm2951_vm5, %v2798_v55, %v9384_v28  ;;  %v9388_v28 = vld [vmem:[#allocation173_spill] sm:$0xff] }
 0x4a1   : >> { %v2808_v38 = vpop.permute.xlu0 %2807 }
 0x4a2   : >> { %v2986_v13 = vsel %vm2951_vm5, %v7669_v46, %v2808_v38  ;;  %v3155_v44 = vpop.permute.xlu1 %3154  ;;  %v2987_v1 = vsel %vm2951_vm5, %v2808_v38, %v2810_v51  ;;  %v9385_v46 = vld [vmem:[#allocation80_spill] sm:$0xff]  ;;  %v2374_v51 = vsel %vm571_vm3, %v9367_v41, %v9377_v30  ;;  %v9386_v41 = vld [vmem:[#allocation77_spill] sm:$0xff] }
 0x4a3   : >> { %v3759_v5 = vsel %vm4828_vm6, %v2986_v13, %v3515_v12  ;;  %2923 = vrot.lane.b32.xlu0 %v7783_v31, %s4490_s22  ;;  %v7803_v37 = vadd.f32 %v2502_v2, %v9385_v46  ;;  %v3198_v15 = vsel %vm3192_vm15, %v2987_v1, %v3155_v44  ;;  %v9387_v13 = vld [vmem:[#allocation134_spill] sm:$0xff] }
 0x4a4   : >> { %3875 = vst [vmem:[%s6484_s14 + $0x138] sm:$0xff] %v3759_v5  ;;  %3239 = vrot.lane.b32.xlu1 %v7762_v14, %s4492_s16 }
 0x4a5   : >> { %v3338_v33 = vpop.permute.xlu0 %3337 }
 0x4a6   : >> { %v3516_v0 = vsel %vm3481_vm9, %v3336_v11, %v3338_v33  ;;  %v3517_v38 = vsel %vm3481_vm9, %v3338_v33, %v3340_v42  ;;  %v3328_v54 = vpop.permute.xlu1 %3327  ;;  %v9390_v33 = vld [vmem:[#allocation176_spill] sm:$0xff] }
 0x4a7   : >> { %v3760_v2 = vsel %vm4832_vm7, %v3198_v15, %v3516_v0  ;;  %v3761_v12 = vsel %vm4836_vm8, %v3155_v44, %v3517_v38  ;;  %v3512_v30 = vsel %vm3481_vm9, %v3328_v54, %v9386_v41  ;;  %v3695_v55 = vsel %vm3481_vm9, %v7708_v47, %v3328_v54  ;;  %3172 = vrot.lane.b32.xlu0 %v7783_v31, %s4493_s17  ;;  %v9392_v54 = vld [vmem:[#allocation142_spill] sm:$0xff] }
 0x4a8   : >> { %3876 = vst [vmem:[%s6484_s14 + $0x140] sm:$0xff] %v3760_v2  ;;  %3877 = vst.msk [vmem:[%s6484_s14 + $0x148] sm:$0xff] %vm3841_vm13, %v3761_v12  ;;  %v3755_v11 = vsel %vm4812_vm10, %v2982_v16, %v3695_v55  ;;  %v3756_v42 = vsel %vm4816_vm11, %v2983_v62, %v3512_v30  ;;  %2937 = vrot.lane.b32.xlu1 %v7803_v37, %s4490_s22  ;;  %v7833_v44 = vadd.f32 %v2374_v51, %v9387_v13  ;;  %v9389_v51 = vld [vmem:[#allocation172_spill] sm:$0xff]  ;;  %v9393_v41 = vld [vmem:[#allocation178_spill] sm:$0xff] }
 0x4a9   : >> { %3871 = vst [vmem:[%s6484_s14 + $0x118] sm:$0xff] %v3755_v11  ;;  %3872 = vst [vmem:[%s6484_s14 + $0x120] sm:$0xff] %v3756_v42  ;;  %v7837_v47 = vpop.permute.xlu0 %2819  ;;  %v9395_v11 = vld [vmem:[#allocation181_spill] sm:$0xff]  ;;  %v9396_v42 = vld [vmem:[#allocation50_spill] sm:$0xff] }
 0x4aa   : >> { %v7839_v1 = vpop.permute.xlu1 %2821 }
 0x4ab   : >> { %2947 = vrot.lane.b32.xlu0 %v7833_v44, %s4490_s22 }
 0x4ac   : >> { %3174 = vrot.lane.b32.xlu1 %v7803_v37, %s4493_s17 }
 0x4ad   : >> { %v7845_v5 = vpop.permute.xlu0 %2823 }
 0x4ae   : >> { %v7847_v24 = vpop.permute.xlu1 %2833 }
 0x4af   : >> { %3341 = vrot.lane.b32.xlu0 %v7298_v53, %s4491_s7  ;;  %v9391_v53 = vld [vmem:[#allocation103_spill] sm:$0xff] }
 0x4b0   : >> { %3343 = vrot.lane.b32.xlu1 %v9388_v28, %s4491_s7  ;;  %v9397_v28 = vld [vmem:[#allocation144_spill] sm:$0xff] }
 0x4b1   : >> { %v7853_v62 = vpop.permute.xlu0 %3221 }
 0x4b2   : >> { %v7855_v46 = vpop.permute.xlu1 %2837 }
 0x4b3   : >> { %3345 = vrot.lane.b32.xlu0 %v9389_v51, %s4491_s7 }
 0x4b4   : >> { %3347 = vrot.lane.b32.xlu1 %v9390_v33, %s4491_s7 }
 0x4b5   : >> { %v7861_v16 = vpop.permute.xlu0 %2811 }
 0x4b6   : >> { %v7863_v15 = vpop.permute.xlu1 %3223 }
 0x4b7   : >> { %3349 = vrot.lane.b32.xlu0 %v7241_v26, %s4491_s7  ;;  %v9394_v26 = vld [vmem:[#allocation182_spill] sm:$0xff] }
 0x4b8   : >> { %3351 = vrot.lane.b32.xlu1 %v9391_v53, %s4491_s7  ;;  %v9399_v53 = vld [vmem:[#allocation55_spill] sm:$0xff] }
 0x4b9   : >> { %v7869_v0 = vpop.permute.xlu0 %3156 }
 0x4ba   : >> { %v7871_v38 = vpop.permute.xlu1 %2825 }
 0x4bb   : >> { %3353 = vrot.lane.b32.xlu0 %v9392_v54, %s4491_s7 }
 0x4bc   : >> { %3355 = vrot.lane.b32.xlu1 %v7309_v45, %s4491_s7 }
 0x4bd   : >> { %v7877_v2 = vpop.permute.xlu0 %2835 }
 0x4be   : >> { %v7879_v12 = vpop.permute.xlu1 %3158 }
 0x4bf   : >> { %3357 = vrot.lane.b32.xlu0 %v9393_v41, %s4491_s7 }
 0x4c0   : >> { %3359 = vrot.lane.b32.xlu1 %v9394_v26, %s4491_s7  ;;  %v9400_v26 = vld [vmem:[#allocation58_spill] sm:$0xff] }
 0x4c1   : >> { %v7885_v30 = vpop.permute.xlu0 %2847 }
 0x4c2   : >> { %v7887_v55 = vpop.permute.xlu1 %2849 }
 0x4c3   : >> { %3361 = vrot.lane.b32.xlu0 %v9395_v11, %s4491_s7 }
 0x4c4   : >> { %3363 = vrot.lane.b32.xlu1 %v9396_v42, %s4491_s7 }
 0x4c5   : >> { %v7893_v45 = vpop.permute.xlu0 %2851 }
 0x4c6   : >> { %v7895_v13 = vpop.permute.xlu1 %2861 }
 0x4c7   : >> { %3365 = vrot.lane.b32.xlu0 %v7319_v8, %s4491_s7  ;;  %v9401_v8 = vld [vmem:[#allocation59_spill] sm:$0xff] }
 0x4c8   : >> { %3367 = vrot.lane.b32.xlu1 %v9397_v28, %s4491_s7 }
 0x4c9   : >> { %v7901_v51 = vpop.permute.xlu0 %3225 }
 0x4ca   : >> { %v7903_v33 = vpop.permute.xlu1 %2865 }
 0x4cb   : >> { %9398 = vst [vmem:[#allocation51_spill] sm:$0xff] %v7903_v33  ;;  %3369 = vrot.lane.b32.xlu0 %v7428_v48, %s4491_s7 }
 0x4cc   : >> { %3371 = vrot.lane.b32.xlu1 %v9399_v53, %s4491_s7 }
 0x4cd   : >> { %v7909_v54 = vpop.permute.xlu0 %2839 }
 0x4ce   : >> { %v7911_v41 = vpop.permute.xlu1 %3227 }
 0x4cf   : >> { %3373 = vrot.lane.b32.xlu0 %v9400_v26, %s4491_s7 }
 0x4d0   : >> { %3375 = vrot.lane.b32.xlu1 %v9401_v8, %s4491_s7  ;;  %v9403_v8 = vld [vmem:[#allocation57_spill] sm:$0xff] }
 0x4d1   : >> { %v7917_v11 = vpop.permute.xlu0 %3160 }
 0x4d2   : >> { %v7919_v42 = vpop.permute.xlu1 %2853 }
 0x4d3   : >> { %3377 = vrot.lane.b32.xlu0 %v7346_v32, %s4491_s7  ;;  %v9404_v32 = vld [vmem:[#allocation60_spill] sm:$0xff] }
 0x4d4   : >> { %3379 = vrot.lane.b32.xlu1 %v7349_v21, %s4491_s7 }
 0x4d5   : >> { %v7925_v48 = vpop.permute.xlu0 %2863 }
 0x4d6   : >> { %v7927_v28 = vpop.permute.xlu1 %3162 }
 0x4d7   : >> { %9402 = vst [vmem:[#allocation101_spill] sm:$0xff] %v7927_v28  ;;  %3381 = vrot.lane.b32.xlu0 %v7371_v3, %s4491_s7  ;;  %v9407_v28 = vld [vmem:[#allocation61_spill] sm:$0xff] }
 0x4d8   : >> { %3383 = vrot.lane.b32.xlu1 %v7447_v40, %s4491_s7 }
 0x4d9   : >> { %v7933_v53 = vpop.permute.xlu0 %2875 }
 0x4da   : >> { %v7935_v26 = vpop.permute.xlu1 %2877 }
 0x4db   : >> { %3385 = vrot.lane.b32.xlu0 %v9403_v8, %s4491_s7 }
 0x4dc   : >> { %3387 = vrot.lane.b32.xlu1 %v9404_v32, %s4491_s7 }
 0x4dd   : >> { %v7941_v21 = vpop.permute.xlu0 %2879 }
 0x4de   : >> { %9405 = vst [vmem:[#allocation151_spill] sm:$0xff] %v7941_v21  ;;  %v7943_v33 = vpop.permute.xlu1 %2889 }
 0x4df   : >> { %9406 = vst [vmem:[#allocation104_spill] sm:$0xff] %v7943_v33  ;;  %3389 = vrot.lane.b32.xlu0 %v9407_v28, %s4491_s7  ;;  %v9410_v28 = vld [vmem:[#allocation63_spill] sm:$0xff] }
 0x4e0   : >> { %3391 = vrot.lane.b32.xlu1 %v7377_v60, %s4491_s7 }
 0x4e1   : >> { %v7949_v3 = vpop.permute.xlu0 %3229 }
 0x4e2   : >> { %v7951_v40 = vpop.permute.xlu1 %2893 }
 0x4e3   : >> { %9408 = vst [vmem:[#allocation105_spill] sm:$0xff] %v7951_v40  ;;  %3393 = vrot.lane.b32.xlu0 %v7457_v63, %s4491_s7  ;;  %v9411_v40 = vld [vmem:[#allocation66_spill] sm:$0xff]  ;;  %v9412_v63 = vld [vmem:[#allocation67_spill] sm:$0xff] }
 0x4e4   : >> { %3395 = vrot.lane.b32.xlu1 %v7398_v27, %s4491_s7 }
 0x4e5   : >> { %v7957_v8 = vpop.permute.xlu0 %2867 }
 0x4e6   : >> { %v7959_v32 = vpop.permute.xlu1 %3231 }
 0x4e7   : >> { %9409 = vst [vmem:[#allocation153_spill] sm:$0xff] %v7959_v32  ;;  %3397 = vrot.lane.b32.xlu0 %v7529_v43, %s4491_s7 }
 0x4e8   : >> { %3399 = vrot.lane.b32.xlu1 %v9410_v28, %s4491_s7 }
 0x4e9   : >> { %v7965_v60 = vpop.permute.xlu0 %3164 }
 0x4ea   : >> { %v7967_v33 = vpop.permute.xlu1 %2881 }
 0x4eb   : >> { %3401 = vrot.lane.b32.xlu0 %v9411_v40, %s4491_s7 }
 0x4ec   : >> { %3403 = vrot.lane.b32.xlu1 %v9412_v63, %s4491_s7 }
 0x4ed   : >> { %v7973_v27 = vpop.permute.xlu0 %2891 }
 0x4ee   : >> { %v7975_v21 = vpop.permute.xlu1 %3166 }
 0x4ef   : >> { %9413 = vst [vmem:[#allocation108_spill] sm:$0xff] %v7975_v21  ;;  %3405 = vrot.lane.b32.xlu0 %v7480_v36, %s4491_s7  ;;  %v9418_v21 = vld [vmem:[#allocation69_spill] sm:$0xff] }
 0x4f0   : >> { %3407 = vrot.lane.b32.xlu1 %v7484_v9, %s4491_s7  ;;  %v9417_v9 = vld [vmem:[#allocation149_spill] sm:$0xff] }
 0x4f1   : >> { %v7981_v43 = vpop.permute.xlu0 %2903 }
 0x4f2   : >> { %9414 = vst [vmem:[#allocation106_spill] sm:$0xff] %v7981_v43  ;;  %v2906_v28 = vpop.permute.xlu1 %2905 }
 0x4f3   : >> { %v7985_v32 = vsel %vm2951_vm5, %v7981_v43, %v2906_v28  ;;  %3409 = vrot.lane.b32.xlu0 %v7501_v39, %s4491_s7  ;;  %v9419_v39 = vld [vmem:[#allocation65_spill] sm:$0xff] }
 0x4f4   : >> { %9415 = vst [vmem:[#allocation146_spill] sm:$0xff] %v7985_v32  ;;  %3411 = vrot.lane.b32.xlu1 %v7555_v50, %s4491_s7 }
 0x4f5   : >> { %v2908_v40 = vpop.permute.xlu0 %2907 }
 0x4f6   : >> { %v7992_v63 = vsel %vm2951_vm5, %v2906_v28, %v2908_v40  ;;  %v7994_v36 = vpop.permute.xlu1 %2917 }
 0x4f7   : >> { %9416 = vst [vmem:[#allocation109_spill] sm:$0xff] %v7992_v63  ;;  %3413 = vrot.lane.b32.xlu0 %v9417_v9, %s4491_s7  ;;  %v9422_v9 = vld [vmem:[#allocation74_spill] sm:$0xff] }
 0x4f8   : >> { %3415 = vrot.lane.b32.xlu1 %v9418_v21, %s4491_s7 }
 0x4f9   : >> { %v8000_v43 = vpop.permute.xlu0 %3233 }
 0x4fa   : >> { %v2922_v32 = vpop.permute.xlu1 %2921 }
 0x4fb   : >> { %3417 = vrot.lane.b32.xlu0 %v9419_v39, %s4491_s7 }
 0x4fc   : >> { %3419 = vrot.lane.b32.xlu1 %v7504_v56, %s4491_s7 }
 0x4fd   : >> { %v8006_v50 = vpop.permute.xlu0 %2895 }
 0x4fe   : >> { %v8008_v28 = vpop.permute.xlu1 %3235 }
 0x4ff   : >> { %9420 = vst [vmem:[#allocation52_spill] sm:$0xff] %v8008_v28  ;;  %3421 = vrot.lane.b32.xlu0 %v7573_v57, %s4491_s7 }
 0x500   : >> { %3423 = vrot.lane.b32.xlu1 %v7519_v29, %s4491_s7  ;;  %v9423_v29 = vld [vmem:[#allocation148_spill] sm:$0xff] }
 0x501   : >> { %v8014_v21 = vpop.permute.xlu0 %3168 }
 0x502   : >> { %v8016_v40 = vpop.permute.xlu1 %2909 }
 0x503   : >> { %9421 = vst [vmem:[#allocation152_spill] sm:$0xff] %v8016_v40  ;;  %3425 = vrot.lane.b32.xlu0 %v7667_v17, %s4491_s7  ;;  %v9424_v40 = vld [vmem:[#allocation75_spill] sm:$0xff] }
 0x504   : >> { %3427 = vrot.lane.b32.xlu1 %v9422_v9, %s4491_s7 }
 0x505   : >> { %v2920_v56 = vpop.permute.xlu0 %2919 }
 0x506   : >> { %v8024_v39 = vsel %vm2951_vm5, %v7994_v36, %v2920_v56  ;;  %v8027_v57 = vsel %vm2951_vm5, %v2920_v56, %v2922_v32  ;;  %v8029_v28 = vpop.permute.xlu1 %3170 }
 0x507   : >> { %3429 = vrot.lane.b32.xlu0 %v9423_v29, %s4491_s7 }
 0x508   : >> { %3431 = vrot.lane.b32.xlu1 %v9424_v40, %s4491_s7 }
 0x509   : >> { %v8035_v17 = vpop.permute.xlu0 %2931 }
 0x50a   : >> { %9425 = vst [vmem:[#allocation53_spill] sm:$0xff] %v8035_v17  ;;  %v2934_v63 = vpop.permute.xlu1 %2933 }
 0x50b   : >> { %v8039_v9 = vsel %vm2951_vm5, %v8035_v17, %v2934_v63  ;;  %3433 = vrot.lane.b32.xlu0 %v7597_v6, %s4491_s7  ;;  %v9429_v6 = vld [vmem:[#allocation156_spill] sm:$0xff] }
 0x50c   : >> { %9426 = vst [vmem:[#allocation107_spill] sm:$0xff] %v8039_v9  ;;  %3435 = vrot.lane.b32.xlu1 %v7600_v35, %s4491_s7  ;;  %v9430_v35 = vld [vmem:[#allocation76_spill] sm:$0xff] }
 0x50d   : >> { %v2936_v32 = vpop.permute.xlu0 %2935 }
 0x50e   : >> { %v8046_v56 = vsel %vm2951_vm5, %v2934_v63, %v2936_v32  ;;  %v8048_v29 = vpop.permute.xlu1 %2945  ;;  %v9432_v32 = vld [vmem:[#allocation73_spill] sm:$0xff] }
 0x50f   : >> { %9427 = vst [vmem:[#allocation179_spill] sm:$0xff] %v8046_v56  ;;  %9428 = vst [vmem:[#allocation110_spill] sm:$0xff] %v8048_v29  ;;  %3437 = vrot.lane.b32.xlu0 %v7631_v49, %s4491_s7  ;;  %v9439_v56 = vld [vmem:[#allocation158_spill] sm:$0xff] }
 0x510   : >> { %3439 = vrot.lane.b32.xlu1 %v7687_v59, %s4491_s7 }
 0x511   : >> { %v8054_v40 = vpop.permute.xlu0 %3237 }
 0x512   : >> { %v2950_v9 = vpop.permute.xlu1 %2949 }
 0x513   : >> { %3441 = vrot.lane.b32.xlu0 %v9429_v6, %s4491_s7 }
 0x514   : >> { %3443 = vrot.lane.b32.xlu1 %v9430_v35, %s4491_s7 }
 0x515   : >> { %v8060_v17 = vpop.permute.xlu0 %2923 }
 0x516   : >> { %v8062_v63 = vpop.permute.xlu1 %3239 }
 0x517   : >> { %9431 = vst [vmem:[#allocation111_spill] sm:$0xff] %v8062_v63  ;;  %3445 = vrot.lane.b32.xlu0 %v9432_v32, %s4491_s7 }
 0x518   : >> { %3447 = vrot.lane.b32.xlu1 %v7639_v58, %s4491_s7 }
 0x519   : >> { %v8068_v49 = vpop.permute.xlu0 %3172 }
 0x51a   : >> { %v8070_v59 = vpop.permute.xlu1 %2937 }
 0x51b   : >> { %9433 = vst [vmem:[#allocation114_spill] sm:$0xff] %v8070_v59  ;;  %3449 = vrot.lane.b32.xlu0 %v7703_v7, %s4491_s7  ;;  %v9437_v7 = vld [vmem:[#allocation161_spill] sm:$0xff]  ;;  %v9438_v59 = vld [vmem:[#allocation79_spill] sm:$0xff] }
 0x51c   : >> { %3451 = vrot.lane.b32.xlu1 %v7657_v52, %s4491_s7  ;;  %v2988_v52 = vsel %vm2951_vm5, %v7861_v16, %v9438_v59 }
 0x51d   : >> { %v2948_v6 = vpop.permute.xlu0 %2947 }
 0x51e   : >> { %v8078_v35 = vsel %vm2951_vm5, %v8048_v29, %v2948_v6  ;;  %v8081_v32 = vsel %vm2951_vm5, %v2948_v6, %v2950_v9  ;;  %v8083_v58 = vpop.permute.xlu1 %3174  ;;  %v2989_v9 = vsel %vm2951_vm5, %v9438_v59, %v9439_v56  ;;  %v9442_v59 = vld [vmem:[#allocation83_spill] sm:$0xff] }
 0x51f   : >> { %9434 = vst [vmem:[#allocation112_spill] sm:$0xff] %v8078_v35  ;;  %9435 = vst [vmem:[#allocation183_spill] sm:$0xff] %v8081_v32  ;;  %3453 = vrot.lane.b32.xlu0 %v7783_v31, %s4491_s7 }
 0x520   : >> { %9436 = vst [vmem:[#allocation154_spill] sm:$0xff] %v8083_v58  ;;  %3455 = vrot.lane.b32.xlu1 %v9437_v7, %s4491_s7  ;;  %v9440_v7 = vld [vmem:[#allocation157_spill] sm:$0xff]  ;;  %v2990_v58 = vsel %vm2951_vm5, %v9439_v56, %v9442_v59 }
 0x521   : >> { %v3342_v63 = vpop.permute.xlu0 %3341 }
 0x522   : >> { %v3696_v35 = vsel %vm3481_vm9, %v7853_v62, %v3342_v63  ;;  %v3344_v29 = vpop.permute.xlu1 %3343  ;;  %v9441_v62 = vld [vmem:[#allocation82_spill] sm:$0xff] }
 0x523   : >> { %v3762_v31 = vsel %vm4812_vm10, %v2988_v52, %v3696_v35  ;;  %v3518_v6 = vsel %vm3481_vm9, %v3342_v63, %v3344_v29  ;;  %3457 = vrot.lane.b32.xlu0 %v9440_v7, %s4491_s7  ;;  %v2991_v52 = vsel %vm2951_vm5, %v9442_v59, %v7837_v47 }
 0x524   : >> { %3878 = vst [vmem:[%s6484_s14 + $0x150] sm:$0xff] %v3762_v31  ;;  %v3763_v16 = vsel %vm4816_vm11, %v2989_v9, %v3518_v6  ;;  %3459 = vrot.lane.b32.xlu1 %v9441_v62, %s4491_s7 }
 0x525   : >> { %3879 = vst [vmem:[%s6484_s14 + $0x158] sm:$0xff] %v3763_v16  ;;  %v3346_v32 = vpop.permute.xlu0 %3345 }
 0x526   : >> { %v3519_v35 = vsel %vm3481_vm9, %v3344_v29, %v3346_v32  ;;  %v3348_v63 = vpop.permute.xlu1 %3347 }
 0x527   : >> { %v3764_v7 = vsel %vm4820_vm14, %v2990_v58, %v3519_v35  ;;  %v3520_v9 = vsel %vm3481_vm9, %v3346_v32, %v3348_v63  ;;  %3461 = vrot.lane.b32.xlu0 %v7718_v10, %s4491_s7  ;;  %v2992_v58 = vsel %vm2951_vm5, %v7837_v47, %v7839_v1  ;;  %v2993_v32 = vsel %vm2951_vm5, %v7839_v1, %v7845_v5  ;;  %v9444_v35 = vld [vmem:[#allocation81_spill] sm:$0xff] }
 0x528   : >> { %3880 = vst [vmem:[%s6484_s14 + $0x160] sm:$0xff] %v3764_v7  ;;  %v3765_v56 = vsel %vm4824_vm4, %v2991_v52, %v3520_v9  ;;  %3463 = vrot.lane.b32.xlu1 %v7721_v23, %s4491_s7  ;;  %v3199_v16 = vsel %vm3192_vm15, %v2993_v32, %v7869_v0  ;;  %v9445_v7 = vld [vmem:[#allocation165_spill] sm:$0xff] }
 0x529   : >> { %3881 = vst [vmem:[%s6484_s14 + $0x168] sm:$0xff] %v3765_v56  ;;  %v3350_v29 = vpop.permute.xlu0 %3349  ;;  %v9446_v9 = vld [vmem:[#allocation85_spill] sm:$0xff] }
 0x52a   : >> { %v3521_v10 = vsel %vm3481_vm9, %v3348_v63, %v3350_v29  ;;  %v3352_v6 = vpop.permute.xlu1 %3351  ;;  %v2994_v63 = vsel %vm2951_vm5, %v7871_v38, %v9444_v35  ;;  %v9447_v56 = vld [vmem:[#allocation197_spill] sm:$0xff] }
 0x52b   : >> { %v3766_v23 = vsel %vm4828_vm6, %v2992_v58, %v3521_v10  ;;  %v3522_v62 = vsel %vm3481_vm9, %v3350_v29, %v3352_v6  ;;  %3465 = vrot.lane.b32.xlu0 %v7735_v18, %s4491_s7  ;;  %v9448_v58 = vld [vmem:[#allocation84_spill] sm:$0xff] }
 0x52c   : >> { %3882 = vst [vmem:[%s6484_s14 + $0x170] sm:$0xff] %v3766_v23  ;;  %v3767_v47 = vsel %vm4832_vm7, %v3199_v16, %v3522_v62  ;;  %3467 = vrot.lane.b32.xlu1 %v7803_v37, %s4491_s7  ;;  %v2996_v32 = vsel %vm2951_vm5, %v9447_v56, %v9448_v58  ;;  %v9449_v16 = vld [vmem:[#allocation167_spill] sm:$0xff] }
 0x52d   : >> { %3883 = vst [vmem:[%s6484_s14 + $0x178] sm:$0xff] %v3767_v47  ;;  %v3354_v1 = vpop.permute.xlu0 %3353  ;;  %v2997_v47 = vsel %vm2951_vm5, %v9448_v58, %v7847_v24 }
 0x52e   : >> { %v3523_v5 = vsel %vm3481_vm9, %v3352_v6, %v3354_v1  ;;  %v3356_v59 = vpop.permute.xlu1 %3355 }
 0x52f   : >> { %v3768_v18 = vsel %vm4836_vm8, %v7869_v0, %v3523_v5  ;;  %v3697_v52 = vsel %vm3481_vm9, %v7863_v15, %v3356_v59  ;;  %3469 = vrot.lane.b32.xlu0 %v9445_v7, %s4491_s7  ;;  %v2995_v0 = vsel %vm2951_vm5, %v9444_v35, %v9447_v56  ;;  %v2999_v35 = vsel %vm2951_vm5, %v7877_v2, %v7855_v46 }
 0x530   : >> { %3884 = vst.msk [vmem:[%s6484_s14 + $0x180] sm:$0xff] %vm3841_vm13, %v3768_v18  ;;  %v3769_v37 = vsel %vm4812_vm10, %v2994_v63, %v3697_v52  ;;  %3471 = vrot.lane.b32.xlu1 %v9446_v9, %s4491_s7  ;;  %v3200_v46 = vsel %vm3192_vm15, %v2999_v35, %v7879_v12  ;;  %v9450_v9 = vld [vmem:[#allocation168_spill] sm:$0xff]  ;;  %v3005_v35 = vsel %vm2951_vm5, %v7887_v55, %v7893_v45 }
 0x531   : >> { %3885 = vst [vmem:[%s6484_s14 + $0x188] sm:$0xff] %v3769_v37  ;;  %v3358_v38 = vpop.permute.xlu0 %3357 }
 0x532   : >> { %v3524_v15 = vsel %vm3481_vm9, %v3356_v59, %v3358_v38  ;;  %v3360_v29 = vpop.permute.xlu1 %3359  ;;  %v2998_v59 = vsel %vm2951_vm5, %v7847_v24, %v7877_v2 }
 0x533   : >> { %v3770_v10 = vsel %vm4816_vm11, %v2995_v0, %v3524_v15  ;;  %v3525_v6 = vsel %vm3481_vm9, %v3358_v38, %v3360_v29  ;;  %3473 = vrot.lane.b32.xlu0 %v9449_v16, %s4491_s7  ;;  %v3000_v38 = vsel %vm2951_vm5, %v7909_v54, %v9450_v9  ;;  %v9451_v15 = vld [vmem:[#allocation170_spill] sm:$0xff] }
 0x534   : >> { %3886 = vst [vmem:[%s6484_s14 + $0x190] sm:$0xff] %v3770_v10  ;;  %v3771_v23 = vsel %vm4820_vm14, %v2996_v32, %v3525_v6  ;;  %3475 = vrot.lane.b32.xlu1 %v7740_v4, %s4491_s7  ;;  %v9452_v10 = vld [vmem:[#allocation198_spill] sm:$0xff] }
 0x535   : >> { %3887 = vst [vmem:[%s6484_s14 + $0x198] sm:$0xff] %v3771_v23  ;;  %v3362_v62 = vpop.permute.xlu0 %3361  ;;  %v3003_v23 = vsel %vm2951_vm5, %v9452_v10, %v7885_v30 }
 0x536   : >> { %v3526_v1 = vsel %vm3481_vm9, %v3360_v29, %v3362_v62  ;;  %v3364_v5 = vpop.permute.xlu1 %3363  ;;  %v3001_v29 = vsel %vm2951_vm5, %v9450_v9, %v9451_v15 }
 0x537   : >> { %v3772_v4 = vsel %vm4824_vm4, %v2997_v47, %v3526_v1  ;;  %v3527_v63 = vsel %vm3481_vm9, %v3362_v62, %v3364_v5  ;;  %3477 = vrot.lane.b32.xlu0 %v7833_v44, %s4491_s7 }
 0x538   : >> { %3888 = vst [vmem:[%s6484_s14 + $0x1a0] sm:$0xff] %v3772_v4  ;;  %v3773_v18 = vsel %vm4828_vm6, %v2998_v59, %v3527_v63  ;;  %3479 = vrot.lane.b32.xlu1 %v7762_v14, %s4491_s7  ;;  %v3004_v59 = vsel %vm2951_vm5, %v7885_v30, %v7887_v55 }
 0x539   : >> { %3889 = vst [vmem:[%s6484_s14 + $0x1a8] sm:$0xff] %v3773_v18  ;;  %v3366_v24 = vpop.permute.xlu0 %3365  ;;  %v3201_v18 = vsel %vm3192_vm15, %v3005_v35, %v7917_v11 }
 0x53a   : >> { %v3528_v2 = vsel %vm3481_vm9, %v3364_v5, %v3366_v24  ;;  %v3368_v52 = vpop.permute.xlu1 %3367 }
 0x53b   : >> { %v3774_v44 = vsel %vm4832_vm7, %v3200_v46, %v3528_v2  ;;  %v3529_v7 = vsel %vm3481_vm9, %v3366_v24, %v3368_v52  ;;  %v9453_v52 = vld [vmem:[#allocation180_spill] sm:$0xff] }
 0x53c   : >> { %3890 = vst [vmem:[%s6484_s14 + $0x1b0] sm:$0xff] %v3774_v44  ;;  %v3775_v14 = vsel %vm4836_vm8, %v7879_v12, %v3529_v7  ;;  %v3006_v44 = vsel %vm2951_vm5, %v7919_v42, %v9453_v52 }
 0x53d   : >> { %3891 = vst.msk [vmem:[%s6484_s14 + $0x1b8] sm:$0xff] %vm3841_vm13, %v3775_v14  ;;  %v3370_v37 = vpop.permute.xlu0 %3369 }
 0x53e   : >> { %v3698_v56 = vsel %vm3481_vm9, %v7901_v51, %v3370_v37  ;;  %v3372_v0 = vpop.permute.xlu1 %3371  ;;  %v3002_v51 = vsel %vm2951_vm5, %v9451_v15, %v9452_v10  ;;  %v9455_v15 = vld [vmem:[#allocation129_spill] sm:$0xff] }
 0x53f   : >> { %v3776_v12 = vsel %vm4812_vm10, %v3000_v38, %v3698_v56  ;;  %v3530_v58 = vsel %vm3481_vm9, %v3370_v37, %v3372_v0  ;;  %v9454_v38 = vld [vmem:[#allocation86_spill] sm:$0xff] }
 0x540   : >> { %3892 = vst [vmem:[%s6484_s14 + $0x1c0] sm:$0xff] %v3776_v12  ;;  %v3777_v32 = vsel %vm4816_vm11, %v3001_v29, %v3530_v58  ;;  %v3007_v56 = vsel %vm2951_vm5, %v9453_v52, %v9454_v38 }
 0x541   : >> { %3893 = vst [vmem:[%s6484_s14 + $0x1c8] sm:$0xff] %v3777_v32  ;;  %v3374_v54 = vpop.permute.xlu0 %3373  ;;  %v3009_v32 = vsel %vm2951_vm5, %v9455_v15, %v7895_v13 }
 0x542   : >> { %v3531_v6 = vsel %vm3481_vm9, %v3372_v0, %v3374_v54  ;;  %v3376_v16 = vpop.permute.xlu1 %3375 }
 0x543   : >> { %v3778_v62 = vsel %vm4820_vm14, %v3002_v51, %v3531_v6  ;;  %v3532_v47 = vsel %vm3481_vm9, %v3374_v54, %v3376_v16  ;;  %v3010_v51 = vsel %vm2951_vm5, %v7895_v13, %v7925_v48  ;;  %v9456_v6 = vld [vmem:[#allocation51_spill] sm:$0xff] }
 0x544   : >> { %3894 = vst [vmem:[%s6484_s14 + $0x1d0] sm:$0xff] %v3778_v62  ;;  %v3779_v1 = vsel %vm4824_vm4, %v3003_v23, %v3532_v47 }
 0x545   : >> { %3895 = vst [vmem:[%s6484_s14 + $0x1d8] sm:$0xff] %v3779_v1  ;;  %v3378_v5 = vpop.permute.xlu0 %3377 }
 0x546   : >> { %v3533_v4 = vsel %vm3481_vm9, %v3376_v16, %v3378_v5  ;;  %v3380_v63 = vpop.permute.xlu1 %3379  ;;  %v3011_v16 = vsel %vm2951_vm5, %v7925_v48, %v9456_v6 }
 0x547   : >> { %v3780_v24 = vsel %vm4828_vm6, %v3004_v59, %v3533_v4  ;;  %v3534_v46 = vsel %vm3481_vm9, %v3378_v5, %v3380_v63  ;;  %v9457_v5 = vld [vmem:[#allocation101_spill] sm:$0xff] }
 0x548   : >> { %3896 = vst [vmem:[%s6484_s14 + $0x1e0] sm:$0xff] %v3780_v24  ;;  %v3781_v30 = vsel %vm4832_vm7, %v3201_v18, %v3534_v46  ;;  %v3202_v59 = vsel %vm3192_vm15, %v3011_v16, %v9457_v5  ;;  %v9458_v24 = vld [vmem:[#allocation90_spill] sm:$0xff]  ;;  %v9462_v16 = vld [vmem:[#allocation88_spill] sm:$0xff] }
 0x549   : >> { %3897 = vst [vmem:[%s6484_s14 + $0x1e8] sm:$0xff] %v3781_v30  ;;  %v3382_v2 = vpop.permute.xlu0 %3381  ;;  %v3012_v46 = vsel %vm2951_vm5, %v7957_v8, %v9458_v24 }
 0x54a   : >> { %v3535_v55 = vsel %vm3481_vm9, %v3380_v63, %v3382_v2  ;;  %v3384_v45 = vpop.permute.xlu1 %3383 }
 0x54b   : >> { %v3782_v7 = vsel %vm4836_vm8, %v7917_v11, %v3535_v55  ;;  %v3699_v14 = vsel %vm3481_vm9, %v7911_v41, %v3384_v45  ;;  %v3008_v11 = vsel %vm2951_vm5, %v9454_v38, %v9455_v15  ;;  %v9459_v55 = vld [vmem:[#allocation87_spill] sm:$0xff] }
 0x54c   : >> { %3898 = vst.msk [vmem:[%s6484_s14 + $0x1f0] sm:$0xff] %vm3841_vm13, %v3782_v7  ;;  %v3783_v37 = vsel %vm4812_vm10, %v3006_v44, %v3699_v14  ;;  %v9460_v14 = vld [vmem:[#allocation137_spill] sm:$0xff] }
 0x54d   : >> { %3899 = vst [vmem:[%s6484_s14 + $0x1f8] sm:$0xff] %v3783_v37  ;;  %v3386_v9 = vpop.permute.xlu0 %3385  ;;  %v3015_v38 = vsel %vm2951_vm5, %v9460_v14, %v7933_v53 }
 0x54e   : >> { %v3536_v42 = vsel %vm3481_vm9, %v3384_v45, %v3386_v9  ;;  %v3388_v0 = vpop.permute.xlu1 %3387  ;;  %v3013_v45 = vsel %vm2951_vm5, %v9458_v24, %v9459_v55 }
 0x54f   : >> { %v3784_v41 = vsel %vm4816_vm11, %v3007_v56, %v3536_v42  ;;  %v3537_v29 = vsel %vm3481_vm9, %v3386_v9, %v3388_v0 }
 0x550   : >> { %3900 = vst [vmem:[%s6484_s14 + $0x200] sm:$0xff] %v3784_v41  ;;  %v3785_v12 = vsel %vm4820_vm14, %v3008_v11, %v3537_v29  ;;  %v3016_v11 = vsel %vm2951_vm5, %v7933_v53, %v7935_v26  ;;  %v9461_v41 = vld [vmem:[#allocation151_spill] sm:$0xff] }
 0x551   : >> { %3901 = vst [vmem:[%s6484_s14 + $0x208] sm:$0xff] %v3785_v12  ;;  %v3390_v58 = vpop.permute.xlu0 %3389  ;;  %v3017_v29 = vsel %vm2951_vm5, %v7935_v26, %v9461_v41  ;;  %v9469_v41 = vld [vmem:[#allocation133_spill] sm:$0xff] }
 0x552   : >> { %v3538_v54 = vsel %vm3481_vm9, %v3388_v0, %v3390_v58  ;;  %v3392_v10 = vpop.permute.xlu1 %3391 }
 0x553   : >> { %v3786_v23 = vsel %vm4824_vm4, %v3009_v32, %v3538_v54  ;;  %v3539_v62 = vsel %vm3481_vm9, %v3390_v58, %v3392_v10  ;;  %v3203_v32 = vsel %vm3192_vm15, %v3017_v29, %v7965_v60  ;;  %v3024_v29 = vsel %vm2951_vm5, %v8006_v50, %v9469_v41 }
 0x554   : >> { %3902 = vst [vmem:[%s6484_s14 + $0x210] sm:$0xff] %v3786_v23  ;;  %v3787_v47 = vsel %vm4828_vm6, %v3010_v51, %v3539_v62  ;;  %v3018_v23 = vsel %vm2951_vm5, %v7967_v33, %v9462_v16 }
 0x555   : >> { %3903 = vst [vmem:[%s6484_s14 + $0x218] sm:$0xff] %v3787_v47  ;;  %v3394_v1 = vpop.permute.xlu0 %3393  ;;  %v9463_v47 = vld [vmem:[#allocation153_spill] sm:$0xff] }
 0x556   : >> { %v3540_v13 = vsel %vm3481_vm9, %v3392_v10, %v3394_v1  ;;  %v3396_v35 = vpop.permute.xlu1 %3395 }
 0x557   : >> { %v3788_v48 = vsel %vm4832_vm7, %v3202_v59, %v3540_v13  ;;  %v3541_v4 = vsel %vm3481_vm9, %v3394_v1, %v3396_v35  ;;  %v9464_v13 = vld [vmem:[#allocation125_spill] sm:$0xff] }
 0x558   : >> { %3904 = vst [vmem:[%s6484_s14 + $0x220] sm:$0xff] %v3788_v48  ;;  %v3789_v63 = vsel %vm4836_vm8, %v9457_v5, %v3541_v4  ;;  %v3019_v35 = vsel %vm2951_vm5, %v9462_v16, %v9464_v13  ;;  %v9465_v4 = vld [vmem:[#allocation91_spill] sm:$0xff] }
 0x559   : >> { %3905 = vst.msk [vmem:[%s6484_s14 + $0x228] sm:$0xff] %vm3841_vm13, %v3789_v63  ;;  %v3398_v18 = vpop.permute.xlu0 %3397 }
 0x55a   : >> { %v3700_v30 = vsel %vm3481_vm9, %v7949_v3, %v3398_v18  ;;  %v3400_v2 = vpop.permute.xlu1 %3399  ;;  %v3014_v3 = vsel %vm2951_vm5, %v9459_v55, %v9460_v14 }
 0x55b   : >> { %v3790_v52 = vsel %vm4812_vm10, %v3012_v46, %v3700_v30  ;;  %v3542_v44 = vsel %vm3481_vm9, %v3398_v18, %v3400_v2  ;;  %v9466_v30 = vld [vmem:[#allocation104_spill] sm:$0xff] }
 0x55c   : >> { %3906 = vst [vmem:[%s6484_s14 + $0x230] sm:$0xff] %v3790_v52  ;;  %v3791_v7 = vsel %vm4816_vm11, %v3013_v45, %v3542_v44  ;;  %v3022_v52 = vsel %vm2951_vm5, %v9466_v30, %v7973_v27  ;;  %v9467_v44 = vld [vmem:[#allocation105_spill] sm:$0xff] }
 0x55d   : >> { %3907 = vst [vmem:[%s6484_s14 + $0x238] sm:$0xff] %v3791_v7  ;;  %v3402_v8 = vpop.permute.xlu0 %3401  ;;  %v3023_v7 = vsel %vm2951_vm5, %v7973_v27, %v9467_v44  ;;  %v9477_v44 = vld [vmem:[#allocation52_spill] sm:$0xff] }
 0x55e   : >> { %v3543_v37 = vsel %vm3481_vm9, %v3400_v2, %v3402_v8  ;;  %v3404_v9 = vpop.permute.xlu1 %3403  ;;  %v3021_v2 = vsel %vm2951_vm5, %v9465_v4, %v9466_v30 }
 0x55f   : >> { %v3792_v56 = vsel %vm4820_vm14, %v3014_v3, %v3543_v37  ;;  %v3544_v42 = vsel %vm3481_vm9, %v3402_v8, %v3404_v9 }
 0x560   : >> { %3908 = vst [vmem:[%s6484_s14 + $0x240] sm:$0xff] %v3792_v56  ;;  %v3793_v0 = vsel %vm4824_vm4, %v3015_v38, %v3544_v42 }
 0x561   : >> { %3909 = vst [vmem:[%s6484_s14 + $0x248] sm:$0xff] %v3793_v0  ;;  %v3406_v15 = vpop.permute.xlu0 %3405 }
 0x562   : >> { %v3545_v12 = vsel %vm3481_vm9, %v3404_v9, %v3406_v15  ;;  %v3408_v58 = vpop.permute.xlu1 %3407  ;;  %v9468_v9 = vld [vmem:[#allocation108_spill] sm:$0xff] }
 0x563   : >> { %v3794_v54 = vsel %vm4828_vm6, %v3016_v11, %v3545_v12  ;;  %v3546_v10 = vsel %vm3481_vm9, %v3406_v15, %v3408_v58  ;;  %v3204_v38 = vsel %vm3192_vm15, %v3023_v7, %v9468_v9 }
 0x564   : >> { %3910 = vst [vmem:[%s6484_s14 + $0x250] sm:$0xff] %v3794_v54  ;;  %v3795_v53 = vsel %vm4832_vm7, %v3203_v32, %v3546_v10  ;;  %v9470_v32 = vld [vmem:[#allocation46_spill] sm:$0xff] }
 0x565   : >> { %3911 = vst [vmem:[%s6484_s14 + $0x258] sm:$0xff] %v3795_v53  ;;  %v3410_v51 = vpop.permute.xlu0 %3409  ;;  %v3025_v54 = vsel %vm2951_vm5, %v9469_v41, %v9470_v32 }
 0x566   : >> { %v3547_v26 = vsel %vm3481_vm9, %v3408_v58, %v3410_v51  ;;  %v3412_v6 = vpop.permute.xlu1 %3411 }
 0x567   : >> { %v3796_v62 = vsel %vm4836_vm8, %v7965_v60, %v3547_v26  ;;  %v3701_v1 = vsel %vm3481_vm9, %v9463_v47, %v3412_v6  ;;  %v3020_v60 = vsel %vm2951_vm5, %v9464_v13, %v9465_v4  ;;  %v9471_v26 = vld [vmem:[#allocation47_spill] sm:$0xff]  ;;  %v9474_v4 = vld [vmem:[#allocation146_spill] sm:$0xff] }
 0x568   : >> { %3912 = vst.msk [vmem:[%s6484_s14 + $0x260] sm:$0xff] %vm3841_vm13, %v3796_v62  ;;  %v3797_v5 = vsel %vm4812_vm10, %v3018_v23, %v3701_v1  ;;  %v9472_v23 = vld [vmem:[#allocation106_spill] sm:$0xff] }
 0x569   : >> { %3913 = vst [vmem:[%s6484_s14 + $0x268] sm:$0xff] %v3797_v5  ;;  %v3414_v59 = vpop.permute.xlu0 %3413  ;;  %v3027_v62 = vsel %vm2951_vm5, %v9471_v26, %v9472_v23  ;;  %v9481_v23 = vld [vmem:[#allocation93_spill] sm:$0xff] }
 0x56a   : >> { %v3548_v33 = vsel %vm3481_vm9, %v3412_v6, %v3414_v59  ;;  %v3416_v48 = vpop.permute.xlu1 %3415 }
 0x56b   : >> { %v3798_v63 = vsel %vm4816_vm11, %v3019_v35, %v3548_v33  ;;  %v3549_v18 = vsel %vm3481_vm9, %v3414_v59, %v3416_v48  ;;  %v9473_v33 = vld [vmem:[#allocation109_spill] sm:$0xff] }
 0x56c   : >> { %3914 = vst [vmem:[%s6484_s14 + $0x270] sm:$0xff] %v3798_v63  ;;  %v3799_v24 = vsel %vm4820_vm14, %v3020_v60, %v3549_v18 }
 0x56d   : >> { %3915 = vst [vmem:[%s6484_s14 + $0x278] sm:$0xff] %v3799_v24  ;;  %v3418_v46 = vpop.permute.xlu0 %3417 }
 0x56e   : >> { %v3550_v55 = vsel %vm3481_vm9, %v3416_v48, %v3418_v46  ;;  %v3420_v45 = vpop.permute.xlu1 %3419  ;;  %v3205_v48 = vsel %vm3192_vm15, %v9473_v33, %v8014_v21 }
 0x56f   : >> { %v3800_v8 = vsel %vm4824_vm4, %v3021_v2, %v3550_v55  ;;  %v3551_v14 = vsel %vm3481_vm9, %v3418_v46, %v3420_v45  ;;  %v9475_v2 = vld [vmem:[#allocation89_spill] sm:$0xff]  ;;  %v9476_v55 = vld [vmem:[#allocation152_spill] sm:$0xff] }
 0x570   : >> { %3916 = vst [vmem:[%s6484_s14 + $0x280] sm:$0xff] %v3800_v8  ;;  %v3801_v3 = vsel %vm4828_vm6, %v3022_v52, %v3551_v14 }
 0x571   : >> { %3917 = vst [vmem:[%s6484_s14 + $0x288] sm:$0xff] %v3801_v3  ;;  %v3422_v37 = vpop.permute.xlu0 %3421  ;;  %v9478_v3 = vld [vmem:[#allocation92_spill] sm:$0xff] }
 0x572   : >> { %v3552_v56 = vsel %vm3481_vm9, %v3420_v45, %v3422_v37  ;;  %v3424_v42 = vpop.permute.xlu1 %3423  ;;  %v3030_v45 = vsel %vm2951_vm5, %v9476_v55, %v9475_v2 }
 0x573   : >> { %v3802_v27 = vsel %vm4832_vm7, %v3204_v38, %v3552_v56  ;;  %v3553_v0 = vsel %vm3481_vm9, %v3422_v37, %v3424_v42  ;;  %v3031_v37 = vsel %vm2951_vm5, %v9475_v2, %v9478_v3  ;;  %v9485_v2 = vld [vmem:[#allocation107_spill] sm:$0xff] }
 0x574   : >> { %3918 = vst [vmem:[%s6484_s14 + $0x290] sm:$0xff] %v3802_v27  ;;  %v3803_v15 = vsel %vm4836_vm8, %v9468_v9, %v3553_v0 }
 0x575   : >> { %3919 = vst.msk [vmem:[%s6484_s14 + $0x298] sm:$0xff] %vm3841_vm13, %v3803_v15  ;;  %v3426_v11 = vpop.permute.xlu0 %3425 }
 0x576   : >> { %v3702_v12 = vsel %vm3481_vm9, %v8000_v43, %v3426_v11  ;;  %v3428_v58 = vpop.permute.xlu1 %3427  ;;  %v3026_v43 = vsel %vm2951_vm5, %v9470_v32, %v9471_v26 }
 0x577   : >> { %v3804_v10 = vsel %vm4812_vm10, %v3024_v29, %v3702_v12  ;;  %v3554_v53 = vsel %vm3481_vm9, %v3426_v11, %v3428_v58 }
 0x578   : >> { %3920 = vst [vmem:[%s6484_s14 + $0x2a0] sm:$0xff] %v3804_v10  ;;  %v3805_v51 = vsel %vm4816_vm11, %v3025_v54, %v3554_v53 }
 0x579   : >> { %3921 = vst [vmem:[%s6484_s14 + $0x2a8] sm:$0xff] %v3805_v51  ;;  %v3430_v50 = vpop.permute.xlu0 %3429 }
 0x57a   : >> { %v3555_v6 = vsel %vm3481_vm9, %v3428_v58, %v3430_v50  ;;  %v3432_v16 = vpop.permute.xlu1 %3431 }
 0x57b   : >> { %v3806_v47 = vsel %vm4820_vm14, %v3026_v43, %v3555_v6  ;;  %v3556_v1 = vsel %vm3481_vm9, %v3430_v50, %v3432_v16  ;;  %v9480_v43 = vld [vmem:[#allocation96_spill] sm:$0xff] }
 0x57c   : >> { %3922 = vst [vmem:[%s6484_s14 + $0x2b0] sm:$0xff] %v3806_v47  ;;  %v3807_v5 = vsel %vm4824_vm4, %v3027_v62, %v3556_v1  ;;  %v3037_v62 = vsel %vm2951_vm5, %v9480_v43, %v9481_v23 }
 0x57d   : >> { %3923 = vst [vmem:[%s6484_s14 + $0x2b8] sm:$0xff] %v3807_v5  ;;  %v3434_v59 = vpop.permute.xlu0 %3433  ;;  %v9482_v5 = vld [vmem:[#allocation141_spill] sm:$0xff] }
 0x57e   : >> { %v3557_v13 = vsel %vm3481_vm9, %v3432_v16, %v3434_v59  ;;  %v3436_v35 = vpop.permute.xlu1 %3435 }
 0x57f   : >> { %v3808_v60 = vsel %vm4828_vm6, %v9474_v4, %v3557_v13  ;;  %v3558_v63 = vsel %vm3481_vm9, %v3434_v59, %v3436_v35 }
 0x580   : >> { %3924 = vst [vmem:[%s6484_s14 + $0x2c0] sm:$0xff] %v3808_v60  ;;  %v3809_v18 = vsel %vm4832_vm7, %v3205_v48, %v3558_v63 }
 0x581   : >> { %3925 = vst [vmem:[%s6484_s14 + $0x2c8] sm:$0xff] %v3809_v18  ;;  %v3438_v24 = vpop.permute.xlu0 %3437 }
 0x582   : >> { %v3559_v46 = vsel %vm3481_vm9, %v3436_v35, %v3438_v24  ;;  %v3440_v30 = vpop.permute.xlu1 %3439  ;;  %v9483_v35 = vld [vmem:[#allocation53_spill] sm:$0xff] }
 0x583   : >> { %v3810_v52 = vsel %vm4836_vm8, %v8014_v21, %v3559_v46  ;;  %v3703_v7 = vsel %vm3481_vm9, %v9477_v44, %v3440_v30  ;;  %v9479_v21 = vld [vmem:[#allocation139_spill] sm:$0xff]  ;;  %v3039_v33 = vsel %vm2951_vm5, %v9482_v5, %v9483_v35 }
 0x584   : >> { %3926 = vst.msk [vmem:[%s6484_s14 + $0x2d0] sm:$0xff] %vm3841_vm13, %v3810_v52  ;;  %v3811_v8 = vsel %vm4812_vm10, %v3030_v45, %v3703_v7  ;;  %v3032_v56 = vsel %vm2951_vm5, %v9478_v3, %v9479_v21  ;;  %v3033_v11 = vsel %vm2951_vm5, %v9479_v21, %v7994_v36  ;;  %v3206_v36 = vsel %vm3192_vm15, %v8027_v57, %v8029_v28  ;;  %v9484_v46 = vld [vmem:[#allocation179_spill] sm:$0xff]  ;;  %v9487_v3 = vld [vmem:[#allocation114_spill] sm:$0xff] }
 0x585   : >> { %3927 = vst [vmem:[%s6484_s14 + $0x2d8] sm:$0xff] %v3811_v8  ;;  %v3442_v14 = vpop.permute.xlu0 %3441  ;;  %v3036_v57 = vsel %vm2951_vm5, %v8060_v17, %v9480_v43 }
 0x586   : >> { %v3560_v9 = vsel %vm3481_vm9, %v3440_v30, %v3442_v14  ;;  %v3444_v38 = vpop.permute.xlu1 %3443  ;;  %v3207_v30 = vsel %vm3192_vm15, %v9484_v46, %v8068_v49 }
 0x587   : >> { %v3812_v42 = vsel %vm4816_vm11, %v3031_v37, %v3560_v9  ;;  %v3561_v27 = vsel %vm3481_vm9, %v3442_v14, %v3444_v38  ;;  %v9486_v14 = vld [vmem:[#allocation138_spill] sm:$0xff] }
 0x588   : >> { %3928 = vst [vmem:[%s6484_s14 + $0x2e0] sm:$0xff] %v3812_v42  ;;  %v3813_v0 = vsel %vm4820_vm14, %v3032_v56, %v3561_v27  ;;  %v3042_v37 = vsel %vm2951_vm5, %v9487_v3, %v9486_v14  ;;  %v9489_v27 = vld [vmem:[#allocation140_spill] sm:$0xff] }
 0x589   : >> { %3929 = vst [vmem:[%s6484_s14 + $0x2e8] sm:$0xff] %v3813_v0  ;;  %v3446_v15 = vpop.permute.xlu0 %3445  ;;  %v3043_v0 = vsel %vm2951_vm5, %v9486_v14, %v9489_v27 }
 0x58a   : >> { %v3562_v41 = vsel %vm3481_vm9, %v3444_v38, %v3446_v15  ;;  %v3448_v29 = vpop.permute.xlu1 %3447  ;;  %v9488_v38 = vld [vmem:[#allocation111_spill] sm:$0xff] }
 0x58b   : >> { %v3814_v12 = vsel %vm4824_vm4, %v3033_v11, %v3562_v41  ;;  %v3563_v58 = vsel %vm3481_vm9, %v3446_v15, %v3448_v29 }
 0x58c   : >> { %3930 = vst [vmem:[%s6484_s14 + $0x2f0] sm:$0xff] %v3814_v12  ;;  %v3815_v32 = vsel %vm4828_vm6, %v8024_v39, %v3563_v58 }
 0x58d   : >> { %3931 = vst [vmem:[%s6484_s14 + $0x2f8] sm:$0xff] %v3815_v32  ;;  %v3450_v54 = vpop.permute.xlu0 %3449 }
 0x58e   : >> { %v3564_v10 = vsel %vm3481_vm9, %v3448_v29, %v3450_v54  ;;  %v3452_v53 = vpop.permute.xlu1 %3451 }
 0x58f   : >> { %v3816_v51 = vsel %vm4832_vm7, %v3206_v36, %v3564_v10  ;;  %v3565_v50 = vsel %vm3481_vm9, %v3450_v54, %v3452_v53  ;;  %v9491_v54 = vld [vmem:[#allocation110_spill] sm:$0xff] }
 0x590   : >> { %3932 = vst [vmem:[%s6484_s14 + $0x300] sm:$0xff] %v3816_v51  ;;  %v3817_v39 = vsel %vm4836_vm8, %v8029_v28, %v3565_v50 }
 0x591   : >> { %3933 = vst.msk [vmem:[%s6484_s14 + $0x308] sm:$0xff] %vm3841_vm13, %v3817_v39  ;;  %v3454_v26 = vpop.permute.xlu0 %3453  ;;  %v9492_v39 = vld [vmem:[#allocation112_spill] sm:$0xff] }
 0x592   : >> { %v3704_v6 = vsel %vm3481_vm9, %v8054_v40, %v3454_v26  ;;  %v3456_v16 = vpop.permute.xlu1 %3455  ;;  %v3038_v40 = vsel %vm2951_vm5, %v9481_v23, %v9482_v5 }
 0x593   : >> { %v3818_v28 = vsel %vm4812_vm10, %v3036_v57, %v3704_v6  ;;  %v3566_v47 = vsel %vm3481_vm9, %v3454_v26, %v3456_v16  ;;  %v9493_v57 = vld [vmem:[#allocation154_spill] sm:$0xff]  ;;  %v9494_v6 = vld [vmem:[#allocation183_spill] sm:$0xff] }
 0x594   : >> { %3934 = vst [vmem:[%s6484_s14 + $0x310] sm:$0xff] %v3818_v28  ;;  %v3819_v1 = vsel %vm4816_vm11, %v3037_v62, %v3566_v47 }
 0x595   : >> { %3935 = vst [vmem:[%s6484_s14 + $0x318] sm:$0xff] %v3819_v1  ;;  %v3458_v17 = vpop.permute.xlu0 %3457 }
 0x596   : >> { %v3567_v59 = vsel %vm3481_vm9, %v3456_v16, %v3458_v17  ;;  %v3460_v13 = vpop.permute.xlu1 %3459  ;;  %v3208_v16 = vsel %vm3192_vm15, %v9494_v6, %v9493_v57 }
 0x597   : >> { %v3820_v48 = vsel %vm4820_vm14, %v3038_v40, %v3567_v59  ;;  %v3568_v4 = vsel %vm3481_vm9, %v3458_v17, %v3460_v13 }
 0x598   : >> { %3936 = vst [vmem:[%s6484_s14 + $0x320] sm:$0xff] %v3820_v48  ;;  %v3821_v60 = vsel %vm4824_vm4, %v3039_v33, %v3568_v4 }
 0x599   : >> { %3937 = vst [vmem:[%s6484_s14 + $0x328] sm:$0xff] %v3821_v60  ;;  %v3462_v63 = vpop.permute.xlu0 %3461 }
 0x59a   : >> { %v3569_v18 = vsel %vm3481_vm9, %v3460_v13, %v3462_v63  ;;  %v3464_v24 = vpop.permute.xlu1 %3463 }
 0x59b   : >> { %v3822_v55 = vsel %vm4828_vm6, %v9485_v2, %v3569_v18  ;;  %v3570_v45 = vsel %vm3481_vm9, %v3462_v63, %v3464_v24 }
 0x59c   : >> { %3938 = vst [vmem:[%s6484_s14 + $0x330] sm:$0xff] %v3822_v55  ;;  %v3823_v52 = vsel %vm4832_vm7, %v3207_v30, %v3570_v45 }
 0x59d   : >> { %3939 = vst [vmem:[%s6484_s14 + $0x338] sm:$0xff] %v3823_v52  ;;  %v3466_v44 = vpop.permute.xlu0 %3465 }
 0x59e   : >> { %v3571_v7 = vsel %vm3481_vm9, %v3464_v24, %v3466_v44  ;;  %v3468_v8 = vpop.permute.xlu1 %3467 }
 0x59f   : >> { %v3824_v9 = vsel %vm4836_vm8, %v8068_v49, %v3571_v7  ;;  %v3705_v21 = vsel %vm3481_vm9, %v9488_v38, %v3468_v8  ;;  %v9490_v49 = vld [vmem:[#allocation48_spill] sm:$0xff] }
 0x5a0   : >> { %3940 = vst.msk [vmem:[%s6484_s14 + $0x340] sm:$0xff] %vm3841_vm13, %v3824_v9  ;;  %v3825_v56 = vsel %vm4812_vm10, %v3042_v37, %v3705_v21  ;;  %v3044_v41 = vsel %vm2951_vm5, %v9489_v27, %v9490_v49  ;;  %v3045_v36 = vsel %vm2951_vm5, %v9490_v49, %v9491_v54 }
 0x5a1   : >> { %3941 = vst [vmem:[%s6484_s14 + $0x348] sm:$0xff] %v3825_v56  ;;  %v3470_v42 = vpop.permute.xlu0 %3469 }
 0x5a2   : >> { %v3572_v15 = vsel %vm3481_vm9, %v3468_v8, %v3470_v42  ;;  %v3472_v11 = vpop.permute.xlu1 %3471 }
 0x5a3   : >> { %v3826_v29 = vsel %vm4816_vm11, %v3043_v0, %v3572_v15  ;;  %v3573_v12 = vsel %vm3481_vm9, %v3470_v42, %v3472_v11 }
 0x5a4   : >> { %3942 = vst [vmem:[%s6484_s14 + $0x350] sm:$0xff] %v3826_v29  ;;  %v3827_v58 = vsel %vm4820_vm14, %v3044_v41, %v3573_v12 }
 0x5a5   : >> { %3943 = vst [vmem:[%s6484_s14 + $0x358] sm:$0xff] %v3827_v58  ;;  %v3474_v32 = vpop.permute.xlu0 %3473 }
 0x5a6   : >> { %v3574_v10 = vsel %vm3481_vm9, %v3472_v11, %v3474_v32  ;;  %v3476_v53 = vpop.permute.xlu1 %3475 }
 0x5a7   : >> { %v3828_v51 = vsel %vm4824_vm4, %v3045_v36, %v3574_v10  ;;  %v3575_v50 = vsel %vm3481_vm9, %v3474_v32, %v3476_v53  ;;  %349 = sbr.rel (!%p347_p11) target bundleno = 62 (0x3e), region = 72 }
 0x5a8   : >> { %3944 = vst [vmem:[%s6484_s14 + $0x360] sm:$0xff] %v3828_v51  ;;  %v3829_v26 = vsel %vm4828_vm6, %v9492_v39, %v3575_v50 }
 0x5a9   : >> { %3945 = vst [vmem:[%s6484_s14 + $0x368] sm:$0xff] %v3829_v26  ;;  %v3478_v43 = vpop.permute.xlu0 %3477 }
 0x5aa   : >> { %v3576_v23 = vsel %vm3481_vm9, %v3476_v53, %v3478_v43  ;;  %v3480_v62 = vpop.permute.xlu1 %3479 }
 0x5ab   : >> { %v3830_v28 = vsel %vm4832_vm7, %v3208_v16, %v3576_v23  ;;  %v3577_v47 = vsel %vm3481_vm9, %v3478_v43, %v3480_v62 }
 0x5ac   : >> { %3946 = vst [vmem:[%s6484_s14 + $0x370] sm:$0xff] %v3830_v28  ;;  %v3831_v1 = vsel %vm4836_vm8, %v9493_v57, %v3577_v47 }
 0x5ad   : >> { %3947 = vst.msk [vmem:[%s6484_s14 + $0x378] sm:$0xff] %vm3841_vm13, %v3831_v1 }
 0x5ae   : > { %4423 = shalt.err (!%p4420_p4)
}
 0x5af   : > { %s4424_s21 = scalar_lea.hbm %s8616_s4, 114688  ;;  %s4428_s6 = scalar_lea.hbm %s8665_s2, 1835008 }
 0x5b0   : > { %p4425_p7 = scmp.ne.s32.totalorder %s8616_s4, %s4424_s21  ;;  %p4429_p10 = scmp.lt.u32.totalorder %s8616_s4, %s8665_s2 }
 0x5b1   : > { %p4430_p11 = scmp.lt.u32.totalorder %s4428_s6, %s4424_s21  ;;  %p4432_p13 = scmp.lt.u32.totalorder %s4424_s21, %s8616_s4 }
 0x5b2   : > { %p4426_p8 = pnand %p4425_p7, %p4550_p5 }
 0x5b3   : > { %p4431_p12 = por %p4430_p11, %p4429_p10 }
 0x5b4   : > { %p4427_p9 = pneg %p4426_p8 }
 0x5b5   : > { %p4433_p0 = por %p4432_p13, %p4431_p12 }
 0x5b7   : > { %p4434_p1 = pnand %p4433_p0, %p4427_p9 }
 0x5b9   : > { %4437 = shalt.err (!%p4434_p1)
}
 0x5ba   : > { %s4495_s8 = smov 896   ;;  %s4496_s14 = smov 56  }
 0x5bb   : > { %4309 = dma.vmem_to_hbm [thread:$0]  (%p4550_p5), %s8618_s24, 114688, %s8616_s4, %s8622_s28, %s4495_s8, %s4495_s8, %s4496_s14  }
 0x5bc PF: > { %p4315_p2 = scmp.ge.s32.totalorder %s4476_s12, 2  ;;  %s3978_s16 = sand.u32 1, %s4464_s9  }
 0x5bd   : > { %s3979_s17 = scalar_lea.sflag [#allocation3], %s3978_s16 }
 0x5be   : > { %p4312_p3 = pnand %p4315_p2, %p4554_p6 }
 0x5c0   : > { %4459 = dma.done.wait (!%p4312_p3), %s3979_s17, 114688  }
 0x5c1   : > { %4461 = vsyncadd (!%p4312_p3), %s3979_s17, 4294852608  ;;  %p12_p4 = scmp.ge.s32.totalorder %s4537_s15, 18   ;;  %s9495_s9 = smov %s4468_s10 }
 0x5c2   : > { %s9496_s10 = smov %s4472_s11  ;;  %s9497_s11 = smov %s4548_s18 }
 0x5c3   : > { %s9498_s12 = smov %s4537_s15  ;;  %14 = sbr.rel (!%p12_p4) target bundleno = 3 (0x3), region = 83 }
 0x5ca   :  { %3984 = vsyncpa [#allocation3], 1 }
 0x5cb   :  { %3986 = vsyncpa [#allocation3 + $0x1], 1 }

</bundles_post_ra>
